<compile_context>
chip_gen: v5e
topology: v5e:2x2
jax: 0.10.0
libtpu: 0.0.40
codegen_flags: <defaults>
</compile_context>

<pallas_src>
import numpy as np

import jax
import jax.numpy as jnp
from jax.experimental import pallas as pl
from jax.experimental.pallas import tpu as pltpu


_VMEM_LIMIT = 32 * 1024 * 1024
# Tap order (dy, dx) = (ky-1, kx-1), ky-major -- must match _prep_3x3 packing.
_TAPS = [(dy, dx) for dy in (-1, 0, 1) for dx in (-1, 0, 1)]


# ---------------------------------------------------------------------------
# One-time host-side preparation (weight repacking + border masks).
# ---------------------------------------------------------------------------

def _tap_masks(H, W):
    """(9, 1, H*W) f32 masks zeroing out-of-image (zero-padded) taps."""
    yy, xx = np.meshgrid(np.arange(H), np.arange(W), indexing="ij")
    ms = []
    for dy, dx in _TAPS:
        m = ((yy + dy >= 0) & (yy + dy < H) &
             (xx + dx >= 0) & (xx + dx < W))
        ms.append(m.reshape(1, H * W).astype(np.float32))
    return jnp.asarray(np.stack(ms, axis=0))


def _prep_1x1(w):                       # (Co, Ci, 1, 1) -> (Co, Ci)
    return jnp.asarray(w).reshape(w.shape[0], w.shape[1]).astype(jnp.float32)


def _prep_3x3(w):                       # (Co, Ci, 3, 3) -> (Co, 9*Ci) tap-major
    co, ci, k, _ = w.shape
    return (jnp.transpose(jnp.asarray(w), (0, 2, 3, 1))
            .reshape(co, k * k * ci).astype(jnp.float32))


def _prep_bias(b):                      # (Co,) -> (Co, 1)
    return jnp.asarray(b).reshape(-1, 1).astype(jnp.float32)


def _prep_head(layers, split=None):
    """Kernel-ready flat weight list [w0 piece(s)..., b0, w1, b1, w2, b2, w3, b3].

    3x3 weights are repacked to (C_out, 9*C_in) matching the stacked-tap
    scratch layout; `split=(c0, c1)` folds the torch.cat along C_in of the
    first 1x1 conv into two weight pieces (no materialized concat).
    """
    (w0, b0, k0), (w1, b1, k1), (w2, b2, k2), (w3, b3, k3) = layers
    assert (k0, k1, k2, k3) == (1, 3, 3, 1)
    w0m = _prep_1x1(w0)
    first = [w0m] if split is None else [w0m[:, :split[0]], w0m[:, split[0]:]]
    return first + [_prep_bias(b0), _prep_3x3(w1), _prep_bias(b1),
                    _prep_3x3(w2), _prep_bias(b2), _prep_1x1(w3), _prep_bias(b3)]


def prepare_local_poe_params(params, H, W):
    """Precompute kernel-ready weights + masks (static per shape, done once)."""
    Cp = params["pre"][0][0].shape[1]
    return {
        "masks": _tap_masks(H, W),
        "pre": _prep_head(params["pre"]),
        "spatial": [
            _prep_head(layers, split=(Cp, layers[0][0].shape[1] - Cp))
            for layers in params["spatial"]
        ],
    }


# ---------------------------------------------------------------------------
# Fused kernel: 3 CNN heads + logvar_tanh + PoE + reparameterize.
# ---------------------------------------------------------------------------

def _make_fused_kernel(Cs, H, W, n_spatial, head_n_w):
    HW = H * W
    n_in = 1 + n_spatial + 2 + sum(head_n_w)      # x, sf_i..., eps, masks, weights
    n_out = 5 if n_spatial > 0 else 3

    def kernel(*refs):
        it = iter(refs)
        x_ref = next(it)
        sf_refs = [next(it) for _ in range(n_spatial)]
        eps_ref = next(it)
        m_ref = next(it)                                      # (9, 1, HW) masks
        head_ws = [[next(it) for _ in range(nw)] for nw in head_n_w]
        outs = [next(it) for _ in range(n_out)]
        im_ref = next(it)                                     # (9*max_hidden, HW)

        def conv1x1(feats, ws, b):
            acc = jnp.dot(ws[0], feats[0], preferred_element_type=jnp.float32)
            for f, w in zip(feats[1:], ws[1:]):
                acc = acc + jnp.dot(w, f, preferred_element_type=jnp.float32)
            return jnp.maximum(acc + b, 0.0)

        def conv3x3(x, w2, b):
            # One deep-contraction matmul per layer: stack the 9 shifted +
            # masked taps into VMEM scratch, contract against (C_out, 9*C_in).
            cin = x.shape[0]
            for t, (dy, dx) in enumerate(_TAPS):
                shift = (-(dy * W + dx)) % HW                 # non-negative roll
                if shift == 0:
                    xs = x                                    # center tap: always valid
                else:
                    xs = pltpu.roll(x, shift, axis=1) * m_ref[t]
                im_ref[t * cin:(t + 1) * cin, :] = xs
            acc = jnp.dot(w2, im_ref[0:9 * cin, :],
                          preferred_element_type=jnp.float32) + b
            return jnp.maximum(acc, 0.0)

        def run_head(feats, wrefs):
            ws = [r[...] for r in wrefs]
            nf = len(feats)
            h = conv1x1(feats, ws[:nf], ws[nf])               # 1x1 (folded concat)
            h = conv3x3(h, ws[nf + 1], ws[nf + 2])            # 3x3
            h = conv3x3(h, ws[nf + 3], ws[nf + 4])            # 3x3
            o = conv1x1([h], [ws[nf + 5]], ws[nf + 6])        # 1x1 -> (2*Cs, HW)
            return o[:Cs, :], o[Cs:, :]                       # in-vreg channel split

        x = x_ref[...]
        eps = eps_ref[...]

        mu0, lv0 = run_head([x], head_ws[0])
        lv0t = jnp.tanh(lv0)                                  # logvar_tanh, theta = 1

        if n_spatial == 0:
            e = jnp.exp(lv0t)
            outs[0][...] = eps * (e * e) + mu0                # std = exp(logvar)^2
            outs[1][...] = mu0
            outs[2][...] = lv0t
            return

        mus, lvts = [mu0], [lv0t]
        for i in range(n_spatial):
            sf = sf_refs[i][...]
            mu_i, lv_i = run_head([x, sf], head_ws[1 + i])
            mus.append(mu_i)
            lvts.append(10.0 * jnp.tanh(lv_i * (1.0 / 10.0)))  # theta = 10

        # PoE: precision-weighted Gaussian product (no prior).
        precs = [jnp.exp(-lvt) for lvt in lvts]
        tsum = precs[0]
        num = mus[0] * precs[0]
        for mu_i, p_i in zip(mus[1:], precs[1:]):
            tsum = tsum + p_i
            num = num + mu_i * p_i

        inv = pl.reciprocal(tsum, approx=True)                # EUP vrcp
        inv = inv * (2.0 - tsum * inv)                        # 1 Newton step (VALU)
        mu_poe = num * inv
        lv_poe = -jnp.log(tsum)
        std = inv * inv                                       # == exp(lv_poe)^2, no exp

        outs[0][...] = eps * std + mu_poe                     # z
        outs[1][...] = mu0
        outs[2][...] = lv0t
        outs[3][...] = mu_poe
        outs[4][...] = lv_poe

    return kernel, n_in, n_out


def _flatten(a):
    n, c, h, w = a.shape
    return a.reshape(n, c, h * w).astype(jnp.float32)


def _local_poe_net_forward(kp, up_pre_out, spatial_feats, eps):
    N, Cp, H, W = up_pre_out.shape
    HW = H * W
    Cs = eps.shape[1]
    unflat = lambda a: a.reshape(N, Cs, H, W)

    x_flat = _flatten(up_pre_out)
    eps_flat = _flatten(eps)
    sf_flats = ([] if spatial_feats is None
                else [_flatten(sf) for sf in spatial_feats])
    n_spatial = len(sf_flats)

    heads = [kp["pre"]] + list(kp["spatial"][:n_spatial])
    head_n_w = [len(h) for h in heads]
    # hidden dim of each head's 3x3 convs = rows of its repacked w1.
    max_hidden = max(h[len(h) - 6].shape[0] for h in heads)
    masks = kp["masks"]

    kernel, n_in, n_out = _make_fused_kernel(Cs, H, W, n_spatial, head_n_w)

    batch_spec = lambda c: pl.BlockSpec((None, c, HW), lambda n: (n, 0, 0))
    in_specs = ([batch_spec(Cp)]
                + [batch_spec(sf.shape[1]) for sf in sf_flats]
                + [batch_spec(Cs)]
                + [pl.BlockSpec(masks.shape, lambda n: (0, 0, 0))]
                + [pl.BlockSpec(a.shape, lambda n: (0, 0))
                   for h in heads for a in h])
    out_specs = tuple([batch_spec(Cs)] * n_out)
    out_shape = tuple(jax.ShapeDtypeStruct((N, Cs, HW), jnp.float32)
                      for _ in range(n_out))

    operands = ([x_flat] + sf_flats + [eps_flat, masks]
                + [a for h in heads for a in h])
    assert len(operands) == n_in

    outs = pl.pallas_call(
        kernel,
        out_shape=out_shape,
        grid_spec=pltpu.PrefetchScalarGridSpec(
            num_scalar_prefetch=0,
            grid=(N,),                                         # >=2 -> both v7x TCs busy
            in_specs=in_specs,
            out_specs=out_specs,
            scratch_shapes=[pltpu.VMEM((9 * max_hidden, HW), jnp.float32)],
        ),
        compiler_params=pltpu.CompilerParams(
            dimension_semantics=("parallel",),
            vmem_limit_bytes=_VMEM_LIMIT,
        ),
    )(*operands)

    if n_spatial == 0:
        z, mu0, lv0t = outs
        pre_stats = [unflat(mu0), unflat(lv0t)]
        return unflat(z), [pre_stats, pre_stats]

    z, mu0, lv0t, mu_poe, lv_poe = outs
    return unflat(z), [[unflat(mu0), unflat(lv0t)],
                       [unflat(mu_poe), unflat(lv_poe)]]


local_poe_net_forward = jax.jit(_local_poe_net_forward)


# ---------------------------------------------------------------------------
# Parameters + pure-JAX reference
# ---------------------------------------------------------------------------

def _init_conv(key, c_in, c_out, k):
    kw, kb = jax.random.split(key)
    w = jax.random.normal(kw, (c_out, c_in, k, k), jnp.float32) / np.sqrt(c_in * k * k)
    b = 0.1 * jax.random.normal(kb, (c_out,), jnp.float32)
    return w, b


def _init_head(key, c_in, c_out):
    hidden = c_in // 4
    sizes = [(c_in, hidden, 1), (hidden, hidden, 3),
             (hidden, hidden, 3), (hidden, 2 * c_out, 1)]
    keys = jax.random.split(key, len(sizes))
    return [(*_init_conv(kk, ci, co, ks), ks)
            for kk, (ci, co, ks) in zip(keys, sizes)]


def _conv_ref(x, w, b, k):
    pad = (k - 1) // 2
    out = jax.lax.conv_general_dilated(
        x, w, window_strides=(1, 1), padding=[(pad, pad), (pad, pad)],
        dimension_numbers=("NCHW", "OIHW", "NCHW"),
        precision=jax.lax.Precision.HIGHEST)
    return jnp.maximum(out + b.reshape(1, -1, 1, 1), 0.0)


def _head_ref(layers, x):
    for (w, b, k) in layers:
        x = _conv_ref(x, w, b, k)
    return x


def local_poe_net_reference(params, up_pre_out, spatial_feats, eps):
    Cs = params["spatial_channel"]
    pre = _head_ref(params["pre"], up_pre_out)
    mu0, lv0 = pre[:, :Cs], pre[:, Cs:]
    lv0t = jnp.tanh(lv0)
    if spatial_feats is None:
        std = jnp.exp(lv0t) ** 2
        return eps * std + mu0, [[mu0, lv0t], [mu0, lv0t]]
    mus, lvs = [mu0], [lv0t]
    for i, sf in enumerate(spatial_feats):
        o = _head_ref(params["spatial"][i],
                      jnp.concatenate([up_pre_out, sf], axis=1))
        mus.append(o[:, :Cs])
        lvs.append(10.0 * jnp.tanh(o[:, Cs:] / 10.0))
    precs = [jnp.exp(-lv) for lv in lvs]
    tsum = sum(precs)
    mu = sum(m * t for m, t in zip(mus, precs)) / tsum
    logvar = -jnp.log(tsum)
    std = jnp.exp(logvar) ** 2
    return eps * std + mu, [[mu0, lv0t], [mu, logvar]]


# ---------------------------------------------------------------------------

if __name__ == "__main__":
    key = jax.random.PRNGKey(0)
    N, H, W = 2, 16, 16
    pre_out_channel, spatial_channel = 8, 4

    k_pre, k_s1, k_s2, k_x, k_f1, k_f2, k_eps = jax.random.split(key, 7)
    params = {
        "spatial_channel": spatial_channel,
        "pre": _init_head(k_pre, pre_out_channel, spatial_channel),
        "spatial": [
            _init_head(k_s1, pre_out_channel + spatial_channel, spatial_channel),
            _init_head(k_s2, pre_out_channel + spatial_channel, spatial_channel),
        ],
    }

    up_pre_out = jax.random.normal(k_x, (N, pre_out_channel, H, W), jnp.float32)
    spatial_feats = [
        jax.random.normal(k_f1, (N, spatial_channel, H, W), jnp.float32),
        jax.random.normal(k_f2, (N, spatial_channel, H, W), jnp.float32),
    ]
    eps = jax.random.normal(k_eps, (N, spatial_channel, H, W), jnp.float32)

    # One-time repacking of weights / masks for the kernel.
    kparams = prepare_local_poe_params(params, H, W)

    z, (pre_stats, poe_stats) = local_poe_net_forward(
        kparams, up_pre_out, spatial_feats, eps)
    z = jax.block_until_ready(z)

    z_ref, (pre_ref, poe_ref) = local_poe_net_reference(
        params, up_pre_out, spatial_feats, eps)

    def check(a, b):
        assert a.shape == b.shape, (a.shape, b.shape)
        assert jnp.allclose(a, b, atol=1e-3, rtol=1e-3), \
            float(jnp.max(jnp.abs(a - b)))

    check(z, z_ref)
    check(pre_stats[0], pre_ref[0])
    check(pre_stats[1], pre_ref[1])
    check(poe_stats[0], poe_ref[0])
    check(poe_stats[1], poe_ref[1])

    # spatial_feats = None branch
    z_n, (pre_n, poe_n) = local_poe_net_forward(kparams, up_pre_out, None, eps)
    z_n = jax.block_until_ready(z_n)
    z_nr, (pre_nr, poe_nr) = local_poe_net_reference(params, up_pre_out, None, eps)
    check(z_n, z_nr)
    check(pre_n[0], pre_nr[0])
    check(pre_n[1], pre_nr[1])
    check(poe_n[0], poe_nr[0])
    check(poe_n[1], poe_nr[1])

    print("KERNEL_OK")
</pallas_src>

<mosaic_0001>
module attributes {stable_mosaic.version = 11 : i64} {
  func.func @kernel(%arg0: i32, %arg1: memref<1x8x256xf32, #tpu.memory_space<vmem>>, %arg2: memref<1x4x256xf32, #tpu.memory_space<vmem>>, %arg3: memref<1x4x256xf32, #tpu.memory_space<vmem>>, %arg4: memref<1x4x256xf32, #tpu.memory_space<vmem>>, %arg5: memref<9x1x256xf32, #tpu.memory_space<vmem>>, %arg6: memref<2x8xf32, #tpu.memory_space<vmem>>, %arg7: memref<2x1xf32, #tpu.memory_space<vmem>>, %arg8: memref<2x18xf32, #tpu.memory_space<vmem>>, %arg9: memref<2x1xf32, #tpu.memory_space<vmem>>, %arg10: memref<2x18xf32, #tpu.memory_space<vmem>>, %arg11: memref<2x1xf32, #tpu.memory_space<vmem>>, %arg12: memref<8x2xf32, #tpu.memory_space<vmem>>, %arg13: memref<8x1xf32, #tpu.memory_space<vmem>>, %arg14: memref<3x8xf32, #tpu.memory_space<vmem>>, %arg15: memref<3x4xf32, #tpu.memory_space<vmem>>, %arg16: memref<3x1xf32, #tpu.memory_space<vmem>>, %arg17: memref<3x27xf32, #tpu.memory_space<vmem>>, %arg18: memref<3x1xf32, #tpu.memory_space<vmem>>, %arg19: memref<3x27xf32, #tpu.memory_space<vmem>>, %arg20: memref<3x1xf32, #tpu.memory_space<vmem>>, %arg21: memref<8x3xf32, #tpu.memory_space<vmem>>, %arg22: memref<8x1xf32, #tpu.memory_space<vmem>>, %arg23: memref<3x8xf32, #tpu.memory_space<vmem>>, %arg24: memref<3x4xf32, #tpu.memory_space<vmem>>, %arg25: memref<3x1xf32, #tpu.memory_space<vmem>>, %arg26: memref<3x27xf32, #tpu.memory_space<vmem>>, %arg27: memref<3x1xf32, #tpu.memory_space<vmem>>, %arg28: memref<3x27xf32, #tpu.memory_space<vmem>>, %arg29: memref<3x1xf32, #tpu.memory_space<vmem>>, %arg30: memref<8x3xf32, #tpu.memory_space<vmem>>, %arg31: memref<8x1xf32, #tpu.memory_space<vmem>>, %arg32: memref<1x4x256xf32, #tpu.memory_space<vmem>>, %arg33: memref<1x4x256xf32, #tpu.memory_space<vmem>>, %arg34: memref<1x4x256xf32, #tpu.memory_space<vmem>>, %arg35: memref<1x4x256xf32, #tpu.memory_space<vmem>>, %arg36: memref<1x4x256xf32, #tpu.memory_space<vmem>>, %arg37: memref<27x256xf32, #tpu.memory_space<vmem>>) attributes {dimension_semantics = [#tpu.dimension_semantics<parallel>], iteration_bounds = array<i64: 2>, scalar_prefetch = 0 : i64, scratch_operands = 1 : i64, tpu.core_type = #tpu.core_type<tc>, window_params = [{transform_indices = @transform_0, window_bounds = array<i64: 1, 8, 256>}, {transform_indices = @transform_1, window_bounds = array<i64: 1, 4, 256>}, {transform_indices = @transform_2, window_bounds = array<i64: 1, 4, 256>}, {transform_indices = @transform_3, window_bounds = array<i64: 1, 4, 256>}, {pipeline_mode = #tpu.pipeline_mode<synchronous>, transform_indices = @transform_4, window_bounds = array<i64: 9, 1, 256>}, {pipeline_mode = #tpu.pipeline_mode<synchronous>, transform_indices = @transform_5, window_bounds = array<i64: 2, 8>}, {pipeline_mode = #tpu.pipeline_mode<synchronous>, transform_indices = @transform_6, window_bounds = array<i64: 2, 1>}, {pipeline_mode = #tpu.pipeline_mode<synchronous>, transform_indices = @transform_7, window_bounds = array<i64: 2, 18>}, {pipeline_mode = #tpu.pipeline_mode<synchronous>, transform_indices = @transform_8, window_bounds = array<i64: 2, 1>}, {pipeline_mode = #tpu.pipeline_mode<synchronous>, transform_indices = @transform_9, window_bounds = array<i64: 2, 18>}, {pipeline_mode = #tpu.pipeline_mode<synchronous>, transform_indices = @transform_10, window_bounds = array<i64: 2, 1>}, {pipeline_mode = #tpu.pipeline_mode<synchronous>, transform_indices = @transform_11, window_bounds = array<i64: 8, 2>}, {pipeline_mode = #tpu.pipeline_mode<synchronous>, transform_indices = @transform_12, window_bounds = array<i64: 8, 1>}, {pipeline_mode = #tpu.pipeline_mode<synchronous>, transform_indices = @transform_13, window_bounds = array<i64: 3, 8>}, {pipeline_mode = #tpu.pipeline_mode<synchronous>, transform_indices = @transform_14, window_bounds = array<i64: 3, 4>}, {pipeline_mode = #tpu.pipeline_mode<synchronous>, transform_indices = @transform_15, window_bounds = array<i64: 3, 1>}, {pipeline_mode = #tpu.pipeline_mode<synchronous>, transform_indices = @transform_16, window_bounds = array<i64: 3, 27>}, {pipeline_mode = #tpu.pipeline_mode<synchronous>, transform_indices = @transform_17, window_bounds = array<i64: 3, 1>}, {pipeline_mode = #tpu.pipeline_mode<synchronous>, transform_indices = @transform_18, window_bounds = array<i64: 3, 27>}, {pipeline_mode = #tpu.pipeline_mode<synchronous>, transform_indices = @transform_19, window_bounds = array<i64: 3, 1>}, {pipeline_mode = #tpu.pipeline_mode<synchronous>, transform_indices = @transform_20, window_bounds = array<i64: 8, 3>}, {pipeline_mode = #tpu.pipeline_mode<synchronous>, transform_indices = @transform_21, window_bounds = array<i64: 8, 1>}, {pipeline_mode = #tpu.pipeline_mode<synchronous>, transform_indices = @transform_22, window_bounds = array<i64: 3, 8>}, {pipeline_mode = #tpu.pipeline_mode<synchronous>, transform_indices = @transform_23, window_bounds = array<i64: 3, 4>}, {pipeline_mode = #tpu.pipeline_mode<synchronous>, transform_indices = @transform_24, window_bounds = array<i64: 3, 1>}, {pipeline_mode = #tpu.pipeline_mode<synchronous>, transform_indices = @transform_25, window_bounds = array<i64: 3, 27>}, {pipeline_mode = #tpu.pipeline_mode<synchronous>, transform_indices = @transform_26, window_bounds = array<i64: 3, 1>}, {pipeline_mode = #tpu.pipeline_mode<synchronous>, transform_indices = @transform_27, window_bounds = array<i64: 3, 27>}, {pipeline_mode = #tpu.pipeline_mode<synchronous>, transform_indices = @transform_28, window_bounds = array<i64: 3, 1>}, {pipeline_mode = #tpu.pipeline_mode<synchronous>, transform_indices = @transform_29, window_bounds = array<i64: 8, 3>}, {pipeline_mode = #tpu.pipeline_mode<synchronous>, transform_indices = @transform_30, window_bounds = array<i64: 8, 1>}, {transform_indices = @transform_31, window_bounds = array<i64: 1, 4, 256>}, {transform_indices = @transform_32, window_bounds = array<i64: 1, 4, 256>}, {transform_indices = @transform_33, window_bounds = array<i64: 1, 4, 256>}, {transform_indices = @transform_34, window_bounds = array<i64: 1, 4, 256>}, {transform_indices = @transform_35, window_bounds = array<i64: 1, 4, 256>}]} {
    %c0 = arith.constant 0 : index
    %c0_0 = arith.constant 0 : index
    %c0_1 = arith.constant 0 : index
    %0 = vector.load %arg1[%c0, %c0_0, %c0_1] : memref<1x8x256xf32, #tpu.memory_space<vmem>>, vector<1x8x256xf32>
    %1 = vector.shape_cast %0 : vector<1x8x256xf32> to vector<8x256xf32>
    %c0_2 = arith.constant 0 : index
    %c0_3 = arith.constant 0 : index
    %c0_4 = arith.constant 0 : index
    %2 = vector.load %arg4[%c0_2, %c0_3, %c0_4] : memref<1x4x256xf32, #tpu.memory_space<vmem>>, vector<1x4x256xf32>
    %3 = vector.shape_cast %2 : vector<1x4x256xf32> to vector<4x256xf32>
    %c0_5 = arith.constant 0 : index
    %c0_6 = arith.constant 0 : index
    %4 = vector.load %arg6[%c0_5, %c0_6] : memref<2x8xf32, #tpu.memory_space<vmem>>, vector<2x8xf32>
    %c0_7 = arith.constant 0 : index
    %c0_8 = arith.constant 0 : index
    %5 = vector.load %arg7[%c0_7, %c0_8] : memref<2x1xf32, #tpu.memory_space<vmem>>, vector<2x1xf32>
    %c0_9 = arith.constant 0 : index
    %c0_10 = arith.constant 0 : index
    %6 = vector.load %arg8[%c0_9, %c0_10] : memref<2x18xf32, #tpu.memory_space<vmem>>, vector<2x18xf32>
    %c0_11 = arith.constant 0 : index
    %c0_12 = arith.constant 0 : index
    %7 = vector.load %arg9[%c0_11, %c0_12] : memref<2x1xf32, #tpu.memory_space<vmem>>, vector<2x1xf32>
    %c0_13 = arith.constant 0 : index
    %c0_14 = arith.constant 0 : index
    %8 = vector.load %arg10[%c0_13, %c0_14] : memref<2x18xf32, #tpu.memory_space<vmem>>, vector<2x18xf32>
    %c0_15 = arith.constant 0 : index
    %c0_16 = arith.constant 0 : index
    %9 = vector.load %arg11[%c0_15, %c0_16] : memref<2x1xf32, #tpu.memory_space<vmem>>, vector<2x1xf32>
    %c0_17 = arith.constant 0 : index
    %c0_18 = arith.constant 0 : index
    %10 = vector.load %arg12[%c0_17, %c0_18] : memref<8x2xf32, #tpu.memory_space<vmem>>, vector<8x2xf32>
    %c0_19 = arith.constant 0 : index
    %c0_20 = arith.constant 0 : index
    %11 = vector.load %arg13[%c0_19, %c0_20] : memref<8x1xf32, #tpu.memory_space<vmem>>, vector<8x1xf32>
    %cst = arith.constant dense<0.000000e+00> : vector<2x256xf32>
    %12 = tpu.matmul %4, %1, %cst {dimension_numbers = #tpu.dot_dimension_numbers<[1], [0], [0], [1], [0, 0, 1, 1], [], []>} : vector<2x8xf32>, vector<8x256xf32>, vector<2x256xf32> -> vector<2x256xf32>
    %13 = vector.broadcast %5 : vector<2x1xf32> to vector<2x256xf32>
    %14 = arith.addf %12, %13 : vector<2x256xf32>
    %cst_21 = arith.constant 0.000000e+00 : f32
    %15 = vector.broadcast %cst_21 : f32 to vector<2x256xf32>
    %16 = arith.maximumf %14, %15 : vector<2x256xf32>
    %c17_i32 = arith.constant 17 : i32
    %17 = tpu.dynamic_rotate %16 by %c17_i32 dim 1 : vector<2x256xf32>, i32 -> vector<2x256xf32>
    %c0_22 = arith.constant 0 : index
    %c0_23 = arith.constant 0 : index
    %c0_24 = arith.constant 0 : index
    %18 = vector.load %arg5[%c0_22, %c0_23, %c0_24] : memref<9x1x256xf32, #tpu.memory_space<vmem>>, vector<1x1x256xf32>
    %19 = vector.shape_cast %18 : vector<1x1x256xf32> to vector<1x256xf32>
    %20 = vector.broadcast %19 : vector<1x256xf32> to vector<2x256xf32>
    %21 = arith.mulf %17, %20 : vector<2x256xf32>
    %c0_25 = arith.constant 0 : index
    %c0_26 = arith.constant 0 : index
    %22 = vector.load %arg37[%c0_25, %c0_26] : memref<27x256xf32, #tpu.memory_space<vmem>>, vector<2x256xf32>
    tpu.vector_store %arg37[%c0_25, %c0_26], %21 {strides = array<i32>} : memref<27x256xf32, #tpu.memory_space<vmem>>, vector<2x256xf32>,
    %c16_i32 = arith.constant 16 : i32
    %23 = tpu.dynamic_rotate %16 by %c16_i32 dim 1 : vector<2x256xf32>, i32 -> vector<2x256xf32>
    %c1 = arith.constant 1 : index
    %c0_27 = arith.constant 0 : index
    %c0_28 = arith.constant 0 : index
    %24 = vector.load %arg5[%c1, %c0_27, %c0_28] : memref<9x1x256xf32, #tpu.memory_space<vmem>>, vector<1x1x256xf32>
    %25 = vector.shape_cast %24 : vector<1x1x256xf32> to vector<1x256xf32>
    %26 = vector.broadcast %25 : vector<1x256xf32> to vector<2x256xf32>
    %27 = arith.mulf %23, %26 : vector<2x256xf32>
    %c2 = arith.constant 2 : index
    %c0_29 = arith.constant 0 : index
    %28 = vector.load %arg37[%c2, %c0_29] : memref<27x256xf32, #tpu.memory_space<vmem>>, vector<2x256xf32>
    tpu.vector_store %arg37[%c2, %c0_29], %27 {strides = array<i32>} : memref<27x256xf32, #tpu.memory_space<vmem>>, vector<2x256xf32>,
    %c15_i32 = arith.constant 15 : i32
    %29 = tpu.dynamic_rotate %16 by %c15_i32 dim 1 : vector<2x256xf32>, i32 -> vector<2x256xf32>
    %c2_30 = arith.constant 2 : index
    %c0_31 = arith.constant 0 : index
    %c0_32 = arith.constant 0 : index
    %30 = vector.load %arg5[%c2_30, %c0_31, %c0_32] : memref<9x1x256xf32, #tpu.memory_space<vmem>>, vector<1x1x256xf32>
    %31 = vector.shape_cast %30 : vector<1x1x256xf32> to vector<1x256xf32>
    %32 = vector.broadcast %31 : vector<1x256xf32> to vector<2x256xf32>
    %33 = arith.mulf %29, %32 : vector<2x256xf32>
    %c4 = arith.constant 4 : index
    %c0_33 = arith.constant 0 : index
    %34 = vector.load %arg37[%c4, %c0_33] : memref<27x256xf32, #tpu.memory_space<vmem>>, vector<2x256xf32>
    tpu.vector_store %arg37[%c4, %c0_33], %33 {strides = array<i32>} : memref<27x256xf32, #tpu.memory_space<vmem>>, vector<2x256xf32>,
    %c1_i32 = arith.constant 1 : i32
    %35 = tpu.dynamic_rotate %16 by %c1_i32 dim 1 : vector<2x256xf32>, i32 -> vector<2x256xf32>
    %c3 = arith.constant 3 : index
    %c0_34 = arith.constant 0 : index
    %c0_35 = arith.constant 0 : index
    %36 = vector.load %arg5[%c3, %c0_34, %c0_35] : memref<9x1x256xf32, #tpu.memory_space<vmem>>, vector<1x1x256xf32>
    %37 = vector.shape_cast %36 : vector<1x1x256xf32> to vector<1x256xf32>
    %38 = vector.broadcast %37 : vector<1x256xf32> to vector<2x256xf32>
    %39 = arith.mulf %35, %38 : vector<2x256xf32>
    %c6 = arith.constant 6 : index
    %c0_36 = arith.constant 0 : index
    %40 = vector.load %arg37[%c6, %c0_36] : memref<27x256xf32, #tpu.memory_space<vmem>>, vector<2x256xf32>
    tpu.vector_store %arg37[%c6, %c0_36], %39 {strides = array<i32>} : memref<27x256xf32, #tpu.memory_space<vmem>>, vector<2x256xf32>,
    %c8 = arith.constant 8 : index
    %c0_37 = arith.constant 0 : index
    %41 = vector.load %arg37[%c8, %c0_37] : memref<27x256xf32, #tpu.memory_space<vmem>>, vector<2x256xf32>
    tpu.vector_store %arg37[%c8, %c0_37], %16 {strides = array<i32>} : memref<27x256xf32, #tpu.memory_space<vmem>>, vector<2x256xf32>,
    %c255_i32 = arith.constant 255 : i32
    %42 = tpu.dynamic_rotate %16 by %c255_i32 dim 1 : vector<2x256xf32>, i32 -> vector<2x256xf32>
    %c5 = arith.constant 5 : index
    %c0_38 = arith.constant 0 : index
    %c0_39 = arith.constant 0 : index
    %43 = vector.load %arg5[%c5, %c0_38, %c0_39] : memref<9x1x256xf32, #tpu.memory_space<vmem>>, vector<1x1x256xf32>
    %44 = vector.shape_cast %43 : vector<1x1x256xf32> to vector<1x256xf32>
    %45 = vector.broadcast %44 : vector<1x256xf32> to vector<2x256xf32>
    %46 = arith.mulf %42, %45 : vector<2x256xf32>
    %c10 = arith.constant 10 : index
    %c0_40 = arith.constant 0 : index
    %47 = vector.load %arg37[%c10, %c0_40] : memref<27x256xf32, #tpu.memory_space<vmem>>, vector<2x256xf32>
    tpu.vector_store %arg37[%c10, %c0_40], %46 {strides = array<i32>} : memref<27x256xf32, #tpu.memory_space<vmem>>, vector<2x256xf32>,
    %c241_i32 = arith.constant 241 : i32
    %48 = tpu.dynamic_rotate %16 by %c241_i32 dim 1 : vector<2x256xf32>, i32 -> vector<2x256xf32>
    %c6_41 = arith.constant 6 : index
    %c0_42 = arith.constant 0 : index
    %c0_43 = arith.constant 0 : index
    %49 = vector.load %arg5[%c6_41, %c0_42, %c0_43] : memref<9x1x256xf32, #tpu.memory_space<vmem>>, vector<1x1x256xf32>
    %50 = vector.shape_cast %49 : vector<1x1x256xf32> to vector<1x256xf32>
    %51 = vector.broadcast %50 : vector<1x256xf32> to vector<2x256xf32>
    %52 = arith.mulf %48, %51 : vector<2x256xf32>
    %c12 = arith.constant 12 : index
    %c0_44 = arith.constant 0 : index
    %53 = vector.load %arg37[%c12, %c0_44] : memref<27x256xf32, #tpu.memory_space<vmem>>, vector<2x256xf32>
    tpu.vector_store %arg37[%c12, %c0_44], %52 {strides = array<i32>} : memref<27x256xf32, #tpu.memory_space<vmem>>, vector<2x256xf32>,
    %c240_i32 = arith.constant 240 : i32
    %54 = tpu.dynamic_rotate %16 by %c240_i32 dim 1 : vector<2x256xf32>, i32 -> vector<2x256xf32>
    %c7 = arith.constant 7 : index
    %c0_45 = arith.constant 0 : index
    %c0_46 = arith.constant 0 : index
    %55 = vector.load %arg5[%c7, %c0_45, %c0_46] : memref<9x1x256xf32, #tpu.memory_space<vmem>>, vector<1x1x256xf32>
    %56 = vector.shape_cast %55 : vector<1x1x256xf32> to vector<1x256xf32>
    %57 = vector.broadcast %56 : vector<1x256xf32> to vector<2x256xf32>
    %58 = arith.mulf %54, %57 : vector<2x256xf32>
    %c14 = arith.constant 14 : index
    %c0_47 = arith.constant 0 : index
    %59 = vector.load %arg37[%c14, %c0_47] : memref<27x256xf32, #tpu.memory_space<vmem>>, vector<2x256xf32>
    tpu.vector_store %arg37[%c14, %c0_47], %58 {strides = array<i32>} : memref<27x256xf32, #tpu.memory_space<vmem>>, vector<2x256xf32>,
    %c239_i32 = arith.constant 239 : i32
    %60 = tpu.dynamic_rotate %16 by %c239_i32 dim 1 : vector<2x256xf32>, i32 -> vector<2x256xf32>
    %c8_48 = arith.constant 8 : index
    %c0_49 = arith.constant 0 : index
    %c0_50 = arith.constant 0 : index
    %61 = vector.load %arg5[%c8_48, %c0_49, %c0_50] : memref<9x1x256xf32, #tpu.memory_space<vmem>>, vector<1x1x256xf32>
    %62 = vector.shape_cast %61 : vector<1x1x256xf32> to vector<1x256xf32>
    %63 = vector.broadcast %62 : vector<1x256xf32> to vector<2x256xf32>
    %64 = arith.mulf %60, %63 : vector<2x256xf32>
    %c16 = arith.constant 16 : index
    %c0_51 = arith.constant 0 : index
    %65 = vector.load %arg37[%c16, %c0_51] : memref<27x256xf32, #tpu.memory_space<vmem>>, vector<2x256xf32>
    tpu.vector_store %arg37[%c16, %c0_51], %64 {strides = array<i32>} : memref<27x256xf32, #tpu.memory_space<vmem>>, vector<2x256xf32>,
    %c0_52 = arith.constant 0 : index
    %c0_53 = arith.constant 0 : index
    %66 = vector.load %arg37[%c0_52, %c0_53] : memref<27x256xf32, #tpu.memory_space<vmem>>, vector<18x256xf32>
    %cst_54 = arith.constant dense<0.000000e+00> : vector<2x256xf32>
    %67 = tpu.matmul %6, %66, %cst_54 {dimension_numbers = #tpu.dot_dimension_numbers<[1], [0], [0], [1], [0, 0, 1, 1], [], []>} : vector<2x18xf32>, vector<18x256xf32>, vector<2x256xf32> -> vector<2x256xf32>
    %68 = vector.broadcast %7 : vector<2x1xf32> to vector<2x256xf32>
    %69 = arith.addf %67, %68 : vector<2x256xf32>
    %cst_55 = arith.constant 0.000000e+00 : f32
    %70 = vector.broadcast %cst_55 : f32 to vector<2x256xf32>
    %71 = arith.maximumf %69, %70 : vector<2x256xf32>
    %c17_i32_56 = arith.constant 17 : i32
    %72 = tpu.dynamic_rotate %71 by %c17_i32_56 dim 1 : vector<2x256xf32>, i32 -> vector<2x256xf32>
    %c0_57 = arith.constant 0 : index
    %c0_58 = arith.constant 0 : index
    %c0_59 = arith.constant 0 : index
    %73 = vector.load %arg5[%c0_57, %c0_58, %c0_59] : memref<9x1x256xf32, #tpu.memory_space<vmem>>, vector<1x1x256xf32>
    %74 = vector.shape_cast %73 : vector<1x1x256xf32> to vector<1x256xf32>
    %75 = vector.broadcast %74 : vector<1x256xf32> to vector<2x256xf32>
    %76 = arith.mulf %72, %75 : vector<2x256xf32>
    %c0_60 = arith.constant 0 : index
    %c0_61 = arith.constant 0 : index
    %77 = vector.load %arg37[%c0_60, %c0_61] : memref<27x256xf32, #tpu.memory_space<vmem>>, vector<2x256xf32>
    tpu.vector_store %arg37[%c0_60, %c0_61], %76 {strides = array<i32>} : memref<27x256xf32, #tpu.memory_space<vmem>>, vector<2x256xf32>,
    %c16_i32_62 = arith.constant 16 : i32
    %78 = tpu.dynamic_rotate %71 by %c16_i32_62 dim 1 : vector<2x256xf32>, i32 -> vector<2x256xf32>
    %c1_63 = arith.constant 1 : index
    %c0_64 = arith.constant 0 : index
    %c0_65 = arith.constant 0 : index
    %79 = vector.load %arg5[%c1_63, %c0_64, %c0_65] : memref<9x1x256xf32, #tpu.memory_space<vmem>>, vector<1x1x256xf32>
    %80 = vector.shape_cast %79 : vector<1x1x256xf32> to vector<1x256xf32>
    %81 = vector.broadcast %80 : vector<1x256xf32> to vector<2x256xf32>
    %82 = arith.mulf %78, %81 : vector<2x256xf32>
    %c2_66 = arith.constant 2 : index
    %c0_67 = arith.constant 0 : index
    %83 = vector.load %arg37[%c2_66, %c0_67] : memref<27x256xf32, #tpu.memory_space<vmem>>, vector<2x256xf32>
    tpu.vector_store %arg37[%c2_66, %c0_67], %82 {strides = array<i32>} : memref<27x256xf32, #tpu.memory_space<vmem>>, vector<2x256xf32>,
    %c15_i32_68 = arith.constant 15 : i32
    %84 = tpu.dynamic_rotate %71 by %c15_i32_68 dim 1 : vector<2x256xf32>, i32 -> vector<2x256xf32>
    %c2_69 = arith.constant 2 : index
    %c0_70 = arith.constant 0 : index
    %c0_71 = arith.constant 0 : index
    %85 = vector.load %arg5[%c2_69, %c0_70, %c0_71] : memref<9x1x256xf32, #tpu.memory_space<vmem>>, vector<1x1x256xf32>
    %86 = vector.shape_cast %85 : vector<1x1x256xf32> to vector<1x256xf32>
    %87 = vector.broadcast %86 : vector<1x256xf32> to vector<2x256xf32>
    %88 = arith.mulf %84, %87 : vector<2x256xf32>
    %c4_72 = arith.constant 4 : index
    %c0_73 = arith.constant 0 : index
    %89 = vector.load %arg37[%c4_72, %c0_73] : memref<27x256xf32, #tpu.memory_space<vmem>>, vector<2x256xf32>
    tpu.vector_store %arg37[%c4_72, %c0_73], %88 {strides = array<i32>} : memref<27x256xf32, #tpu.memory_space<vmem>>, vector<2x256xf32>,
    %c1_i32_74 = arith.constant 1 : i32
    %90 = tpu.dynamic_rotate %71 by %c1_i32_74 dim 1 : vector<2x256xf32>, i32 -> vector<2x256xf32>
    %c3_75 = arith.constant 3 : index
    %c0_76 = arith.constant 0 : index
    %c0_77 = arith.constant 0 : index
    %91 = vector.load %arg5[%c3_75, %c0_76, %c0_77] : memref<9x1x256xf32, #tpu.memory_space<vmem>>, vector<1x1x256xf32>
    %92 = vector.shape_cast %91 : vector<1x1x256xf32> to vector<1x256xf32>
    %93 = vector.broadcast %92 : vector<1x256xf32> to vector<2x256xf32>
    %94 = arith.mulf %90, %93 : vector<2x256xf32>
    %c6_78 = arith.constant 6 : index
    %c0_79 = arith.constant 0 : index
    %95 = vector.load %arg37[%c6_78, %c0_79] : memref<27x256xf32, #tpu.memory_space<vmem>>, vector<2x256xf32>
    tpu.vector_store %arg37[%c6_78, %c0_79], %94 {strides = array<i32>} : memref<27x256xf32, #tpu.memory_space<vmem>>, vector<2x256xf32>,
    %c8_80 = arith.constant 8 : index
    %c0_81 = arith.constant 0 : index
    %96 = vector.load %arg37[%c8_80, %c0_81] : memref<27x256xf32, #tpu.memory_space<vmem>>, vector<2x256xf32>
    tpu.vector_store %arg37[%c8_80, %c0_81], %71 {strides = array<i32>} : memref<27x256xf32, #tpu.memory_space<vmem>>, vector<2x256xf32>,
    %c255_i32_82 = arith.constant 255 : i32
    %97 = tpu.dynamic_rotate %71 by %c255_i32_82 dim 1 : vector<2x256xf32>, i32 -> vector<2x256xf32>
    %c5_83 = arith.constant 5 : index
    %c0_84 = arith.constant 0 : index
    %c0_85 = arith.constant 0 : index
    %98 = vector.load %arg5[%c5_83, %c0_84, %c0_85] : memref<9x1x256xf32, #tpu.memory_space<vmem>>, vector<1x1x256xf32>
    %99 = vector.shape_cast %98 : vector<1x1x256xf32> to vector<1x256xf32>
    %100 = vector.broadcast %99 : vector<1x256xf32> to vector<2x256xf32>
    %101 = arith.mulf %97, %100 : vector<2x256xf32>
    %c10_86 = arith.constant 10 : index
    %c0_87 = arith.constant 0 : index
    %102 = vector.load %arg37[%c10_86, %c0_87] : memref<27x256xf32, #tpu.memory_space<vmem>>, vector<2x256xf32>
    tpu.vector_store %arg37[%c10_86, %c0_87], %101 {strides = array<i32>} : memref<27x256xf32, #tpu.memory_space<vmem>>, vector<2x256xf32>,
    %c241_i32_88 = arith.constant 241 : i32
    %103 = tpu.dynamic_rotate %71 by %c241_i32_88 dim 1 : vector<2x256xf32>, i32 -> vector<2x256xf32>
    %c6_89 = arith.constant 6 : index
    %c0_90 = arith.constant 0 : index
    %c0_91 = arith.constant 0 : index
    %104 = vector.load %arg5[%c6_89, %c0_90, %c0_91] : memref<9x1x256xf32, #tpu.memory_space<vmem>>, vector<1x1x256xf32>
    %105 = vector.shape_cast %104 : vector<1x1x256xf32> to vector<1x256xf32>
    %106 = vector.broadcast %105 : vector<1x256xf32> to vector<2x256xf32>
    %107 = arith.mulf %103, %106 : vector<2x256xf32>
    %c12_92 = arith.constant 12 : index
    %c0_93 = arith.constant 0 : index
    %108 = vector.load %arg37[%c12_92, %c0_93] : memref<27x256xf32, #tpu.memory_space<vmem>>, vector<2x256xf32>
    tpu.vector_store %arg37[%c12_92, %c0_93], %107 {strides = array<i32>} : memref<27x256xf32, #tpu.memory_space<vmem>>, vector<2x256xf32>,
    %c240_i32_94 = arith.constant 240 : i32
    %109 = tpu.dynamic_rotate %71 by %c240_i32_94 dim 1 : vector<2x256xf32>, i32 -> vector<2x256xf32>
    %c7_95 = arith.constant 7 : index
    %c0_96 = arith.constant 0 : index
    %c0_97 = arith.constant 0 : index
    %110 = vector.load %arg5[%c7_95, %c0_96, %c0_97] : memref<9x1x256xf32, #tpu.memory_space<vmem>>, vector<1x1x256xf32>
    %111 = vector.shape_cast %110 : vector<1x1x256xf32> to vector<1x256xf32>
    %112 = vector.broadcast %111 : vector<1x256xf32> to vector<2x256xf32>
    %113 = arith.mulf %109, %112 : vector<2x256xf32>
    %c14_98 = arith.constant 14 : index
    %c0_99 = arith.constant 0 : index
    %114 = vector.load %arg37[%c14_98, %c0_99] : memref<27x256xf32, #tpu.memory_space<vmem>>, vector<2x256xf32>
    tpu.vector_store %arg37[%c14_98, %c0_99], %113 {strides = array<i32>} : memref<27x256xf32, #tpu.memory_space<vmem>>, vector<2x256xf32>,
    %c239_i32_100 = arith.constant 239 : i32
    %115 = tpu.dynamic_rotate %71 by %c239_i32_100 dim 1 : vector<2x256xf32>, i32 -> vector<2x256xf32>
    %c8_101 = arith.constant 8 : index
    %c0_102 = arith.constant 0 : index
    %c0_103 = arith.constant 0 : index
    %116 = vector.load %arg5[%c8_101, %c0_102, %c0_103] : memref<9x1x256xf32, #tpu.memory_space<vmem>>, vector<1x1x256xf32>
    %117 = vector.shape_cast %116 : vector<1x1x256xf32> to vector<1x256xf32>
    %118 = vector.broadcast %117 : vector<1x256xf32> to vector<2x256xf32>
    %119 = arith.mulf %115, %118 : vector<2x256xf32>
    %c16_104 = arith.constant 16 : index
    %c0_105 = arith.constant 0 : index
    %120 = vector.load %arg37[%c16_104, %c0_105] : memref<27x256xf32, #tpu.memory_space<vmem>>, vector<2x256xf32>
    tpu.vector_store %arg37[%c16_104, %c0_105], %119 {strides = array<i32>} : memref<27x256xf32, #tpu.memory_space<vmem>>, vector<2x256xf32>,
    %c0_106 = arith.constant 0 : index
    %c0_107 = arith.constant 0 : index
    %121 = vector.load %arg37[%c0_106, %c0_107] : memref<27x256xf32, #tpu.memory_space<vmem>>, vector<18x256xf32>
    %cst_108 = arith.constant dense<0.000000e+00> : vector<2x256xf32>
    %122 = tpu.matmul %8, %121, %cst_108 {dimension_numbers = #tpu.dot_dimension_numbers<[1], [0], [0], [1], [0, 0, 1, 1], [], []>} : vector<2x18xf32>, vector<18x256xf32>, vector<2x256xf32> -> vector<2x256xf32>
    %123 = vector.broadcast %9 : vector<2x1xf32> to vector<2x256xf32>
    %124 = arith.addf %122, %123 : vector<2x256xf32>
    %cst_109 = arith.constant 0.000000e+00 : f32
    %125 = vector.broadcast %cst_109 : f32 to vector<2x256xf32>
    %126 = arith.maximumf %124, %125 : vector<2x256xf32>
    %cst_110 = arith.constant dense<0.000000e+00> : vector<8x256xf32>
    %127 = tpu.matmul %10, %126, %cst_110 {dimension_numbers = #tpu.dot_dimension_numbers<[1], [0], [0], [1], [0, 0, 1, 1], [], []>} : vector<8x2xf32>, vector<2x256xf32>, vector<8x256xf32> -> vector<8x256xf32>
    %128 = vector.broadcast %11 : vector<8x1xf32> to vector<8x256xf32>
    %129 = arith.addf %127, %128 : vector<8x256xf32>
    %cst_111 = arith.constant 0.000000e+00 : f32
    %130 = vector.broadcast %cst_111 : f32 to vector<8x256xf32>
    %131 = arith.maximumf %129, %130 : vector<8x256xf32>
    %132 = vector.extract_strided_slice %131 {offsets = [0, 0], sizes = [4, 256], strides = [1, 1]} : vector<8x256xf32> to vector<4x256xf32>
    %133 = vector.extract_strided_slice %131 {offsets = [4, 0], sizes = [4, 256], strides = [1, 1]} : vector<8x256xf32> to vector<4x256xf32>
    %134 = math.tanh %133 : vector<4x256xf32>
    %c0_112 = arith.constant 0 : index
    %c0_113 = arith.constant 0 : index
    %c0_114 = arith.constant 0 : index
    %135 = vector.load %arg2[%c0_112, %c0_113, %c0_114] : memref<1x4x256xf32, #tpu.memory_space<vmem>>, vector<1x4x256xf32>
    %136 = vector.shape_cast %135 : vector<1x4x256xf32> to vector<4x256xf32>
    %c0_115 = arith.constant 0 : index
    %c0_116 = arith.constant 0 : index
    %137 = vector.load %arg14[%c0_115, %c0_116] : memref<3x8xf32, #tpu.memory_space<vmem>>, vector<3x8xf32>
    %c0_117 = arith.constant 0 : index
    %c0_118 = arith.constant 0 : index
    %138 = vector.load %arg15[%c0_117, %c0_118] : memref<3x4xf32, #tpu.memory_space<vmem>>, vector<3x4xf32>
    %c0_119 = arith.constant 0 : index
    %c0_120 = arith.constant 0 : index
    %139 = vector.load %arg16[%c0_119, %c0_120] : memref<3x1xf32, #tpu.memory_space<vmem>>, vector<3x1xf32>
    %c0_121 = arith.constant 0 : index
    %c0_122 = arith.constant 0 : index
    %140 = vector.load %arg17[%c0_121, %c0_122] : memref<3x27xf32, #tpu.memory_space<vmem>>, vector<3x27xf32>
    %c0_123 = arith.constant 0 : index
    %c0_124 = arith.constant 0 : index
    %141 = vector.load %arg18[%c0_123, %c0_124] : memref<3x1xf32, #tpu.memory_space<vmem>>, vector<3x1xf32>
    %c0_125 = arith.constant 0 : index
    %c0_126 = arith.constant 0 : index
    %142 = vector.load %arg19[%c0_125, %c0_126] : memref<3x27xf32, #tpu.memory_space<vmem>>, vector<3x27xf32>
    %c0_127 = arith.constant 0 : index
    %c0_128 = arith.constant 0 : index
    %143 = vector.load %arg20[%c0_127, %c0_128] : memref<3x1xf32, #tpu.memory_space<vmem>>, vector<3x1xf32>
    %c0_129 = arith.constant 0 : index
    %c0_130 = arith.constant 0 : index
    %144 = vector.load %arg21[%c0_129, %c0_130] : memref<8x3xf32, #tpu.memory_space<vmem>>, vector<8x3xf32>
    %c0_131 = arith.constant 0 : index
    %c0_132 = arith.constant 0 : index
    %145 = vector.load %arg22[%c0_131, %c0_132] : memref<8x1xf32, #tpu.memory_space<vmem>>, vector<8x1xf32>
    %cst_133 = arith.constant dense<0.000000e+00> : vector<3x256xf32>
    %146 = tpu.matmul %137, %1, %cst_133 {dimension_numbers = #tpu.dot_dimension_numbers<[1], [0], [0], [1], [0, 0, 1, 1], [], []>} : vector<3x8xf32>, vector<8x256xf32>, vector<3x256xf32> -> vector<3x256xf32>
    %cst_134 = arith.constant dense<0.000000e+00> : vector<3x256xf32>
    %147 = tpu.matmul %138, %136, %cst_134 {dimension_numbers = #tpu.dot_dimension_numbers<[1], [0], [0], [1], [0, 0, 1, 1], [], []>} : vector<3x4xf32>, vector<4x256xf32>, vector<3x256xf32> -> vector<3x256xf32>
    %148 = arith.addf %146, %147 : vector<3x256xf32>
    %149 = vector.broadcast %139 : vector<3x1xf32> to vector<3x256xf32>
    %150 = arith.addf %148, %149 : vector<3x256xf32>
    %cst_135 = arith.constant 0.000000e+00 : f32
    %151 = vector.broadcast %cst_135 : f32 to vector<3x256xf32>
    %152 = arith.maximumf %150, %151 : vector<3x256xf32>
    %c17_i32_136 = arith.constant 17 : i32
    %153 = tpu.dynamic_rotate %152 by %c17_i32_136 dim 1 : vector<3x256xf32>, i32 -> vector<3x256xf32>
    %c0_137 = arith.constant 0 : index
    %c0_138 = arith.constant 0 : index
    %c0_139 = arith.constant 0 : index
    %154 = vector.load %arg5[%c0_137, %c0_138, %c0_139] : memref<9x1x256xf32, #tpu.memory_space<vmem>>, vector<1x1x256xf32>
    %155 = vector.shape_cast %154 : vector<1x1x256xf32> to vector<1x256xf32>
    %156 = vector.broadcast %155 : vector<1x256xf32> to vector<3x256xf32>
    %157 = arith.mulf %153, %156 : vector<3x256xf32>
    %c0_140 = arith.constant 0 : index
    %c0_141 = arith.constant 0 : index
    %158 = vector.load %arg37[%c0_140, %c0_141] : memref<27x256xf32, #tpu.memory_space<vmem>>, vector<3x256xf32>
    tpu.vector_store %arg37[%c0_140, %c0_141], %157 {strides = array<i32>} : memref<27x256xf32, #tpu.memory_space<vmem>>, vector<3x256xf32>,
    %c16_i32_142 = arith.constant 16 : i32
    %159 = tpu.dynamic_rotate %152 by %c16_i32_142 dim 1 : vector<3x256xf32>, i32 -> vector<3x256xf32>
    %c1_143 = arith.constant 1 : index
    %c0_144 = arith.constant 0 : index
    %c0_145 = arith.constant 0 : index
    %160 = vector.load %arg5[%c1_143, %c0_144, %c0_145] : memref<9x1x256xf32, #tpu.memory_space<vmem>>, vector<1x1x256xf32>
    %161 = vector.shape_cast %160 : vector<1x1x256xf32> to vector<1x256xf32>
    %162 = vector.broadcast %161 : vector<1x256xf32> to vector<3x256xf32>
    %163 = arith.mulf %159, %162 : vector<3x256xf32>
    %c3_146 = arith.constant 3 : index
    %c0_147 = arith.constant 0 : index
    %164 = vector.load %arg37[%c3_146, %c0_147] : memref<27x256xf32, #tpu.memory_space<vmem>>, vector<3x256xf32>
    tpu.vector_store %arg37[%c3_146, %c0_147], %163 {strides = array<i32>} : memref<27x256xf32, #tpu.memory_space<vmem>>, vector<3x256xf32>,
    %c15_i32_148 = arith.constant 15 : i32
    %165 = tpu.dynamic_rotate %152 by %c15_i32_148 dim 1 : vector<3x256xf32>, i32 -> vector<3x256xf32>
    %c2_149 = arith.constant 2 : index
    %c0_150 = arith.constant 0 : index
    %c0_151 = arith.constant 0 : index
    %166 = vector.load %arg5[%c2_149, %c0_150, %c0_151] : memref<9x1x256xf32, #tpu.memory_space<vmem>>, vector<1x1x256xf32>
    %167 = vector.shape_cast %166 : vector<1x1x256xf32> to vector<1x256xf32>
    %168 = vector.broadcast %167 : vector<1x256xf32> to vector<3x256xf32>
    %169 = arith.mulf %165, %168 : vector<3x256xf32>
    %c6_152 = arith.constant 6 : index
    %c0_153 = arith.constant 0 : index
    %170 = vector.load %arg37[%c6_152, %c0_153] : memref<27x256xf32, #tpu.memory_space<vmem>>, vector<3x256xf32>
    tpu.vector_store %arg37[%c6_152, %c0_153], %169 {strides = array<i32>} : memref<27x256xf32, #tpu.memory_space<vmem>>, vector<3x256xf32>,
    %c1_i32_154 = arith.constant 1 : i32
    %171 = tpu.dynamic_rotate %152 by %c1_i32_154 dim 1 : vector<3x256xf32>, i32 -> vector<3x256xf32>
    %c3_155 = arith.constant 3 : index
    %c0_156 = arith.constant 0 : index
    %c0_157 = arith.constant 0 : index
    %172 = vector.load %arg5[%c3_155, %c0_156, %c0_157] : memref<9x1x256xf32, #tpu.memory_space<vmem>>, vector<1x1x256xf32>
    %173 = vector.shape_cast %172 : vector<1x1x256xf32> to vector<1x256xf32>
    %174 = vector.broadcast %173 : vector<1x256xf32> to vector<3x256xf32>
    %175 = arith.mulf %171, %174 : vector<3x256xf32>
    %c9 = arith.constant 9 : index
    %c0_158 = arith.constant 0 : index
    %176 = vector.load %arg37[%c9, %c0_158] : memref<27x256xf32, #tpu.memory_space<vmem>>, vector<3x256xf32>
    tpu.vector_store %arg37[%c9, %c0_158], %175 {strides = array<i32>} : memref<27x256xf32, #tpu.memory_space<vmem>>, vector<3x256xf32>,
    %c12_159 = arith.constant 12 : index
    %c0_160 = arith.constant 0 : index
    %177 = vector.load %arg37[%c12_159, %c0_160] : memref<27x256xf32, #tpu.memory_space<vmem>>, vector<3x256xf32>
    tpu.vector_store %arg37[%c12_159, %c0_160], %152 {strides = array<i32>} : memref<27x256xf32, #tpu.memory_space<vmem>>, vector<3x256xf32>,
    %c255_i32_161 = arith.constant 255 : i32
    %178 = tpu.dynamic_rotate %152 by %c255_i32_161 dim 1 : vector<3x256xf32>, i32 -> vector<3x256xf32>
    %c5_162 = arith.constant 5 : index
    %c0_163 = arith.constant 0 : index
    %c0_164 = arith.constant 0 : index
    %179 = vector.load %arg5[%c5_162, %c0_163, %c0_164] : memref<9x1x256xf32, #tpu.memory_space<vmem>>, vector<1x1x256xf32>
    %180 = vector.shape_cast %179 : vector<1x1x256xf32> to vector<1x256xf32>
    %181 = vector.broadcast %180 : vector<1x256xf32> to vector<3x256xf32>
    %182 = arith.mulf %178, %181 : vector<3x256xf32>
    %c15 = arith.constant 15 : index
    %c0_165 = arith.constant 0 : index
    %183 = vector.load %arg37[%c15, %c0_165] : memref<27x256xf32, #tpu.memory_space<vmem>>, vector<3x256xf32>
    tpu.vector_store %arg37[%c15, %c0_165], %182 {strides = array<i32>} : memref<27x256xf32, #tpu.memory_space<vmem>>, vector<3x256xf32>,
    %c241_i32_166 = arith.constant 241 : i32
    %184 = tpu.dynamic_rotate %152 by %c241_i32_166 dim 1 : vector<3x256xf32>, i32 -> vector<3x256xf32>
    %c6_167 = arith.constant 6 : index
    %c0_168 = arith.constant 0 : index
    %c0_169 = arith.constant 0 : index
    %185 = vector.load %arg5[%c6_167, %c0_168, %c0_169] : memref<9x1x256xf32, #tpu.memory_space<vmem>>, vector<1x1x256xf32>
    %186 = vector.shape_cast %185 : vector<1x1x256xf32> to vector<1x256xf32>
    %187 = vector.broadcast %186 : vector<1x256xf32> to vector<3x256xf32>
    %188 = arith.mulf %184, %187 : vector<3x256xf32>
    %c18 = arith.constant 18 : index
    %c0_170 = arith.constant 0 : index
    %189 = vector.load %arg37[%c18, %c0_170] : memref<27x256xf32, #tpu.memory_space<vmem>>, vector<3x256xf32>
    tpu.vector_store %arg37[%c18, %c0_170], %188 {strides = array<i32>} : memref<27x256xf32, #tpu.memory_space<vmem>>, vector<3x256xf32>,
    %c240_i32_171 = arith.constant 240 : i32
    %190 = tpu.dynamic_rotate %152 by %c240_i32_171 dim 1 : vector<3x256xf32>, i32 -> vector<3x256xf32>
    %c7_172 = arith.constant 7 : index
    %c0_173 = arith.constant 0 : index
    %c0_174 = arith.constant 0 : index
    %191 = vector.load %arg5[%c7_172, %c0_173, %c0_174] : memref<9x1x256xf32, #tpu.memory_space<vmem>>, vector<1x1x256xf32>
    %192 = vector.shape_cast %191 : vector<1x1x256xf32> to vector<1x256xf32>
    %193 = vector.broadcast %192 : vector<1x256xf32> to vector<3x256xf32>
    %194 = arith.mulf %190, %193 : vector<3x256xf32>
    %c21 = arith.constant 21 : index
    %c0_175 = arith.constant 0 : index
    %195 = vector.load %arg37[%c21, %c0_175] : memref<27x256xf32, #tpu.memory_space<vmem>>, vector<3x256xf32>
    tpu.vector_store %arg37[%c21, %c0_175], %194 {strides = array<i32>} : memref<27x256xf32, #tpu.memory_space<vmem>>, vector<3x256xf32>,
    %c239_i32_176 = arith.constant 239 : i32
    %196 = tpu.dynamic_rotate %152 by %c239_i32_176 dim 1 : vector<3x256xf32>, i32 -> vector<3x256xf32>
    %c8_177 = arith.constant 8 : index
    %c0_178 = arith.constant 0 : index
    %c0_179 = arith.constant 0 : index
    %197 = vector.load %arg5[%c8_177, %c0_178, %c0_179] : memref<9x1x256xf32, #tpu.memory_space<vmem>>, vector<1x1x256xf32>
    %198 = vector.shape_cast %197 : vector<1x1x256xf32> to vector<1x256xf32>
    %199 = vector.broadcast %198 : vector<1x256xf32> to vector<3x256xf32>
    %200 = arith.mulf %196, %199 : vector<3x256xf32>
    %c24 = arith.constant 24 : index
    %c0_180 = arith.constant 0 : index
    %201 = vector.load %arg37[%c24, %c0_180] : memref<27x256xf32, #tpu.memory_space<vmem>>, vector<3x256xf32>
    tpu.vector_store %arg37[%c24, %c0_180], %200 {strides = array<i32>} : memref<27x256xf32, #tpu.memory_space<vmem>>, vector<3x256xf32>,
    %c0_181 = arith.constant 0 : index
    %c0_182 = arith.constant 0 : index
    %202 = vector.load %arg37[%c0_181, %c0_182] : memref<27x256xf32, #tpu.memory_space<vmem>>, vector<27x256xf32>
    %cst_183 = arith.constant dense<0.000000e+00> : vector<3x256xf32>
    %203 = tpu.matmul %140, %202, %cst_183 {dimension_numbers = #tpu.dot_dimension_numbers<[1], [0], [0], [1], [0, 0, 1, 1], [], []>} : vector<3x27xf32>, vector<27x256xf32>, vector<3x256xf32> -> vector<3x256xf32>
    %204 = vector.broadcast %141 : vector<3x1xf32> to vector<3x256xf32>
    %205 = arith.addf %203, %204 : vector<3x256xf32>
    %cst_184 = arith.constant 0.000000e+00 : f32
    %206 = vector.broadcast %cst_184 : f32 to vector<3x256xf32>
    %207 = arith.maximumf %205, %206 : vector<3x256xf32>
    %c17_i32_185 = arith.constant 17 : i32
    %208 = tpu.dynamic_rotate %207 by %c17_i32_185 dim 1 : vector<3x256xf32>, i32 -> vector<3x256xf32>
    %c0_186 = arith.constant 0 : index
    %c0_187 = arith.constant 0 : index
    %c0_188 = arith.constant 0 : index
    %209 = vector.load %arg5[%c0_186, %c0_187, %c0_188] : memref<9x1x256xf32, #tpu.memory_space<vmem>>, vector<1x1x256xf32>
    %210 = vector.shape_cast %209 : vector<1x1x256xf32> to vector<1x256xf32>
    %211 = vector.broadcast %210 : vector<1x256xf32> to vector<3x256xf32>
    %212 = arith.mulf %208, %211 : vector<3x256xf32>
    %c0_189 = arith.constant 0 : index
    %c0_190 = arith.constant 0 : index
    %213 = vector.load %arg37[%c0_189, %c0_190] : memref<27x256xf32, #tpu.memory_space<vmem>>, vector<3x256xf32>
    tpu.vector_store %arg37[%c0_189, %c0_190], %212 {strides = array<i32>} : memref<27x256xf32, #tpu.memory_space<vmem>>, vector<3x256xf32>,
    %c16_i32_191 = arith.constant 16 : i32
    %214 = tpu.dynamic_rotate %207 by %c16_i32_191 dim 1 : vector<3x256xf32>, i32 -> vector<3x256xf32>
    %c1_192 = arith.constant 1 : index
    %c0_193 = arith.constant 0 : index
    %c0_194 = arith.constant 0 : index
    %215 = vector.load %arg5[%c1_192, %c0_193, %c0_194] : memref<9x1x256xf32, #tpu.memory_space<vmem>>, vector<1x1x256xf32>
    %216 = vector.shape_cast %215 : vector<1x1x256xf32> to vector<1x256xf32>
    %217 = vector.broadcast %216 : vector<1x256xf32> to vector<3x256xf32>
    %218 = arith.mulf %214, %217 : vector<3x256xf32>
    %c3_195 = arith.constant 3 : index
    %c0_196 = arith.constant 0 : index
    %219 = vector.load %arg37[%c3_195, %c0_196] : memref<27x256xf32, #tpu.memory_space<vmem>>, vector<3x256xf32>
    tpu.vector_store %arg37[%c3_195, %c0_196], %218 {strides = array<i32>} : memref<27x256xf32, #tpu.memory_space<vmem>>, vector<3x256xf32>,
    %c15_i32_197 = arith.constant 15 : i32
    %220 = tpu.dynamic_rotate %207 by %c15_i32_197 dim 1 : vector<3x256xf32>, i32 -> vector<3x256xf32>
    %c2_198 = arith.constant 2 : index
    %c0_199 = arith.constant 0 : index
    %c0_200 = arith.constant 0 : index
    %221 = vector.load %arg5[%c2_198, %c0_199, %c0_200] : memref<9x1x256xf32, #tpu.memory_space<vmem>>, vector<1x1x256xf32>
    %222 = vector.shape_cast %221 : vector<1x1x256xf32> to vector<1x256xf32>
    %223 = vector.broadcast %222 : vector<1x256xf32> to vector<3x256xf32>
    %224 = arith.mulf %220, %223 : vector<3x256xf32>
    %c6_201 = arith.constant 6 : index
    %c0_202 = arith.constant 0 : index
    %225 = vector.load %arg37[%c6_201, %c0_202] : memref<27x256xf32, #tpu.memory_space<vmem>>, vector<3x256xf32>
    tpu.vector_store %arg37[%c6_201, %c0_202], %224 {strides = array<i32>} : memref<27x256xf32, #tpu.memory_space<vmem>>, vector<3x256xf32>,
    %c1_i32_203 = arith.constant 1 : i32
    %226 = tpu.dynamic_rotate %207 by %c1_i32_203 dim 1 : vector<3x256xf32>, i32 -> vector<3x256xf32>
    %c3_204 = arith.constant 3 : index
    %c0_205 = arith.constant 0 : index
    %c0_206 = arith.constant 0 : index
    %227 = vector.load %arg5[%c3_204, %c0_205, %c0_206] : memref<9x1x256xf32, #tpu.memory_space<vmem>>, vector<1x1x256xf32>
    %228 = vector.shape_cast %227 : vector<1x1x256xf32> to vector<1x256xf32>
    %229 = vector.broadcast %228 : vector<1x256xf32> to vector<3x256xf32>
    %230 = arith.mulf %226, %229 : vector<3x256xf32>
    %c9_207 = arith.constant 9 : index
    %c0_208 = arith.constant 0 : index
    %231 = vector.load %arg37[%c9_207, %c0_208] : memref<27x256xf32, #tpu.memory_space<vmem>>, vector<3x256xf32>
    tpu.vector_store %arg37[%c9_207, %c0_208], %230 {strides = array<i32>} : memref<27x256xf32, #tpu.memory_space<vmem>>, vector<3x256xf32>,
    %c12_209 = arith.constant 12 : index
    %c0_210 = arith.constant 0 : index
    %232 = vector.load %arg37[%c12_209, %c0_210] : memref<27x256xf32, #tpu.memory_space<vmem>>, vector<3x256xf32>
    tpu.vector_store %arg37[%c12_209, %c0_210], %207 {strides = array<i32>} : memref<27x256xf32, #tpu.memory_space<vmem>>, vector<3x256xf32>,
    %c255_i32_211 = arith.constant 255 : i32
    %233 = tpu.dynamic_rotate %207 by %c255_i32_211 dim 1 : vector<3x256xf32>, i32 -> vector<3x256xf32>
    %c5_212 = arith.constant 5 : index
    %c0_213 = arith.constant 0 : index
    %c0_214 = arith.constant 0 : index
    %234 = vector.load %arg5[%c5_212, %c0_213, %c0_214] : memref<9x1x256xf32, #tpu.memory_space<vmem>>, vector<1x1x256xf32>
    %235 = vector.shape_cast %234 : vector<1x1x256xf32> to vector<1x256xf32>
    %236 = vector.broadcast %235 : vector<1x256xf32> to vector<3x256xf32>
    %237 = arith.mulf %233, %236 : vector<3x256xf32>
    %c15_215 = arith.constant 15 : index
    %c0_216 = arith.constant 0 : index
    %238 = vector.load %arg37[%c15_215, %c0_216] : memref<27x256xf32, #tpu.memory_space<vmem>>, vector<3x256xf32>
    tpu.vector_store %arg37[%c15_215, %c0_216], %237 {strides = array<i32>} : memref<27x256xf32, #tpu.memory_space<vmem>>, vector<3x256xf32>,
    %c241_i32_217 = arith.constant 241 : i32
    %239 = tpu.dynamic_rotate %207 by %c241_i32_217 dim 1 : vector<3x256xf32>, i32 -> vector<3x256xf32>
    %c6_218 = arith.constant 6 : index
    %c0_219 = arith.constant 0 : index
    %c0_220 = arith.constant 0 : index
    %240 = vector.load %arg5[%c6_218, %c0_219, %c0_220] : memref<9x1x256xf32, #tpu.memory_space<vmem>>, vector<1x1x256xf32>
    %241 = vector.shape_cast %240 : vector<1x1x256xf32> to vector<1x256xf32>
    %242 = vector.broadcast %241 : vector<1x256xf32> to vector<3x256xf32>
    %243 = arith.mulf %239, %242 : vector<3x256xf32>
    %c18_221 = arith.constant 18 : index
    %c0_222 = arith.constant 0 : index
    %244 = vector.load %arg37[%c18_221, %c0_222] : memref<27x256xf32, #tpu.memory_space<vmem>>, vector<3x256xf32>
    tpu.vector_store %arg37[%c18_221, %c0_222], %243 {strides = array<i32>} : memref<27x256xf32, #tpu.memory_space<vmem>>, vector<3x256xf32>,
    %c240_i32_223 = arith.constant 240 : i32
    %245 = tpu.dynamic_rotate %207 by %c240_i32_223 dim 1 : vector<3x256xf32>, i32 -> vector<3x256xf32>
    %c7_224 = arith.constant 7 : index
    %c0_225 = arith.constant 0 : index
    %c0_226 = arith.constant 0 : index
    %246 = vector.load %arg5[%c7_224, %c0_225, %c0_226] : memref<9x1x256xf32, #tpu.memory_space<vmem>>, vector<1x1x256xf32>
    %247 = vector.shape_cast %246 : vector<1x1x256xf32> to vector<1x256xf32>
    %248 = vector.broadcast %247 : vector<1x256xf32> to vector<3x256xf32>
    %249 = arith.mulf %245, %248 : vector<3x256xf32>
    %c21_227 = arith.constant 21 : index
    %c0_228 = arith.constant 0 : index
    %250 = vector.load %arg37[%c21_227, %c0_228] : memref<27x256xf32, #tpu.memory_space<vmem>>, vector<3x256xf32>
    tpu.vector_store %arg37[%c21_227, %c0_228], %249 {strides = array<i32>} : memref<27x256xf32, #tpu.memory_space<vmem>>, vector<3x256xf32>,
    %c239_i32_229 = arith.constant 239 : i32
    %251 = tpu.dynamic_rotate %207 by %c239_i32_229 dim 1 : vector<3x256xf32>, i32 -> vector<3x256xf32>
    %c8_230 = arith.constant 8 : index
    %c0_231 = arith.constant 0 : index
    %c0_232 = arith.constant 0 : index
    %252 = vector.load %arg5[%c8_230, %c0_231, %c0_232] : memref<9x1x256xf32, #tpu.memory_space<vmem>>, vector<1x1x256xf32>
    %253 = vector.shape_cast %252 : vector<1x1x256xf32> to vector<1x256xf32>
    %254 = vector.broadcast %253 : vector<1x256xf32> to vector<3x256xf32>
    %255 = arith.mulf %251, %254 : vector<3x256xf32>
    %c24_233 = arith.constant 24 : index
    %c0_234 = arith.constant 0 : index
    %256 = vector.load %arg37[%c24_233, %c0_234] : memref<27x256xf32, #tpu.memory_space<vmem>>, vector<3x256xf32>
    tpu.vector_store %arg37[%c24_233, %c0_234], %255 {strides = array<i32>} : memref<27x256xf32, #tpu.memory_space<vmem>>, vector<3x256xf32>,
    %c0_235 = arith.constant 0 : index
    %c0_236 = arith.constant 0 : index
    %257 = vector.load %arg37[%c0_235, %c0_236] : memref<27x256xf32, #tpu.memory_space<vmem>>, vector<27x256xf32>
    %cst_237 = arith.constant dense<0.000000e+00> : vector<3x256xf32>
    %258 = tpu.matmul %142, %257, %cst_237 {dimension_numbers = #tpu.dot_dimension_numbers<[1], [0], [0], [1], [0, 0, 1, 1], [], []>} : vector<3x27xf32>, vector<27x256xf32>, vector<3x256xf32> -> vector<3x256xf32>
    %259 = vector.broadcast %143 : vector<3x1xf32> to vector<3x256xf32>
    %260 = arith.addf %258, %259 : vector<3x256xf32>
    %cst_238 = arith.constant 0.000000e+00 : f32
    %261 = vector.broadcast %cst_238 : f32 to vector<3x256xf32>
    %262 = arith.maximumf %260, %261 : vector<3x256xf32>
    %cst_239 = arith.constant dense<0.000000e+00> : vector<8x256xf32>
    %263 = tpu.matmul %144, %262, %cst_239 {dimension_numbers = #tpu.dot_dimension_numbers<[1], [0], [0], [1], [0, 0, 1, 1], [], []>} : vector<8x3xf32>, vector<3x256xf32>, vector<8x256xf32> -> vector<8x256xf32>
    %264 = vector.broadcast %145 : vector<8x1xf32> to vector<8x256xf32>
    %265 = arith.addf %263, %264 : vector<8x256xf32>
    %cst_240 = arith.constant 0.000000e+00 : f32
    %266 = vector.broadcast %cst_240 : f32 to vector<8x256xf32>
    %267 = arith.maximumf %265, %266 : vector<8x256xf32>
    %268 = vector.extract_strided_slice %267 {offsets = [0, 0], sizes = [4, 256], strides = [1, 1]} : vector<8x256xf32> to vector<4x256xf32>
    %269 = vector.extract_strided_slice %267 {offsets = [4, 0], sizes = [4, 256], strides = [1, 1]} : vector<8x256xf32> to vector<4x256xf32>
    %cst_241 = arith.constant 1.000000e-01 : f32
    %270 = vector.broadcast %cst_241 : f32 to vector<4x256xf32>
    %271 = arith.mulf %269, %270 : vector<4x256xf32>
    %272 = math.tanh %271 : vector<4x256xf32>
    %cst_242 = arith.constant 1.000000e+01 : f32
    %273 = vector.broadcast %cst_242 : f32 to vector<4x256xf32>
    %274 = arith.mulf %273, %272 : vector<4x256xf32>
    %c0_243 = arith.constant 0 : index
    %c0_244 = arith.constant 0 : index
    %c0_245 = arith.constant 0 : index
    %275 = vector.load %arg3[%c0_243, %c0_244, %c0_245] : memref<1x4x256xf32, #tpu.memory_space<vmem>>, vector<1x4x256xf32>
    %276 = vector.shape_cast %275 : vector<1x4x256xf32> to vector<4x256xf32>
    %c0_246 = arith.constant 0 : index
    %c0_247 = arith.constant 0 : index
    %277 = vector.load %arg23[%c0_246, %c0_247] : memref<3x8xf32, #tpu.memory_space<vmem>>, vector<3x8xf32>
    %c0_248 = arith.constant 0 : index
    %c0_249 = arith.constant 0 : index
    %278 = vector.load %arg24[%c0_248, %c0_249] : memref<3x4xf32, #tpu.memory_space<vmem>>, vector<3x4xf32>
    %c0_250 = arith.constant 0 : index
    %c0_251 = arith.constant 0 : index
    %279 = vector.load %arg25[%c0_250, %c0_251] : memref<3x1xf32, #tpu.memory_space<vmem>>, vector<3x1xf32>
    %c0_252 = arith.constant 0 : index
    %c0_253 = arith.constant 0 : index
    %280 = vector.load %arg26[%c0_252, %c0_253] : memref<3x27xf32, #tpu.memory_space<vmem>>, vector<3x27xf32>
    %c0_254 = arith.constant 0 : index
    %c0_255 = arith.constant 0 : index
    %281 = vector.load %arg27[%c0_254, %c0_255] : memref<3x1xf32, #tpu.memory_space<vmem>>, vector<3x1xf32>
    %c0_256 = arith.constant 0 : index
    %c0_257 = arith.constant 0 : index
    %282 = vector.load %arg28[%c0_256, %c0_257] : memref<3x27xf32, #tpu.memory_space<vmem>>, vector<3x27xf32>
    %c0_258 = arith.constant 0 : index
    %c0_259 = arith.constant 0 : index
    %283 = vector.load %arg29[%c0_258, %c0_259] : memref<3x1xf32, #tpu.memory_space<vmem>>, vector<3x1xf32>
    %c0_260 = arith.constant 0 : index
    %c0_261 = arith.constant 0 : index
    %284 = vector.load %arg30[%c0_260, %c0_261] : memref<8x3xf32, #tpu.memory_space<vmem>>, vector<8x3xf32>
    %c0_262 = arith.constant 0 : index
    %c0_263 = arith.constant 0 : index
    %285 = vector.load %arg31[%c0_262, %c0_263] : memref<8x1xf32, #tpu.memory_space<vmem>>, vector<8x1xf32>
    %cst_264 = arith.constant dense<0.000000e+00> : vector<3x256xf32>
    %286 = tpu.matmul %277, %1, %cst_264 {dimension_numbers = #tpu.dot_dimension_numbers<[1], [0], [0], [1], [0, 0, 1, 1], [], []>} : vector<3x8xf32>, vector<8x256xf32>, vector<3x256xf32> -> vector<3x256xf32>
    %cst_265 = arith.constant dense<0.000000e+00> : vector<3x256xf32>
    %287 = tpu.matmul %278, %276, %cst_265 {dimension_numbers = #tpu.dot_dimension_numbers<[1], [0], [0], [1], [0, 0, 1, 1], [], []>} : vector<3x4xf32>, vector<4x256xf32>, vector<3x256xf32> -> vector<3x256xf32>
    %288 = arith.addf %286, %287 : vector<3x256xf32>
    %289 = vector.broadcast %279 : vector<3x1xf32> to vector<3x256xf32>
    %290 = arith.addf %288, %289 : vector<3x256xf32>
    %cst_266 = arith.constant 0.000000e+00 : f32
    %291 = vector.broadcast %cst_266 : f32 to vector<3x256xf32>
    %292 = arith.maximumf %290, %291 : vector<3x256xf32>
    %c17_i32_267 = arith.constant 17 : i32
    %293 = tpu.dynamic_rotate %292 by %c17_i32_267 dim 1 : vector<3x256xf32>, i32 -> vector<3x256xf32>
    %c0_268 = arith.constant 0 : index
    %c0_269 = arith.constant 0 : index
    %c0_270 = arith.constant 0 : index
    %294 = vector.load %arg5[%c0_268, %c0_269, %c0_270] : memref<9x1x256xf32, #tpu.memory_space<vmem>>, vector<1x1x256xf32>
    %295 = vector.shape_cast %294 : vector<1x1x256xf32> to vector<1x256xf32>
    %296 = vector.broadcast %295 : vector<1x256xf32> to vector<3x256xf32>
    %297 = arith.mulf %293, %296 : vector<3x256xf32>
    %c0_271 = arith.constant 0 : index
    %c0_272 = arith.constant 0 : index
    %298 = vector.load %arg37[%c0_271, %c0_272] : memref<27x256xf32, #tpu.memory_space<vmem>>, vector<3x256xf32>
    tpu.vector_store %arg37[%c0_271, %c0_272], %297 {strides = array<i32>} : memref<27x256xf32, #tpu.memory_space<vmem>>, vector<3x256xf32>,
    %c16_i32_273 = arith.constant 16 : i32
    %299 = tpu.dynamic_rotate %292 by %c16_i32_273 dim 1 : vector<3x256xf32>, i32 -> vector<3x256xf32>
    %c1_274 = arith.constant 1 : index
    %c0_275 = arith.constant 0 : index
    %c0_276 = arith.constant 0 : index
    %300 = vector.load %arg5[%c1_274, %c0_275, %c0_276] : memref<9x1x256xf32, #tpu.memory_space<vmem>>, vector<1x1x256xf32>
    %301 = vector.shape_cast %300 : vector<1x1x256xf32> to vector<1x256xf32>
    %302 = vector.broadcast %301 : vector<1x256xf32> to vector<3x256xf32>
    %303 = arith.mulf %299, %302 : vector<3x256xf32>
    %c3_277 = arith.constant 3 : index
    %c0_278 = arith.constant 0 : index
    %304 = vector.load %arg37[%c3_277, %c0_278] : memref<27x256xf32, #tpu.memory_space<vmem>>, vector<3x256xf32>
    tpu.vector_store %arg37[%c3_277, %c0_278], %303 {strides = array<i32>} : memref<27x256xf32, #tpu.memory_space<vmem>>, vector<3x256xf32>,
    %c15_i32_279 = arith.constant 15 : i32
    %305 = tpu.dynamic_rotate %292 by %c15_i32_279 dim 1 : vector<3x256xf32>, i32 -> vector<3x256xf32>
    %c2_280 = arith.constant 2 : index
    %c0_281 = arith.constant 0 : index
    %c0_282 = arith.constant 0 : index
    %306 = vector.load %arg5[%c2_280, %c0_281, %c0_282] : memref<9x1x256xf32, #tpu.memory_space<vmem>>, vector<1x1x256xf32>
    %307 = vector.shape_cast %306 : vector<1x1x256xf32> to vector<1x256xf32>
    %308 = vector.broadcast %307 : vector<1x256xf32> to vector<3x256xf32>
    %309 = arith.mulf %305, %308 : vector<3x256xf32>
    %c6_283 = arith.constant 6 : index
    %c0_284 = arith.constant 0 : index
    %310 = vector.load %arg37[%c6_283, %c0_284] : memref<27x256xf32, #tpu.memory_space<vmem>>, vector<3x256xf32>
    tpu.vector_store %arg37[%c6_283, %c0_284], %309 {strides = array<i32>} : memref<27x256xf32, #tpu.memory_space<vmem>>, vector<3x256xf32>,
    %c1_i32_285 = arith.constant 1 : i32
    %311 = tpu.dynamic_rotate %292 by %c1_i32_285 dim 1 : vector<3x256xf32>, i32 -> vector<3x256xf32>
    %c3_286 = arith.constant 3 : index
    %c0_287 = arith.constant 0 : index
    %c0_288 = arith.constant 0 : index
    %312 = vector.load %arg5[%c3_286, %c0_287, %c0_288] : memref<9x1x256xf32, #tpu.memory_space<vmem>>, vector<1x1x256xf32>
    %313 = vector.shape_cast %312 : vector<1x1x256xf32> to vector<1x256xf32>
    %314 = vector.broadcast %313 : vector<1x256xf32> to vector<3x256xf32>
    %315 = arith.mulf %311, %314 : vector<3x256xf32>
    %c9_289 = arith.constant 9 : index
    %c0_290 = arith.constant 0 : index
    %316 = vector.load %arg37[%c9_289, %c0_290] : memref<27x256xf32, #tpu.memory_space<vmem>>, vector<3x256xf32>
    tpu.vector_store %arg37[%c9_289, %c0_290], %315 {strides = array<i32>} : memref<27x256xf32, #tpu.memory_space<vmem>>, vector<3x256xf32>,
    %c12_291 = arith.constant 12 : index
    %c0_292 = arith.constant 0 : index
    %317 = vector.load %arg37[%c12_291, %c0_292] : memref<27x256xf32, #tpu.memory_space<vmem>>, vector<3x256xf32>
    tpu.vector_store %arg37[%c12_291, %c0_292], %292 {strides = array<i32>} : memref<27x256xf32, #tpu.memory_space<vmem>>, vector<3x256xf32>,
    %c255_i32_293 = arith.constant 255 : i32
    %318 = tpu.dynamic_rotate %292 by %c255_i32_293 dim 1 : vector<3x256xf32>, i32 -> vector<3x256xf32>
    %c5_294 = arith.constant 5 : index
    %c0_295 = arith.constant 0 : index
    %c0_296 = arith.constant 0 : index
    %319 = vector.load %arg5[%c5_294, %c0_295, %c0_296] : memref<9x1x256xf32, #tpu.memory_space<vmem>>, vector<1x1x256xf32>
    %320 = vector.shape_cast %319 : vector<1x1x256xf32> to vector<1x256xf32>
    %321 = vector.broadcast %320 : vector<1x256xf32> to vector<3x256xf32>
    %322 = arith.mulf %318, %321 : vector<3x256xf32>
    %c15_297 = arith.constant 15 : index
    %c0_298 = arith.constant 0 : index
    %323 = vector.load %arg37[%c15_297, %c0_298] : memref<27x256xf32, #tpu.memory_space<vmem>>, vector<3x256xf32>
    tpu.vector_store %arg37[%c15_297, %c0_298], %322 {strides = array<i32>} : memref<27x256xf32, #tpu.memory_space<vmem>>, vector<3x256xf32>,
    %c241_i32_299 = arith.constant 241 : i32
    %324 = tpu.dynamic_rotate %292 by %c241_i32_299 dim 1 : vector<3x256xf32>, i32 -> vector<3x256xf32>
    %c6_300 = arith.constant 6 : index
    %c0_301 = arith.constant 0 : index
    %c0_302 = arith.constant 0 : index
    %325 = vector.load %arg5[%c6_300, %c0_301, %c0_302] : memref<9x1x256xf32, #tpu.memory_space<vmem>>, vector<1x1x256xf32>
    %326 = vector.shape_cast %325 : vector<1x1x256xf32> to vector<1x256xf32>
    %327 = vector.broadcast %326 : vector<1x256xf32> to vector<3x256xf32>
    %328 = arith.mulf %324, %327 : vector<3x256xf32>
    %c18_303 = arith.constant 18 : index
    %c0_304 = arith.constant 0 : index
    %329 = vector.load %arg37[%c18_303, %c0_304] : memref<27x256xf32, #tpu.memory_space<vmem>>, vector<3x256xf32>
    tpu.vector_store %arg37[%c18_303, %c0_304], %328 {strides = array<i32>} : memref<27x256xf32, #tpu.memory_space<vmem>>, vector<3x256xf32>,
    %c240_i32_305 = arith.constant 240 : i32
    %330 = tpu.dynamic_rotate %292 by %c240_i32_305 dim 1 : vector<3x256xf32>, i32 -> vector<3x256xf32>
    %c7_306 = arith.constant 7 : index
    %c0_307 = arith.constant 0 : index
    %c0_308 = arith.constant 0 : index
    %331 = vector.load %arg5[%c7_306, %c0_307, %c0_308] : memref<9x1x256xf32, #tpu.memory_space<vmem>>, vector<1x1x256xf32>
    %332 = vector.shape_cast %331 : vector<1x1x256xf32> to vector<1x256xf32>
    %333 = vector.broadcast %332 : vector<1x256xf32> to vector<3x256xf32>
    %334 = arith.mulf %330, %333 : vector<3x256xf32>
    %c21_309 = arith.constant 21 : index
    %c0_310 = arith.constant 0 : index
    %335 = vector.load %arg37[%c21_309, %c0_310] : memref<27x256xf32, #tpu.memory_space<vmem>>, vector<3x256xf32>
    tpu.vector_store %arg37[%c21_309, %c0_310], %334 {strides = array<i32>} : memref<27x256xf32, #tpu.memory_space<vmem>>, vector<3x256xf32>,
    %c239_i32_311 = arith.constant 239 : i32
    %336 = tpu.dynamic_rotate %292 by %c239_i32_311 dim 1 : vector<3x256xf32>, i32 -> vector<3x256xf32>
    %c8_312 = arith.constant 8 : index
    %c0_313 = arith.constant 0 : index
    %c0_314 = arith.constant 0 : index
    %337 = vector.load %arg5[%c8_312, %c0_313, %c0_314] : memref<9x1x256xf32, #tpu.memory_space<vmem>>, vector<1x1x256xf32>
    %338 = vector.shape_cast %337 : vector<1x1x256xf32> to vector<1x256xf32>
    %339 = vector.broadcast %338 : vector<1x256xf32> to vector<3x256xf32>
    %340 = arith.mulf %336, %339 : vector<3x256xf32>
    %c24_315 = arith.constant 24 : index
    %c0_316 = arith.constant 0 : index
    %341 = vector.load %arg37[%c24_315, %c0_316] : memref<27x256xf32, #tpu.memory_space<vmem>>, vector<3x256xf32>
    tpu.vector_store %arg37[%c24_315, %c0_316], %340 {strides = array<i32>} : memref<27x256xf32, #tpu.memory_space<vmem>>, vector<3x256xf32>,
    %c0_317 = arith.constant 0 : index
    %c0_318 = arith.constant 0 : index
    %342 = vector.load %arg37[%c0_317, %c0_318] : memref<27x256xf32, #tpu.memory_space<vmem>>, vector<27x256xf32>
    %cst_319 = arith.constant dense<0.000000e+00> : vector<3x256xf32>
    %343 = tpu.matmul %280, %342, %cst_319 {dimension_numbers = #tpu.dot_dimension_numbers<[1], [0], [0], [1], [0, 0, 1, 1], [], []>} : vector<3x27xf32>, vector<27x256xf32>, vector<3x256xf32> -> vector<3x256xf32>
    %344 = vector.broadcast %281 : vector<3x1xf32> to vector<3x256xf32>
    %345 = arith.addf %343, %344 : vector<3x256xf32>
    %cst_320 = arith.constant 0.000000e+00 : f32
    %346 = vector.broadcast %cst_320 : f32 to vector<3x256xf32>
    %347 = arith.maximumf %345, %346 : vector<3x256xf32>
    %c17_i32_321 = arith.constant 17 : i32
    %348 = tpu.dynamic_rotate %347 by %c17_i32_321 dim 1 : vector<3x256xf32>, i32 -> vector<3x256xf32>
    %c0_322 = arith.constant 0 : index
    %c0_323 = arith.constant 0 : index
    %c0_324 = arith.constant 0 : index
    %349 = vector.load %arg5[%c0_322, %c0_323, %c0_324] : memref<9x1x256xf32, #tpu.memory_space<vmem>>, vector<1x1x256xf32>
    %350 = vector.shape_cast %349 : vector<1x1x256xf32> to vector<1x256xf32>
    %351 = vector.broadcast %350 : vector<1x256xf32> to vector<3x256xf32>
    %352 = arith.mulf %348, %351 : vector<3x256xf32>
    %c0_325 = arith.constant 0 : index
    %c0_326 = arith.constant 0 : index
    %353 = vector.load %arg37[%c0_325, %c0_326] : memref<27x256xf32, #tpu.memory_space<vmem>>, vector<3x256xf32>
    tpu.vector_store %arg37[%c0_325, %c0_326], %352 {strides = array<i32>} : memref<27x256xf32, #tpu.memory_space<vmem>>, vector<3x256xf32>,
    %c16_i32_327 = arith.constant 16 : i32
    %354 = tpu.dynamic_rotate %347 by %c16_i32_327 dim 1 : vector<3x256xf32>, i32 -> vector<3x256xf32>
    %c1_328 = arith.constant 1 : index
    %c0_329 = arith.constant 0 : index
    %c0_330 = arith.constant 0 : index
    %355 = vector.load %arg5[%c1_328, %c0_329, %c0_330] : memref<9x1x256xf32, #tpu.memory_space<vmem>>, vector<1x1x256xf32>
    %356 = vector.shape_cast %355 : vector<1x1x256xf32> to vector<1x256xf32>
    %357 = vector.broadcast %356 : vector<1x256xf32> to vector<3x256xf32>
    %358 = arith.mulf %354, %357 : vector<3x256xf32>
    %c3_331 = arith.constant 3 : index
    %c0_332 = arith.constant 0 : index
    %359 = vector.load %arg37[%c3_331, %c0_332] : memref<27x256xf32, #tpu.memory_space<vmem>>, vector<3x256xf32>
    tpu.vector_store %arg37[%c3_331, %c0_332], %358 {strides = array<i32>} : memref<27x256xf32, #tpu.memory_space<vmem>>, vector<3x256xf32>,
    %c15_i32_333 = arith.constant 15 : i32
    %360 = tpu.dynamic_rotate %347 by %c15_i32_333 dim 1 : vector<3x256xf32>, i32 -> vector<3x256xf32>
    %c2_334 = arith.constant 2 : index
    %c0_335 = arith.constant 0 : index
    %c0_336 = arith.constant 0 : index
    %361 = vector.load %arg5[%c2_334, %c0_335, %c0_336] : memref<9x1x256xf32, #tpu.memory_space<vmem>>, vector<1x1x256xf32>
    %362 = vector.shape_cast %361 : vector<1x1x256xf32> to vector<1x256xf32>
    %363 = vector.broadcast %362 : vector<1x256xf32> to vector<3x256xf32>
    %364 = arith.mulf %360, %363 : vector<3x256xf32>
    %c6_337 = arith.constant 6 : index
    %c0_338 = arith.constant 0 : index
    %365 = vector.load %arg37[%c6_337, %c0_338] : memref<27x256xf32, #tpu.memory_space<vmem>>, vector<3x256xf32>
    tpu.vector_store %arg37[%c6_337, %c0_338], %364 {strides = array<i32>} : memref<27x256xf32, #tpu.memory_space<vmem>>, vector<3x256xf32>,
    %c1_i32_339 = arith.constant 1 : i32
    %366 = tpu.dynamic_rotate %347 by %c1_i32_339 dim 1 : vector<3x256xf32>, i32 -> vector<3x256xf32>
    %c3_340 = arith.constant 3 : index
    %c0_341 = arith.constant 0 : index
    %c0_342 = arith.constant 0 : index
    %367 = vector.load %arg5[%c3_340, %c0_341, %c0_342] : memref<9x1x256xf32, #tpu.memory_space<vmem>>, vector<1x1x256xf32>
    %368 = vector.shape_cast %367 : vector<1x1x256xf32> to vector<1x256xf32>
    %369 = vector.broadcast %368 : vector<1x256xf32> to vector<3x256xf32>
    %370 = arith.mulf %366, %369 : vector<3x256xf32>
    %c9_343 = arith.constant 9 : index
    %c0_344 = arith.constant 0 : index
    %371 = vector.load %arg37[%c9_343, %c0_344] : memref<27x256xf32, #tpu.memory_space<vmem>>, vector<3x256xf32>
    tpu.vector_store %arg37[%c9_343, %c0_344], %370 {strides = array<i32>} : memref<27x256xf32, #tpu.memory_space<vmem>>, vector<3x256xf32>,
    %c12_345 = arith.constant 12 : index
    %c0_346 = arith.constant 0 : index
    %372 = vector.load %arg37[%c12_345, %c0_346] : memref<27x256xf32, #tpu.memory_space<vmem>>, vector<3x256xf32>
    tpu.vector_store %arg37[%c12_345, %c0_346], %347 {strides = array<i32>} : memref<27x256xf32, #tpu.memory_space<vmem>>, vector<3x256xf32>,
    %c255_i32_347 = arith.constant 255 : i32
    %373 = tpu.dynamic_rotate %347 by %c255_i32_347 dim 1 : vector<3x256xf32>, i32 -> vector<3x256xf32>
    %c5_348 = arith.constant 5 : index
    %c0_349 = arith.constant 0 : index
    %c0_350 = arith.constant 0 : index
    %374 = vector.load %arg5[%c5_348, %c0_349, %c0_350] : memref<9x1x256xf32, #tpu.memory_space<vmem>>, vector<1x1x256xf32>
    %375 = vector.shape_cast %374 : vector<1x1x256xf32> to vector<1x256xf32>
    %376 = vector.broadcast %375 : vector<1x256xf32> to vector<3x256xf32>
    %377 = arith.mulf %373, %376 : vector<3x256xf32>
    %c15_351 = arith.constant 15 : index
    %c0_352 = arith.constant 0 : index
    %378 = vector.load %arg37[%c15_351, %c0_352] : memref<27x256xf32, #tpu.memory_space<vmem>>, vector<3x256xf32>
    tpu.vector_store %arg37[%c15_351, %c0_352], %377 {strides = array<i32>} : memref<27x256xf32, #tpu.memory_space<vmem>>, vector<3x256xf32>,
    %c241_i32_353 = arith.constant 241 : i32
    %379 = tpu.dynamic_rotate %347 by %c241_i32_353 dim 1 : vector<3x256xf32>, i32 -> vector<3x256xf32>
    %c6_354 = arith.constant 6 : index
    %c0_355 = arith.constant 0 : index
    %c0_356 = arith.constant 0 : index
    %380 = vector.load %arg5[%c6_354, %c0_355, %c0_356] : memref<9x1x256xf32, #tpu.memory_space<vmem>>, vector<1x1x256xf32>
    %381 = vector.shape_cast %380 : vector<1x1x256xf32> to vector<1x256xf32>
    %382 = vector.broadcast %381 : vector<1x256xf32> to vector<3x256xf32>
    %383 = arith.mulf %379, %382 : vector<3x256xf32>
    %c18_357 = arith.constant 18 : index
    %c0_358 = arith.constant 0 : index
    %384 = vector.load %arg37[%c18_357, %c0_358] : memref<27x256xf32, #tpu.memory_space<vmem>>, vector<3x256xf32>
    tpu.vector_store %arg37[%c18_357, %c0_358], %383 {strides = array<i32>} : memref<27x256xf32, #tpu.memory_space<vmem>>, vector<3x256xf32>,
    %c240_i32_359 = arith.constant 240 : i32
    %385 = tpu.dynamic_rotate %347 by %c240_i32_359 dim 1 : vector<3x256xf32>, i32 -> vector<3x256xf32>
    %c7_360 = arith.constant 7 : index
    %c0_361 = arith.constant 0 : index
    %c0_362 = arith.constant 0 : index
    %386 = vector.load %arg5[%c7_360, %c0_361, %c0_362] : memref<9x1x256xf32, #tpu.memory_space<vmem>>, vector<1x1x256xf32>
    %387 = vector.shape_cast %386 : vector<1x1x256xf32> to vector<1x256xf32>
    %388 = vector.broadcast %387 : vector<1x256xf32> to vector<3x256xf32>
    %389 = arith.mulf %385, %388 : vector<3x256xf32>
    %c21_363 = arith.constant 21 : index
    %c0_364 = arith.constant 0 : index
    %390 = vector.load %arg37[%c21_363, %c0_364] : memref<27x256xf32, #tpu.memory_space<vmem>>, vector<3x256xf32>
    tpu.vector_store %arg37[%c21_363, %c0_364], %389 {strides = array<i32>} : memref<27x256xf32, #tpu.memory_space<vmem>>, vector<3x256xf32>,
    %c239_i32_365 = arith.constant 239 : i32
    %391 = tpu.dynamic_rotate %347 by %c239_i32_365 dim 1 : vector<3x256xf32>, i32 -> vector<3x256xf32>
    %c8_366 = arith.constant 8 : index
    %c0_367 = arith.constant 0 : index
    %c0_368 = arith.constant 0 : index
    %392 = vector.load %arg5[%c8_366, %c0_367, %c0_368] : memref<9x1x256xf32, #tpu.memory_space<vmem>>, vector<1x1x256xf32>
    %393 = vector.shape_cast %392 : vector<1x1x256xf32> to vector<1x256xf32>
    %394 = vector.broadcast %393 : vector<1x256xf32> to vector<3x256xf32>
    %395 = arith.mulf %391, %394 : vector<3x256xf32>
    %c24_369 = arith.constant 24 : index
    %c0_370 = arith.constant 0 : index
    %396 = vector.load %arg37[%c24_369, %c0_370] : memref<27x256xf32, #tpu.memory_space<vmem>>, vector<3x256xf32>
    tpu.vector_store %arg37[%c24_369, %c0_370], %395 {strides = array<i32>} : memref<27x256xf32, #tpu.memory_space<vmem>>, vector<3x256xf32>,
    %c0_371 = arith.constant 0 : index
    %c0_372 = arith.constant 0 : index
    %397 = vector.load %arg37[%c0_371, %c0_372] : memref<27x256xf32, #tpu.memory_space<vmem>>, vector<27x256xf32>
    %cst_373 = arith.constant dense<0.000000e+00> : vector<3x256xf32>
    %398 = tpu.matmul %282, %397, %cst_373 {dimension_numbers = #tpu.dot_dimension_numbers<[1], [0], [0], [1], [0, 0, 1, 1], [], []>} : vector<3x27xf32>, vector<27x256xf32>, vector<3x256xf32> -> vector<3x256xf32>
    %399 = vector.broadcast %283 : vector<3x1xf32> to vector<3x256xf32>
    %400 = arith.addf %398, %399 : vector<3x256xf32>
    %cst_374 = arith.constant 0.000000e+00 : f32
    %401 = vector.broadcast %cst_374 : f32 to vector<3x256xf32>
    %402 = arith.maximumf %400, %401 : vector<3x256xf32>
    %cst_375 = arith.constant dense<0.000000e+00> : vector<8x256xf32>
    %403 = tpu.matmul %284, %402, %cst_375 {dimension_numbers = #tpu.dot_dimension_numbers<[1], [0], [0], [1], [0, 0, 1, 1], [], []>} : vector<8x3xf32>, vector<3x256xf32>, vector<8x256xf32> -> vector<8x256xf32>
    %404 = vector.broadcast %285 : vector<8x1xf32> to vector<8x256xf32>
    %405 = arith.addf %403, %404 : vector<8x256xf32>
    %cst_376 = arith.constant 0.000000e+00 : f32
    %406 = vector.broadcast %cst_376 : f32 to vector<8x256xf32>
    %407 = arith.maximumf %405, %406 : vector<8x256xf32>
    %408 = vector.extract_strided_slice %407 {offsets = [0, 0], sizes = [4, 256], strides = [1, 1]} : vector<8x256xf32> to vector<4x256xf32>
    %409 = vector.extract_strided_slice %407 {offsets = [4, 0], sizes = [4, 256], strides = [1, 1]} : vector<8x256xf32> to vector<4x256xf32>
    %cst_377 = arith.constant 1.000000e-01 : f32
    %410 = vector.broadcast %cst_377 : f32 to vector<4x256xf32>
    %411 = arith.mulf %409, %410 : vector<4x256xf32>
    %412 = math.tanh %411 : vector<4x256xf32>
    %cst_378 = arith.constant 1.000000e+01 : f32
    %413 = vector.broadcast %cst_378 : f32 to vector<4x256xf32>
    %414 = arith.mulf %413, %412 : vector<4x256xf32>
    %cst_379 = arith.constant 0.000000e+00 : f32
    %415 = vector.broadcast %cst_379 : f32 to vector<4x256xf32>
    %416 = arith.subf %415, %134 : vector<4x256xf32>
    %417 = math.exp %416 : vector<4x256xf32>
    %cst_380 = arith.constant 0.000000e+00 : f32
    %418 = vector.broadcast %cst_380 : f32 to vector<4x256xf32>
    %419 = arith.subf %418, %274 : vector<4x256xf32>
    %420 = math.exp %419 : vector<4x256xf32>
    %cst_381 = arith.constant 0.000000e+00 : f32
    %421 = vector.broadcast %cst_381 : f32 to vector<4x256xf32>
    %422 = arith.subf %421, %414 : vector<4x256xf32>
    %423 = math.exp %422 : vector<4x256xf32>
    %424 = arith.mulf %132, %417 : vector<4x256xf32>
    %425 = arith.addf %417, %420 : vector<4x256xf32>
    %426 = arith.mulf %268, %420 : vector<4x256xf32>
    %427 = arith.addf %424, %426 : vector<4x256xf32>
    %428 = arith.addf %425, %423 : vector<4x256xf32>
    %429 = arith.mulf %408, %423 : vector<4x256xf32>
    %430 = arith.addf %427, %429 : vector<4x256xf32>
    %431 = tpu.reciprocal %428 {approx = true} : vector<4x256xf32> -> vector<4x256xf32>
    %432 = arith.mulf %428, %431 : vector<4x256xf32>
    %cst_382 = arith.constant 2.000000e+00 : f32
    %433 = vector.broadcast %cst_382 : f32 to vector<4x256xf32>
    %434 = arith.subf %433, %432 : vector<4x256xf32>
    %435 = arith.mulf %431, %434 : vector<4x256xf32>
    %436 = arith.mulf %430, %435 : vector<4x256xf32>
    %437 = math.log %428 : vector<4x256xf32>
    %cst_383 = arith.constant 0.000000e+00 : f32
    %438 = vector.broadcast %cst_383 : f32 to vector<4x256xf32>
    %439 = arith.subf %438, %437 : vector<4x256xf32>
    %440 = arith.mulf %435, %435 : vector<4x256xf32>
    %441 = arith.mulf %3, %440 : vector<4x256xf32>
    %442 = arith.addf %441, %436 : vector<4x256xf32>
    %c0_384 = arith.constant 0 : index
    %c0_385 = arith.constant 0 : index
    %c0_386 = arith.constant 0 : index
    %443 = vector.load %arg32[%c0_384, %c0_385, %c0_386] : memref<1x4x256xf32, #tpu.memory_space<vmem>>, vector<1x4x256xf32>
    %444 = vector.shape_cast %443 : vector<1x4x256xf32> to vector<4x256xf32>
    %445 = vector.shape_cast %442 : vector<4x256xf32> to vector<1x4x256xf32>
    tpu.vector_store %arg32[%c0_384, %c0_385, %c0_386], %445 {strides = array<i32>} : memref<1x4x256xf32, #tpu.memory_space<vmem>>, vector<1x4x256xf32>,
    %c0_387 = arith.constant 0 : index
    %c0_388 = arith.constant 0 : index
    %c0_389 = arith.constant 0 : index
    %446 = vector.load %arg33[%c0_387, %c0_388, %c0_389] : memref<1x4x256xf32, #tpu.memory_space<vmem>>, vector<1x4x256xf32>
    %447 = vector.shape_cast %446 : vector<1x4x256xf32> to vector<4x256xf32>
    %448 = vector.shape_cast %132 : vector<4x256xf32> to vector<1x4x256xf32>
    tpu.vector_store %arg33[%c0_387, %c0_388, %c0_389], %448 {strides = array<i32>} : memref<1x4x256xf32, #tpu.memory_space<vmem>>, vector<1x4x256xf32>,
    %c0_390 = arith.constant 0 : index
    %c0_391 = arith.constant 0 : index
    %c0_392 = arith.constant 0 : index
    %449 = vector.load %arg34[%c0_390, %c0_391, %c0_392] : memref<1x4x256xf32, #tpu.memory_space<vmem>>, vector<1x4x256xf32>
    %450 = vector.shape_cast %449 : vector<1x4x256xf32> to vector<4x256xf32>
    %451 = vector.shape_cast %134 : vector<4x256xf32> to vector<1x4x256xf32>
    tpu.vector_store %arg34[%c0_390, %c0_391, %c0_392], %451 {strides = array<i32>} : memref<1x4x256xf32, #tpu.memory_space<vmem>>, vector<1x4x256xf32>,
    %c0_393 = arith.constant 0 : index
    %c0_394 = arith.constant 0 : index
    %c0_395 = arith.constant 0 : index
    %452 = vector.load %arg35[%c0_393, %c0_394, %c0_395] : memref<1x4x256xf32, #tpu.memory_space<vmem>>, vector<1x4x256xf32>
    %453 = vector.shape_cast %452 : vector<1x4x256xf32> to vector<4x256xf32>
    %454 = vector.shape_cast %436 : vector<4x256xf32> to vector<1x4x256xf32>
    tpu.vector_store %arg35[%c0_393, %c0_394, %c0_395], %454 {strides = array<i32>} : memref<1x4x256xf32, #tpu.memory_space<vmem>>, vector<1x4x256xf32>,
    %c0_396 = arith.constant 0 : index
    %c0_397 = arith.constant 0 : index
    %c0_398 = arith.constant 0 : index
    %455 = vector.load %arg36[%c0_396, %c0_397, %c0_398] : memref<1x4x256xf32, #tpu.memory_space<vmem>>, vector<1x4x256xf32>
    %456 = vector.shape_cast %455 : vector<1x4x256xf32> to vector<4x256xf32>
    %457 = vector.shape_cast %439 : vector<4x256xf32> to vector<1x4x256xf32>
    tpu.vector_store %arg36[%c0_396, %c0_397, %c0_398], %457 {strides = array<i32>} : memref<1x4x256xf32, #tpu.memory_space<vmem>>, vector<1x4x256xf32>,
    return
  }
  func.func @transform_0(%arg0: i32) -> (i32, i32, i32) {
    %c0_i32 = arith.constant 0 : i32
    %c0_i32_0 = arith.constant 0 : i32
    %c0_i32_1 = arith.constant 0 : i32
    return %arg0, %c0_i32, %c0_i32_0 : i32, i32, i32
  }
  func.func @transform_1(%arg0: i32) -> (i32, i32, i32) {
    %c0_i32 = arith.constant 0 : i32
    %c0_i32_0 = arith.constant 0 : i32
    %c0_i32_1 = arith.constant 0 : i32
    return %arg0, %c0_i32, %c0_i32_0 : i32, i32, i32
  }
  func.func @transform_2(%arg0: i32) -> (i32, i32, i32) {
    %c0_i32 = arith.constant 0 : i32
    %c0_i32_0 = arith.constant 0 : i32
    %c0_i32_1 = arith.constant 0 : i32
    return %arg0, %c0_i32, %c0_i32_0 : i32, i32, i32
  }
  func.func @transform_3(%arg0: i32) -> (i32, i32, i32) {
    %c0_i32 = arith.constant 0 : i32
    %c0_i32_0 = arith.constant 0 : i32
    %c0_i32_1 = arith.constant 0 : i32
    return %arg0, %c0_i32, %c0_i32_0 : i32, i32, i32
  }
  func.func @transform_4(%arg0: i32) -> (i32, i32, i32) {
    %c0_i32 = arith.constant 0 : i32
    %c0_i32_0 = arith.constant 0 : i32
    %c0_i32_1 = arith.constant 0 : i32
    %c0_i32_2 = arith.constant 0 : i32
    return %c0_i32, %c0_i32_0, %c0_i32_1 : i32, i32, i32
  }
  func.func @transform_5(%arg0: i32) -> (i32, i32) {
    %c0_i32 = arith.constant 0 : i32
    %c0_i32_0 = arith.constant 0 : i32
    %c0_i32_1 = arith.constant 0 : i32
    return %c0_i32, %c0_i32_0 : i32, i32
  }
  func.func @transform_6(%arg0: i32) -> (i32, i32) {
    %c0_i32 = arith.constant 0 : i32
    %c0_i32_0 = arith.constant 0 : i32
    %c0_i32_1 = arith.constant 0 : i32
    return %c0_i32, %c0_i32_0 : i32, i32
  }
  func.func @transform_7(%arg0: i32) -> (i32, i32) {
    %c0_i32 = arith.constant 0 : i32
    %c0_i32_0 = arith.constant 0 : i32
    %c0_i32_1 = arith.constant 0 : i32
    return %c0_i32, %c0_i32_0 : i32, i32
  }
  func.func @transform_8(%arg0: i32) -> (i32, i32) {
    %c0_i32 = arith.constant 0 : i32
    %c0_i32_0 = arith.constant 0 : i32
    %c0_i32_1 = arith.constant 0 : i32
    return %c0_i32, %c0_i32_0 : i32, i32
  }
  func.func @transform_9(%arg0: i32) -> (i32, i32) {
    %c0_i32 = arith.constant 0 : i32
    %c0_i32_0 = arith.constant 0 : i32
    %c0_i32_1 = arith.constant 0 : i32
    return %c0_i32, %c0_i32_0 : i32, i32
  }
  func.func @transform_10(%arg0: i32) -> (i32, i32) {
    %c0_i32 = arith.constant 0 : i32
    %c0_i32_0 = arith.constant 0 : i32
    %c0_i32_1 = arith.constant 0 : i32
    return %c0_i32, %c0_i32_0 : i32, i32
  }
  func.func @transform_11(%arg0: i32) -> (i32, i32) {
    %c0_i32 = arith.constant 0 : i32
    %c0_i32_0 = arith.constant 0 : i32
    %c0_i32_1 = arith.constant 0 : i32
    return %c0_i32, %c0_i32_0 : i32, i32
  }
  func.func @transform_12(%arg0: i32) -> (i32, i32) {
    %c0_i32 = arith.constant 0 : i32
    %c0_i32_0 = arith.constant 0 : i32
    %c0_i32_1 = arith.constant 0 : i32
    return %c0_i32, %c0_i32_0 : i32, i32
  }
  func.func @transform_13(%arg0: i32) -> (i32, i32) {
    %c0_i32 = arith.constant 0 : i32
    %c0_i32_0 = arith.constant 0 : i32
    %c0_i32_1 = arith.constant 0 : i32
    return %c0_i32, %c0_i32_0 : i32, i32
  }
  func.func @transform_14(%arg0: i32) -> (i32, i32) {
    %c0_i32 = arith.constant 0 : i32
    %c0_i32_0 = arith.constant 0 : i32
    %c0_i32_1 = arith.constant 0 : i32
    return %c0_i32, %c0_i32_0 : i32, i32
  }
  func.func @transform_15(%arg0: i32) -> (i32, i32) {
    %c0_i32 = arith.constant 0 : i32
    %c0_i32_0 = arith.constant 0 : i32
    %c0_i32_1 = arith.constant 0 : i32
    return %c0_i32, %c0_i32_0 : i32, i32
  }
  func.func @transform_16(%arg0: i32) -> (i32, i32) {
    %c0_i32 = arith.constant 0 : i32
    %c0_i32_0 = arith.constant 0 : i32
    %c0_i32_1 = arith.constant 0 : i32
    return %c0_i32, %c0_i32_0 : i32, i32
  }
  func.func @transform_17(%arg0: i32) -> (i32, i32) {
    %c0_i32 = arith.constant 0 : i32
    %c0_i32_0 = arith.constant 0 : i32
    %c0_i32_1 = arith.constant 0 : i32
    return %c0_i32, %c0_i32_0 : i32, i32
  }
  func.func @transform_18(%arg0: i32) -> (i32, i32) {
    %c0_i32 = arith.constant 0 : i32
    %c0_i32_0 = arith.constant 0 : i32
    %c0_i32_1 = arith.constant 0 : i32
    return %c0_i32, %c0_i32_0 : i32, i32
  }
  func.func @transform_19(%arg0: i32) -> (i32, i32) {
    %c0_i32 = arith.constant 0 : i32
    %c0_i32_0 = arith.constant 0 : i32
    %c0_i32_1 = arith.constant 0 : i32
    return %c0_i32, %c0_i32_0 : i32, i32
  }
  func.func @transform_20(%arg0: i32) -> (i32, i32) {
    %c0_i32 = arith.constant 0 : i32
    %c0_i32_0 = arith.constant 0 : i32
    %c0_i32_1 = arith.constant 0 : i32
    return %c0_i32, %c0_i32_0 : i32, i32
  }
  func.func @transform_21(%arg0: i32) -> (i32, i32) {
    %c0_i32 = arith.constant 0 : i32
    %c0_i32_0 = arith.constant 0 : i32
    %c0_i32_1 = arith.constant 0 : i32
    return %c0_i32, %c0_i32_0 : i32, i32
  }
  func.func @transform_22(%arg0: i32) -> (i32, i32) {
    %c0_i32 = arith.constant 0 : i32
    %c0_i32_0 = arith.constant 0 : i32
    %c0_i32_1 = arith.constant 0 : i32
    return %c0_i32, %c0_i32_0 : i32, i32
  }
  func.func @transform_23(%arg0: i32) -> (i32, i32) {
    %c0_i32 = arith.constant 0 : i32
    %c0_i32_0 = arith.constant 0 : i32
    %c0_i32_1 = arith.constant 0 : i32
    return %c0_i32, %c0_i32_0 : i32, i32
  }
  func.func @transform_24(%arg0: i32) -> (i32, i32) {
    %c0_i32 = arith.constant 0 : i32
    %c0_i32_0 = arith.constant 0 : i32
    %c0_i32_1 = arith.constant 0 : i32
    return %c0_i32, %c0_i32_0 : i32, i32
  }
  func.func @transform_25(%arg0: i32) -> (i32, i32) {
    %c0_i32 = arith.constant 0 : i32
    %c0_i32_0 = arith.constant 0 : i32
    %c0_i32_1 = arith.constant 0 : i32
    return %c0_i32, %c0_i32_0 : i32, i32
  }
  func.func @transform_26(%arg0: i32) -> (i32, i32) {
    %c0_i32 = arith.constant 0 : i32
    %c0_i32_0 = arith.constant 0 : i32
    %c0_i32_1 = arith.constant 0 : i32
    return %c0_i32, %c0_i32_0 : i32, i32
  }
  func.func @transform_27(%arg0: i32) -> (i32, i32) {
    %c0_i32 = arith.constant 0 : i32
    %c0_i32_0 = arith.constant 0 : i32
    %c0_i32_1 = arith.constant 0 : i32
    return %c0_i32, %c0_i32_0 : i32, i32
  }
  func.func @transform_28(%arg0: i32) -> (i32, i32) {
    %c0_i32 = arith.constant 0 : i32
    %c0_i32_0 = arith.constant 0 : i32
    %c0_i32_1 = arith.constant 0 : i32
    return %c0_i32, %c0_i32_0 : i32, i32
  }
  func.func @transform_29(%arg0: i32) -> (i32, i32) {
    %c0_i32 = arith.constant 0 : i32
    %c0_i32_0 = arith.constant 0 : i32
    %c0_i32_1 = arith.constant 0 : i32
    return %c0_i32, %c0_i32_0 : i32, i32
  }
  func.func @transform_30(%arg0: i32) -> (i32, i32) {
    %c0_i32 = arith.constant 0 : i32
    %c0_i32_0 = arith.constant 0 : i32
    %c0_i32_1 = arith.constant 0 : i32
    return %c0_i32, %c0_i32_0 : i32, i32
  }
  func.func @transform_31(%arg0: i32) -> (i32, i32, i32) {
    %c0_i32 = arith.constant 0 : i32
    %c0_i32_0 = arith.constant 0 : i32
    %c0_i32_1 = arith.constant 0 : i32
    return %arg0, %c0_i32, %c0_i32_0 : i32, i32, i32
  }
  func.func @transform_32(%arg0: i32) -> (i32, i32, i32) {
    %c0_i32 = arith.constant 0 : i32
    %c0_i32_0 = arith.constant 0 : i32
    %c0_i32_1 = arith.constant 0 : i32
    return %arg0, %c0_i32, %c0_i32_0 : i32, i32, i32
  }
  func.func @transform_33(%arg0: i32) -> (i32, i32, i32) {
    %c0_i32 = arith.constant 0 : i32
    %c0_i32_0 = arith.constant 0 : i32
    %c0_i32_1 = arith.constant 0 : i32
    return %arg0, %c0_i32, %c0_i32_0 : i32, i32, i32
  }
  func.func @transform_34(%arg0: i32) -> (i32, i32, i32) {
    %c0_i32 = arith.constant 0 : i32
    %c0_i32_0 = arith.constant 0 : i32
    %c0_i32_1 = arith.constant 0 : i32
    return %arg0, %c0_i32, %c0_i32_0 : i32, i32, i32
  }
  func.func @transform_35(%arg0: i32) -> (i32, i32, i32) {
    %c0_i32 = arith.constant 0 : i32
    %c0_i32_0 = arith.constant 0 : i32
    %c0_i32_1 = arith.constant 0 : i32
    return %arg0, %c0_i32, %c0_i32_0 : i32, i32, i32
  }
}

</mosaic_0001>

<bundles_post_ra>
// kernel: _local_poe_net_forward.1
= control target key start
LH: loop header
LB: loop body
LE: loop exit
PB: predicated region body
PF: predicated region fallthrough
CT: control target
= control target key end

     0   :  { %s3684_s6 = smov 1   ;;  %s3685_s10 = smov 2   ;;  %s4434_s0 = inlined_call_operand.smem [shape: u32[36], index: -1, kind: input, shape index: {}] }
   0x1   :  { %s3736_s5 = sld [smem:[%s4434_s0]]   ;;  %s3686_s14 = smov 3  }
   0x2   :  { %s3741_s9 = sld [smem:[%s4434_s0 + %s3684_s6]]   ;;  %s3687_s18 = smov 4  }
   0x3   :  { %s3746_s13 = sld [smem:[%s4434_s0 + %s3685_s10]]   ;;  %s3688_s22 = smov 5  }
   0x4   :  { %s3751_s17 = sld [smem:[%s4434_s0 + %s3686_s14]]   ;;  %s3689_s26 = smov 6  }
   0x5   :  { %s3756_s21 = sld [smem:[%s4434_s0 + %s3687_s18]]   ;;  %s3690_s30 = smov 7  }
   0x6   :  { %s3761_s25 = sld [smem:[%s4434_s0 + %s3688_s22]]   ;;  %s3691_s4 = smov 8  }
   0x7   :  { %s3766_s29 = sld [smem:[%s4434_s0 + %s3689_s26]]   ;;  %s3692_s10 = smov 9  }
   0x8   :  { %s3771_s3 = sld [smem:[%s4434_s0 + %s3690_s30]]   ;;  %s3693_s15 = smov 10  }
   0x9   :  { %s3776_s8 = sld [smem:[%s4434_s0 + %s3691_s4]]   ;;  %s3694_s20 = smov 11  }
   0xa   :  { %4439 = sst [smem:[#allocation3_spill]] %s3751_s17  ;;  %s3695_s26 = smov 12  }
   0xb   :  { %s3781_s14 = sld [smem:[%s4434_s0 + %s3692_s10]]   ;;  %s3696_s1 = smov 13  }
   0xc   :  { %s3786_s19 = sld [smem:[%s4434_s0 + %s3693_s15]]   ;;  %s3697_s7 = smov 14  }
   0xd   :  { %s3791_s24 = sld [smem:[%s4434_s0 + %s3694_s20]]   ;;  %s3698_s15 = smov 15  }
   0xe   :  { %s3796_s30 = sld [smem:[%s4434_s0 + %s3695_s26]]   ;;  %s3699_s22 = smov 16  }
   0xf   :  { %s3801_s6 = sld [smem:[%s4434_s0 + %s3696_s1]]   ;;  %s3700_s28 = smov 17  }
  0x10   :  { %s3806_s12 = sld [smem:[%s4434_s0 + %s3697_s7]]   ;;  %s3701_s7 = smov 18  }
  0x11   :  { %s3811_s20 = sld [smem:[%s4434_s0 + %s3698_s15]]   ;;  %s3702_s15 = smov 19  }
  0x12   :  { %s3816_s27 = sld [smem:[%s4434_s0 + %s3699_s22]]   ;;  %s3703_s22 = smov 20  }
  0x13   :  { %s3821_s4 = sld [smem:[%s4434_s0 + %s3700_s28]]   ;;  %s3704_s28 = smov 21  }
  0x14   :  { %4440 = sst [smem:[#allocation4_spill]] %s3796_s30 }
  0x15   :  { %s3826_s17 = sld [smem:[%s4434_s0 + %s3701_s7]]   ;;  %s3705_s7 = smov 22  }
  0x16   :  { %s3831_s30 = sld [smem:[%s4434_s0 + %s3702_s15]]   ;;  %s3706_s15 = smov 23  }
  0x18   :  { %4441 = sst [smem:[#allocation5_spill]] %s3816_s27 }
  0x19   :  { %4442 = sst [smem:[#allocation6_spill]] %s3821_s4 }
  0x1a   :  { %s3836_s27 = sld [smem:[%s4434_s0 + %s3703_s22]]   ;;  %s3707_s22 = smov 24  }
  0x1b   :  { %4443 = sst [smem:[#allocation7_spill]] %s3826_s17 }
  0x1c   :  { %4444 = sst [smem:[#allocation8_spill]] %s3831_s30 }
  0x1d   :  { %s3841_s4 = sld [smem:[%s4434_s0 + %s3704_s28]]   ;;  %s3708_s28 = smov 25  }
  0x1e   :  { %s3846_s17 = sld [smem:[%s4434_s0 + %s3705_s7]]   ;;  %s3709_s7 = smov 26  }
  0x1f   :  { %s3851_s30 = sld [smem:[%s4434_s0 + %s3706_s15]]   ;;  %s3710_s15 = smov 27  }
  0x20   :  { %4445 = sst [smem:[#allocation9_spill]] %s3836_s27 }
  0x21   :  { %s3856_s27 = sld [smem:[%s4434_s0 + %s3707_s22]]   ;;  %s3711_s22 = smov 28  }
  0x23   :  { %4446 = sst [smem:[#allocation10_spill]] %s3841_s4 }
  0x24   :  { %4447 = sst [smem:[#allocation11_spill]] %s3846_s17 }
  0x25   :  { %4448 = sst [smem:[#allocation12_spill]] %s3851_s30 }
  0x26   :  { %s3861_s4 = sld [smem:[%s4434_s0 + %s3708_s28]]   ;;  %s3712_s28 = smov 29  }
  0x27   :  { %4449 = sst [smem:[#allocation13_spill]] %s3856_s27 }
  0x28   :  { %s3866_s17 = sld [smem:[%s4434_s0 + %s3709_s7]]   ;;  %s3713_s7 = smov 30  }
  0x29   :  { %s3871_s30 = sld [smem:[%s4434_s0 + %s3710_s15]]   ;;  %s3714_s15 = smov 31  }
  0x2a   :  { %s3876_s27 = sld [smem:[%s4434_s0 + %s3711_s22]]   ;;  %s3715_s22 = smov 32  }
  0x2c   :  { %4450 = sst [smem:[#allocation14_spill]] %s3861_s4 }
  0x2d   :  { %s3881_s4 = sld [smem:[%s4434_s0 + %s3712_s28]]   ;;  %s3716_s28 = smov 33  }
  0x2e   :  { %4451 = sst [smem:[#allocation15_spill]] %s3866_s17 }
  0x2f   :  { %4452 = sst [smem:[#allocation16_spill]] %s3871_s30 }
  0x30   :  { %4453 = sst [smem:[#allocation17_spill]] %s3876_s27 }
  0x31   :  { %s3886_s17 = sld [smem:[%s4434_s0 + %s3713_s7]]   ;;  %s3717_s7 = smov 34  }
  0x32   :  { %s3891_s30 = sld [smem:[%s4434_s0 + %s3714_s15]]   ;;  %s3718_s15 = smov 35  }
  0x33   :  { %4454 = sst [smem:[#allocation18_spill]] %s3881_s4 }
  0x34   :  { %s3896_s27 = sld [smem:[%s4434_s0 + %s3715_s22]]   ;;  %s3913_s22 = smov 0  }
  0x35   :  { %s3901_s4 = sld [smem:[%s4434_s0 + %s3716_s28]]  }
  0x37   :  { %4455 = sst [smem:[#allocation19_spill]] %s3886_s17 }
  0x38   :  { %4456 = sst [smem:[#allocation20_spill]] %s3891_s30 }
  0x39   :  { %s3906_s17 = sld [smem:[%s4434_s0 + %s3717_s7]]  }
  0x3a   :  { %s3911_s30 = sld [smem:[%s4434_s0 + %s3718_s15]]  }
  0x3b LB: > { %s3461_s23 = sadd.s32 4294967295, %s3682_s22   ;;  %p3465_p0 = scmp.ge.s32.totalorder %s3682_s22, 1  ;;  %s3682_s22 = sphi %s3913_s22, %s82_s22  }
  0x3c   : > { %p1012_p1 = scmp.lt.s32.totalorder %s3682_s22, 3 }
  0x3e   : > { %p1013_p2 = pnand %p3465_p0, %p1012_p1 }
  0x3f   : > { %p1135_p3 = scmp.lt.s32.totalorder (!%p1013_p2), %s3461_s23, 1  ;;  %s3720_s2 = smov (!%p1013_p2), 113  }
  0x40   : > { %1016 = sbr.rel (%p1013_p2) target bundleno = 2487 (0x9b7), region = 144  ;;  %s3721_s7 = smov (!%p1013_p2), 127  }
  0x41   : > { %s3722_s10 = smov (!%p1013_p2), 112   ;;  %s3723_s11 = smov (!%p1013_p2), 111  }
  0x42   : > { %s4435_s15 = smov (!%p1013_p2), 16   ;;  %s3725_s16 = smov (!%p1013_p2), 15  }
  0x43   : > { %s3726_s18 = smov (!%p1013_p2), 1  }
  0x45   : > { %v3719_v0 = vmov 0   ;;  %v1184_v1 = vld [vmem:[%s3766_s29] sm:$0x3]  ;;  %s4478_s23 = smov (!%p1135_p3, %s3461_s23), 1  ;;  %vm1196_vm0 = vcmask 64512   ;;  %v1246_v13 = vlaneseq  ;;  %vm1440_vm7 = vcmask 1041408  }
  0x46   : > { %3639 = vset.pattern.permute.xlu0 %v3719_v0  ;;  %3640 = vset.pattern.permute.xlu2 %v3719_v0  ;;  %s3578_s0 = sshll.u32 %s4478_s23, 4  ;;  %s3922_s26 = sshll.u32 %s4478_s23, 3  ;;  %v1183_v2 = vld [vmem:[%s3761_s25] sm:$0x3]  ;;  %v3489_v16 = vld [vmem:[%s3756_s21 + $0xa] sm:$0x3] }
  0x47   : > { %1193 = vperm.xlu0 %3639, %v1184_v1   ;;  %3641 = vset.pattern.permute.xlu1 %v3719_v0  ;;  %s3925_s28 = scalar_lea.vmem %s3736_s5, %s3578_s0  ;;  %s1144_s1 = scalar_lea.vmem %s3741_s9, %s3922_s26  ;;  %v3956_v15 = vand.u32 127, %v1246_v13  ;;  %v1345_v17 = vperm.slane %v3489_v16, 0  ;;  %v1346_v18 = vperm.slane %v3489_v16, 1  ;;  %v3490_v26 = vld [vmem:[%s3756_s21 + $0xc] sm:$0x3]  ;;  %vm1436_vm10 = vcmask 146432  }
  0x48   : > { %v3931_v3 = vld [vmem:[%s3925_s28] sm:$0xff]  ;;  %v3934_v5 = vld [vmem:[%s3925_s28 + $0x8] sm:$0xff]  ;;  %s4437_s23 = smov 17   ;;  %v1369_v30 = vperm.slane %v3490_v26, 0  ;;  %v1370_v31 = vperm.slane %v3490_v26, 1  ;;  %s1149_s0 = scalar_lea.vmem %s3746_s13, %s3922_s26  ;;  %vm1794_vm11 = vcmask 1043456  }
  0x49   : > { %v1776_v4 = vld [vmem:[%s1144_s1] sm:$0xff]  ;;  %1215 = vmatpush.msra.mxu0 %v3931_v3  ;;  %1235 = vmatpush.msra.mxu1 %v3934_v5  ;;  %vm1339_vm1 = vcmp.lt.s32.totalorder %v3956_v15, 127  ;;  %v3491_v27 = vld [vmem:[%s3756_s21 + $0xe] sm:$0x3]  ;;  %vm1363_vm2 = vcmp.lt.s32.totalorder %v3956_v15, 113  ;;  %vm1387_vm3 = vcmp.lt.s32.totalorder %v3956_v15, 112 }
  0x4a   : > { %1787 = vst [vmem:[#allocation1] ss:$2 sm:$0xff] %v1776_v4  ;;  %3484 = vmatmul.msk.f32.vlgmr.msra.gmra.mxu0 %vm1196_vm0, %v1183_v2  ;;  %3485 = vmatmul.msk.f32.vlgmr.msra.gmra.mxu1 %vm1196_vm0, %v1183_v2  ;;  %v1393_v32 = vperm.slane %v3491_v27, 0  ;;  %v1394_v33 = vperm.slane %v3491_v27, 1  ;;  %v3492_v44 = vld [vmem:[%s3756_s21 + $0x10] sm:$0x3] }
  0x4b   : > { %vm1411_vm4 = vcmp.lt.s32.totalorder %v3956_v15, 111  ;;  %v1417_v50 = vperm.slane %v3492_v44, 0  ;;  %v1418_v51 = vperm.slane %v3492_v44, 1  ;;  %v3486_v58 = vld [vmem:[%s3756_s21 + $0x2] sm:$0x3]  ;;  %vm1265_vm5 = vcmp.lt.s32.totalorder %v3956_v15, 16 }
  0x4c   : > { %v3487_v59 = vld [vmem:[%s3756_s21 + $0x4] sm:$0x3]  ;;  %v1271_v61 = vperm.slane %v3486_v58, 0  ;;  %v1272_v62 = vperm.slane %v3486_v58, 1  ;;  %v1186_v63 = vld [vmem:[%s3776_s8] sm:$0x3] }
  0x4d   : > { %vm1289_vm6 = vcmp.lt.s32.totalorder %v3956_v15, 15  ;;  %v1295_v0 = vperm.slane %v3487_v59, 0  ;;  %v1296_v1 = vperm.slane %v3487_v59, 1  ;;  %v3488_v16 = vld [vmem:[%s3756_s21 + $0x6] sm:$0x3]  ;;  %vm1313_vm8 = vcmp.lt.s32.totalorder %v3956_v15, 1 }
  0x4e   : > { %vm1248_vm9 = vcmp.lt.s32.totalorder %v3956_v15, 17  ;;  %vm1790_vm12 = vcmask 31744   ;;  %vm1722_vm13 = vcmask 15360   ;;  %s4457_s1 = sld [smem:[#allocation6_spill]]  ;;  %vm2084_vm14 = vcmask 1042432  }
  0x4f   : > { %vm2080_vm15 = vcmask 220160  }
  0xb9   : > { %v1194_v6 = vpop.permute.xlu0 %1193 }
  0xc7   : > { %v1217_v7 = vpop.f32.mrf.mxu0  ;;  %v1237_v8 = vpop.f32.mrf.mxu1 }
  0xc8   : > { %v1218_v9 = vadd.f32 %v1217_v7, %v1194_v6  ;;  %v1238_v10 = vadd.f32 %v1237_v8, %v1194_v6 }
  0xca   : > { %v1240_v11 = vmax.f32 %v1218_v9, 0.0  ;;  %v1241_v12 = vmax.f32 %v1238_v10, 0.0 }
  0xcc   : > { %1333 = vst [vmem:[#allocation2 + $0x18] sm:$0x3] %v1240_v11  ;;  %1361 = vrot.lane.b32.xlu2 %v1241_v12, %s3720_s2  ;;  %1337 = vrot.lane.b32.xlu1 %v1241_v12, %s3721_s7 }
  0xcd   : > { %1334 = vst [vmem:[#allocation2 + $0x10] sm:$0x3] %v1241_v12  ;;  %1335 = vrot.lane.b32.xlu0 %v1240_v11, %s3721_s7 }
  0xd4   : > { %1383 = vrot.lane.b32.xlu2 %v1240_v11, %s3722_s10  ;;  %1359 = vrot.lane.b32.xlu1 %v1240_v11, %s3720_s2 }
  0xd5   : > { %1385 = vrot.lane.b32.xlu0 %v1241_v12, %s3722_s10 }
  0xdc   : > { %1409 = vrot.lane.b32.xlu2 %v1241_v12, %s3723_s11  ;;  %1407 = vrot.lane.b32.xlu1 %v1240_v11, %s3723_s11 }
  0xdd   : > { %1261 = vrot.lane.b32.xlu0 %v1240_v11, %s4435_s15 }
  0xe4   : > { %1285 = vrot.lane.b32.xlu2 %v1240_v11, %s3725_s16  ;;  %1263 = vrot.lane.b32.xlu1 %v1241_v12, %s4435_s15 }
  0xe5   : > { %1287 = vrot.lane.b32.xlu0 %v1241_v12, %s3725_s16 }
  0xec   : > { %1311 = vrot.lane.b32.xlu2 %v1241_v12, %s3726_s18  ;;  %1309 = vrot.lane.b32.xlu1 %v1240_v11, %s3726_s18 }
  0xed   : > { %1242 = vrot.lane.b32.xlu0 %v1240_v11, %s4437_s23 }
  0xf4   : > { %1244 = vrot.lane.b32.xlu1 %v1241_v12, %s4437_s23  ;;  %1433 = vperm.xlu2 %3640, %v1186_v63  }
 0x126   : > { %v1362_v14 = vpop.permute.xlu2 %1361 }
 0x12e   : > { %v1384_v21 = vpop.permute.xlu2 %1383 }
 0x136   : > { %v1410_v45 = vpop.permute.xlu2 %1409 }
 0x13e   : > { %v1338_v19 = vpop.permute.xlu1 %1337  ;;  %v1286_v60 = vpop.permute.xlu2 %1285 }
 0x13f   : > { %v1336_v20 = vpop.permute.xlu0 %1335 }
 0x140   : > { %v1340_v22 = vsel %vm1339_vm1, %v1336_v20, %v1338_v19  ;;  %v1341_v23 = vsel %vm1339_vm1, %v1338_v19, %v1336_v20 }
 0x141   : > { %v1349_v24 = vmul.f32 %v1345_v17, %v1340_v22  ;;  %v1350_v25 = vmul.f32 %v1346_v18, %v1341_v23 }
 0x143   : > { %v1353_v28 = vrot.slane %v1349_v24, 6  ;;  %v1354_v29 = vrot.slane %v1350_v25, 6  ;;  %v1319_v24 = vperm.slane %v3488_v16, 0  ;;  %v1320_v25 = vperm.slane %v3488_v16, 1 }
 0x145   : > { %1357 = vst [vmem:[#allocation2 + $0x18] sm:$0xc] %v1353_v28 }
 0x146   : > { %1358 = vst [vmem:[#allocation2 + $0x10] sm:$0xc] %v1354_v29  ;;  %v1360_v34 = vpop.permute.xlu1 %1359  ;;  %v1312_v26 = vpop.permute.xlu2 %1311 }
 0x147   : > { %v1364_v35 = vsel %vm1363_vm2, %v1360_v34, %v1362_v14  ;;  %v1365_v36 = vsel %vm1363_vm2, %v1362_v14, %v1360_v34  ;;  %v1386_v37 = vpop.permute.xlu0 %1385 }
 0x148   : > { %v1373_v38 = vmul.f32 %v1369_v30, %v1364_v35  ;;  %v1374_v39 = vmul.f32 %v1370_v31, %v1365_v36  ;;  %v1388_v40 = vsel %vm1387_vm3, %v1384_v21, %v1386_v37  ;;  %v1389_v41 = vsel %vm1387_vm3, %v1386_v37, %v1384_v21 }
 0x149   : > { %v1397_v42 = vmul.f32 %v1393_v32, %v1388_v40  ;;  %v1398_v43 = vmul.f32 %v1394_v33, %v1389_v41  ;;  %v1251_v32 = vld [vmem:[%s3756_s21] sm:$0x3] }
 0x14a   : > { %v1377_v46 = vrot.slane %v1373_v38, 4  ;;  %v1378_v47 = vrot.slane %v1374_v39, 4  ;;  %v1253_v35 = vperm.slane %v1251_v32, 0  ;;  %v1254_v36 = vperm.slane %v1251_v32, 1 }
 0x14b   : > { %v1401_v48 = vrot.slane %v1397_v42, 2  ;;  %v1402_v49 = vrot.slane %v1398_v43, 2  ;;  %v1185_v43 = vld [vmem:[%s3771_s3] sm:$0x3] }
 0x14c   : > { %1381 = vst [vmem:[#allocation2 + $0x18] sm:$0x30] %v1377_v46 }
 0x14d   : > { %1382 = vst [vmem:[#allocation2 + $0x10] sm:$0x30] %v1378_v47 }
 0x14e   : > { %1405 = vst [vmem:[#allocation2 + $0x18] sm:$0xc0] %v1401_v48  ;;  %v1408_v52 = vpop.permute.xlu1 %1407  ;;  %v1434_v46 = vpop.permute.xlu2 %1433 }
 0x14f   : > { %1406 = vst [vmem:[#allocation2 + $0x10] sm:$0xc0] %v1402_v49  ;;  %v1412_v53 = vsel %vm1411_vm4, %v1408_v52, %v1410_v45  ;;  %v1413_v54 = vsel %vm1411_vm4, %v1410_v45, %v1408_v52  ;;  %v1262_v55 = vpop.permute.xlu0 %1261 }
 0x150   : > { %v1421_v56 = vmul.f32 %v1417_v50, %v1412_v53  ;;  %v1422_v57 = vmul.f32 %v1418_v51, %v1413_v54  ;;  %v1779_v53 = vld [vmem:[%s3811_s20] sm:$0x7] }
 0x152   : > { %1423 = vst [vmem:[#allocation2 + $0x8] sm:$0x3] %v1421_v56 }
 0x153   : > { %1424 = vst [vmem:[#allocation2 + $0x20] sm:$0x3] %v1422_v57 }
 0x155   : > { %v1427_v20 = vld [vmem:[#allocation2 + $0x18] sm:$0xff] }
 0x156   : > { %v1264_v2 = vpop.permute.xlu1 %1263  ;;  %v1428_v23 = vld [vmem:[#allocation2 + $0x10] sm:$0xff] }
 0x157   : > { %v1266_v4 = vsel %vm1265_vm5, %v1262_v55, %v1264_v2  ;;  %v1267_v6 = vsel %vm1265_vm5, %v1264_v2, %v1262_v55  ;;  %v1288_v7 = vpop.permute.xlu0 %1287  ;;  %v3500_v55 = vld [vmem:[%s3756_s21 + $0xa] sm:$0x3] }
 0x158   : > { %v1275_v8 = vmul.f32 %v1271_v61, %v1267_v6  ;;  %v1276_v9 = vmul.f32 %v1272_v62, %v1266_v4  ;;  %v1290_v10 = vsel %vm1289_vm6, %v1286_v60, %v1288_v7  ;;  %v1291_v11 = vsel %vm1289_vm6, %v1288_v7, %v1286_v60 }
 0x159   : > { %v1299_v12 = vmul.f32 %v1295_v0, %v1291_v11  ;;  %v1300_v13 = vmul.f32 %v1296_v1, %v1290_v10  ;;  %v1429_v14 = vld [vmem:[#allocation2 + $0x8] sm:$0x3]  ;;  %v1581_v56 = vperm.slane %v3500_v55, 0  ;;  %v1582_v57 = vperm.slane %v3500_v55, 1  ;;  %v3501_v0 = vld [vmem:[%s3756_s21 + $0xc] sm:$0x3] }
 0x15a   : > { %v1279_v17 = vrot.slane %v1275_v8, 6  ;;  %v1280_v18 = vrot.slane %v1276_v9, 6  ;;  %3493 = vmatpush.msk.msra.mxu2 %vm1440_vm7, %v1429_v14  ;;  %v1430_v19 = vld [vmem:[#allocation2 + $0x20] sm:$0x3]  ;;  %v3502_v1 = vld [vmem:[%s3756_s21 + $0xe] sm:$0x3] }
 0x15b   : > { %v1303_v21 = vrot.slane %v1299_v12, 4  ;;  %v1304_v22 = vrot.slane %v1300_v13, 4  ;;  %3495 = vmatpush.msk.msra.mxu3 %vm1440_vm7, %v1430_v19  ;;  %v1603_v7 = vperm.slane %v3501_v0, 0  ;;  %v1604_v8 = vperm.slane %v3501_v0, 1 }
 0x15c   : > { %1283 = vst [vmem:[#allocation2 + $0x30] sm:$0xc] %v1279_v17  ;;  %1461 = vmatpush.msra.mxu2 %v1427_v20  ;;  %v1625_v9 = vperm.slane %v3502_v1, 0  ;;  %v1626_v10 = vperm.slane %v3502_v1, 1 }
 0x15d   : > { %1284 = vst [vmem:[#allocation2] sm:$0xc] %v1280_v18  ;;  %1481 = vmatpush.msra.mxu3 %v1428_v23  ;;  %v3503_v23 = vld [vmem:[%s3756_s21 + $0x10] sm:$0x3] }
 0x15e   : > { %1307 = vst [vmem:[#allocation2 + $0x30] sm:$0x30] %v1303_v21  ;;  %v1310_v27 = vpop.permute.xlu1 %1309 }
 0x15f   : > { %1308 = vst [vmem:[#allocation2] sm:$0x30] %v1304_v22  ;;  %v1314_v28 = vsel %vm1313_vm8, %v1310_v27, %v1312_v26  ;;  %v1315_v29 = vsel %vm1313_vm8, %v1312_v26, %v1310_v27  ;;  %v1243_v37 = vpop.permute.xlu0 %1242 }
 0x160   : > { %v1323_v30 = vmul.f32 %v1319_v24, %v1315_v29  ;;  %v1324_v31 = vmul.f32 %v1320_v25, %v1314_v28  ;;  %v1647_v28 = vperm.slane %v3503_v23, 0  ;;  %v1648_v29 = vperm.slane %v3503_v23, 1 }
 0x162   : > { %v1327_v33 = vrot.slane %v1323_v30, 2  ;;  %v1328_v34 = vrot.slane %v1324_v31, 2 }
 0x164   : > { %1331 = vst [vmem:[#allocation2 + $0x30] sm:$0xc0] %v1327_v33 }
 0x165   : > { %1332 = vst [vmem:[#allocation2] sm:$0xc0] %v1328_v34 }
 0x166   : > { %v1245_v38 = vpop.permute.xlu1 %1244 }
 0x167   : > { %v1249_v39 = vsel %vm1248_vm9, %v1243_v37, %v1245_v38  ;;  %v1250_v40 = vsel %vm1248_vm9, %v1245_v38, %v1243_v37  ;;  %v3498_v37 = vld [vmem:[%s3756_s21 + $0x4] sm:$0x3] }
 0x168   : > { %v1257_v41 = vmul.f32 %v1253_v35, %v1250_v40  ;;  %v1258_v42 = vmul.f32 %v1254_v36, %v1249_v39  ;;  %v3497_v36 = vld [vmem:[%s3756_s21 + $0x2] sm:$0x3]  ;;  %v1188_v40 = vld [vmem:[%s3786_s19] sm:$0x3] }
 0x169   : > { %v1513_v38 = vperm.slane %v3497_v36, 0  ;;  %v1514_v39 = vperm.slane %v3497_v36, 1  ;;  %v1777_v36 = vld [vmem:[%s3801_s6] sm:$0x7] }
 0x16a   : > { %1259 = vst [vmem:[#allocation2 + $0x30] sm:$0x3] %v1257_v41  ;;  %v1535_v41 = vperm.slane %v3498_v37, 0 }
 0x16b   : > { %1260 = vst [vmem:[#allocation2] sm:$0x3] %v1258_v42  ;;  %v1536_v42 = vperm.slane %v3498_v37, 1 }
 0x171   : > { %v1425_v44 = vld [vmem:[#allocation2 + $0x30] sm:$0xff] }
 0x172   : > { %v1426_v45 = vld [vmem:[#allocation2] sm:$0xff]  ;;  %1462 = vmatpush.msra.mxu2 %v1425_v44 }
 0x173   : > { %1482 = vmatpush.msra.mxu3 %v1426_v45  ;;  %3494 = vmatmul.msk.f32.vlgmr.msra.gmra.mxu2 %vm1436_vm10, %v1185_v43 }
 0x174   : > { %3496 = vmatmul.msk.f32.vlgmr.msra.gmra.mxu3 %vm1436_vm10, %v1185_v43 }
 0x1f6   : > { %v1464_v47 = vpop.f32.mrf.mxu2 }
 0x1f7   : > { %v1465_v48 = vadd.f32 %v1464_v47, %v1434_v46  ;;  %v1484_v49 = vpop.f32.mrf.mxu3 }
 0x1f8   : > { %v1485_v50 = vadd.f32 %v1484_v49, %v1434_v46 }
 0x1f9   : > { %v1487_v51 = vmax.f32 %v1465_v48, 0.0 }
 0x1fa   : > { %v1488_v52 = vmax.f32 %v1485_v50, 0.0 }
 0x1fb   : > { %1571 = vst [vmem:[#allocation2 + $0x18] sm:$0x3] %v1487_v51  ;;  %1595 = vrot.lane.b32.xlu2 %v1487_v51, %s3720_s2  ;;  %1573 = vrot.lane.b32.xlu0 %v1487_v51, %s3721_s7 }
 0x1fc   : > { %1572 = vst [vmem:[#allocation2 + $0x10] sm:$0x3] %v1488_v52  ;;  %1575 = vrot.lane.b32.xlu1 %v1488_v52, %s3721_s7 }
 0x203   : > { %1619 = vrot.lane.b32.xlu2 %v1488_v52, %s3722_s10  ;;  %1597 = vrot.lane.b32.xlu0 %v1488_v52, %s3720_s2 }
 0x204   : > { %1617 = vrot.lane.b32.xlu1 %v1487_v51, %s3722_s10 }
 0x20b   : > { %1505 = vrot.lane.b32.xlu2 %v1487_v51, %s4435_s15  ;;  %1639 = vrot.lane.b32.xlu0 %v1487_v51, %s3723_s11 }
 0x20c   : > { %1641 = vrot.lane.b32.xlu1 %v1488_v52, %s3723_s11 }
 0x213   : > { %1529 = vrot.lane.b32.xlu2 %v1488_v52, %s3725_s16  ;;  %1507 = vrot.lane.b32.xlu0 %v1488_v52, %s4435_s15 }
 0x214   : > { %1527 = vrot.lane.b32.xlu1 %v1487_v51, %s3725_s16 }
 0x21b   : > { %1489 = vrot.lane.b32.xlu2 %v1487_v51, %s4437_s23  ;;  %1549 = vrot.lane.b32.xlu0 %v1487_v51, %s3726_s18 }
 0x21c   : > { %1551 = vrot.lane.b32.xlu1 %v1488_v52, %s3726_s18 }
 0x223   : > { %1884 = vperm.xlu2 %3640, %v1779_v53   ;;  %1491 = vrot.lane.b32.xlu0 %v1488_v52, %s4437_s23 }
 0x224   : > { %1663 = vperm.xlu1 %3641, %v1188_v40  }
 0x255   : > { %v1596_v54 = vpop.permute.xlu2 %1595 }
 0x25d   : > { %v1620_v2 = vpop.permute.xlu2 %1619 }
 0x265   : > { %v1506_v27 = vpop.permute.xlu2 %1505 }
 0x26d   : > { %v1574_v58 = vpop.permute.xlu0 %1573  ;;  %v1530_v44 = vpop.permute.xlu2 %1529 }
 0x26e   : > { %v1576_v59 = vpop.permute.xlu1 %1575 }
 0x26f   : > { %v1577_v60 = vsel %vm1339_vm1, %v1574_v58, %v1576_v59  ;;  %v1578_v61 = vsel %vm1339_vm1, %v1576_v59, %v1574_v58 }
 0x270   : > { %v1585_v62 = vmul.f32 %v1581_v56, %v1577_v60  ;;  %v1586_v63 = vmul.f32 %v1582_v57, %v1578_v61  ;;  %v3499_v56 = vld [vmem:[%s3756_s21 + $0x6] sm:$0x3] }
 0x271   : > { %v1558_v0 = vperm.slane %v3499_v56, 1 }
 0x272   : > { %v1589_v4 = vrot.slane %v1585_v62, 6  ;;  %v1590_v6 = vrot.slane %v1586_v63, 6  ;;  %v1557_v63 = vperm.slane %v3499_v56, 0 }
 0x274   : > { %1593 = vst [vmem:[#allocation2 + $0x18] sm:$0xc] %v1589_v4 }
 0x275   : > { %1594 = vst [vmem:[#allocation2 + $0x10] sm:$0xc] %v1590_v6  ;;  %v1598_v11 = vpop.permute.xlu0 %1597 }
 0x276   : > { %v1618_v12 = vpop.permute.xlu1 %1617  ;;  %v1599_v13 = vsel %vm1363_vm2, %v1596_v54, %v1598_v11  ;;  %v1600_v14 = vsel %vm1363_vm2, %v1598_v11, %v1596_v54 }
 0x277   : > { %v1621_v16 = vsel %vm1387_vm3, %v1618_v12, %v1620_v2  ;;  %v1622_v17 = vsel %vm1387_vm3, %v1620_v2, %v1618_v12  ;;  %v1607_v18 = vmul.f32 %v1603_v7, %v1599_v13  ;;  %v1608_v19 = vmul.f32 %v1604_v8, %v1600_v14  ;;  %v1490_v14 = vpop.permute.xlu2 %1489 }
 0x278   : > { %v1629_v20 = vmul.f32 %v1625_v9, %v1621_v16  ;;  %v1630_v21 = vmul.f32 %v1626_v10, %v1622_v17  ;;  %v1495_v9 = vld [vmem:[%s3756_s21] sm:$0x3] }
 0x279   : > { %v1611_v22 = vrot.slane %v1607_v18, 4  ;;  %v1612_v26 = vrot.slane %v1608_v19, 4  ;;  %v1497_v12 = vperm.slane %v1495_v9, 0  ;;  %v1498_v13 = vperm.slane %v1495_v9, 1 }
 0x27a   : > { %v1633_v24 = vrot.slane %v1629_v20, 2  ;;  %v1634_v25 = vrot.slane %v1630_v21, 2  ;;  %v1187_v21 = vld [vmem:[%s3781_s14] sm:$0x3] }
 0x27b   : > { %1615 = vst [vmem:[#allocation2 + $0x18] sm:$0x30] %v1611_v22 }
 0x27c   : > { %1637 = vst [vmem:[#allocation2 + $0x18] sm:$0xc0] %v1633_v24  ;;  %v1788_v24 = vld.sshfl [vmem:[#allocation1] sm:$0xff pattern:$0x75316420] }
 0x27d   : > { %1638 = vst [vmem:[#allocation2 + $0x10] sm:$0xc0] %v1634_v25  ;;  %v1640_v30 = vpop.permute.xlu0 %1639  ;;  %v2436_v25 = vld [vmem:[%s1149_s0] sm:$0xff]  ;;  %s4458_s0 = sld [smem:[#allocation5_spill]] }
 0x27e   : > { %1616 = vst [vmem:[#allocation2 + $0x10] sm:$0x30] %v1612_v26  ;;  %v1642_v31 = vpop.permute.xlu1 %1641  ;;  %v1789_v26 = vld.sshfl [vmem:[#allocation1 + $0x8] sm:$0xff pattern:$0x75316420] }
 0x27f   : > { %v1643_v32 = vsel %vm1411_vm4, %v1640_v30, %v1642_v31  ;;  %v1644_v33 = vsel %vm1411_vm4, %v1642_v31, %v1640_v30  ;;  %2447 = vst [vmem:[#allocation1] ss:$2 sm:$0xff] %v2436_v25 }
 0x280   : > { %v1651_v34 = vmul.f32 %v1647_v28, %v1643_v32  ;;  %v1652_v35 = vmul.f32 %v1648_v29, %v1644_v33 }
 0x282   : > { %1653 = vst [vmem:[#allocation2 + $0x8] sm:$0x3] %v1651_v34  ;;  %v1189_v34 = vld [vmem:[%s3791_s24] sm:$0xff] }
 0x283   : > { %1654 = vst [vmem:[#allocation2 + $0x20] sm:$0x3] %v1652_v35  ;;  %v1657_v61 = vld [vmem:[#allocation2 + $0x18] sm:$0xff] }
 0x285   : > { %v1508_v43 = vpop.permute.xlu0 %1507  ;;  %v1658_v62 = vld [vmem:[#allocation2 + $0x10] sm:$0xff] }
 0x286   : > { %v1528_v45 = vpop.permute.xlu1 %1527  ;;  %v1509_v46 = vsel %vm1265_vm5, %v1506_v27, %v1508_v43  ;;  %v1510_v47 = vsel %vm1265_vm5, %v1508_v43, %v1506_v27  ;;  %v1778_v27 = vld [vmem:[%s3806_s12] sm:$0x7] }
 0x287   : > { %v1531_v48 = vsel %vm1289_vm6, %v1528_v45, %v1530_v44  ;;  %v1532_v49 = vsel %vm1289_vm6, %v1530_v44, %v1528_v45  ;;  %v1517_v50 = vmul.f32 %v1513_v38, %v1510_v47  ;;  %v1518_v51 = vmul.f32 %v1514_v39, %v1509_v46  ;;  %v1885_v44 = vpop.permute.xlu2 %1884 }
 0x288   : > { %v1539_v52 = vmul.f32 %v1535_v41, %v1532_v49  ;;  %v1540_v53 = vmul.f32 %v1536_v42, %v1531_v48 }
 0x289   : > { %v1521_v54 = vrot.slane %v1517_v50, 6  ;;  %v1659_v55 = vld [vmem:[#allocation2 + $0x8] sm:$0x3]  ;;  %v1522_v59 = vrot.slane %v1518_v51, 6  ;;  %v1781_v50 = vld [vmem:[%s4457_s1] sm:$0x7] }
 0x28a   : > { %v1543_v57 = vrot.slane %v1539_v52, 4  ;;  %v1544_v58 = vrot.slane %v1540_v53, 4  ;;  %3504 = vmatpush.msk.msrb.mxu0 %vm1440_vm7, %v1659_v55  ;;  %v1660_v60 = vld [vmem:[#allocation2 + $0x20] sm:$0x3]  ;;  %v3521_v52 = vld [vmem:[%s3756_s21 + $0xa] sm:$0x3] }
 0x28b   : > { %1525 = vst [vmem:[#allocation2 + $0x30] sm:$0xc] %v1521_v54  ;;  %3506 = vmatpush.msk.msrb.mxu1 %vm1440_vm7, %v1660_v60  ;;  %v1991_v53 = vperm.slane %v3521_v52, 0  ;;  %v1992_v54 = vperm.slane %v3521_v52, 1  ;;  %v3518_v52 = vld [vmem:[%s3756_s21 + $0x2] sm:$0x3] }
 0x28c   : > { %1547 = vst [vmem:[#allocation2 + $0x30] sm:$0x30] %v1543_v57  ;;  %1689 = vmatpush.msrb.mxu0 %v1657_v61  ;;  %v3522_v61 = vld [vmem:[%s3756_s21 + $0xc] sm:$0x3]  ;;  %s4459_s1 = sld [smem:[#allocation13_spill]] }
 0x28d   : > { %1548 = vst [vmem:[#allocation2] sm:$0x30] %v1544_v58  ;;  %1709 = vmatpush.msrb.mxu1 %v1658_v62  ;;  %v1550_v1 = vpop.permute.xlu0 %1549  ;;  %v3523_v62 = vld [vmem:[%s3756_s21 + $0xe] sm:$0x3] }
 0x28e   : > { %1526 = vst [vmem:[#allocation2] sm:$0xc] %v1522_v59  ;;  %v1552_v2 = vpop.permute.xlu1 %1551 }
 0x28f   : > { %v1553_v4 = vsel %vm1313_vm8, %v1550_v1, %v1552_v2  ;;  %v1554_v6 = vsel %vm1313_vm8, %v1552_v2, %v1550_v1  ;;  %v2015_v2 = vperm.slane %v3522_v61, 0 }
 0x290   : > { %v1561_v7 = vmul.f32 %v1557_v63, %v1554_v6  ;;  %v1562_v8 = vmul.f32 %v1558_v0, %v1553_v4  ;;  %v2016_v4 = vperm.slane %v3522_v61, 1  ;;  %v2037_v6 = vperm.slane %v3523_v62, 0 }
 0x292   : > { %v1565_v10 = vrot.slane %v1561_v7, 2  ;;  %v1566_v11 = vrot.slane %v1562_v8, 2  ;;  %v2038_v7 = vperm.slane %v3523_v62, 1 }
 0x294   : > { %1569 = vst [vmem:[#allocation2 + $0x30] sm:$0xc0] %v1565_v10 }
 0x295   : > { %1570 = vst [vmem:[#allocation2] sm:$0xc0] %v1566_v11  ;;  %v1492_v16 = vpop.permute.xlu0 %1491 }
 0x296   : > { %v1493_v17 = vsel %vm1248_vm9, %v1490_v14, %v1492_v16  ;;  %v1494_v18 = vsel %vm1248_vm9, %v1492_v16, %v1490_v14  ;;  %v1664_v28 = vpop.permute.xlu1 %1663 }
 0x297   : > { %v1501_v19 = vmul.f32 %v1497_v12, %v1494_v18  ;;  %v1502_v20 = vmul.f32 %v1498_v13, %v1493_v17 }
 0x299   : > { %1503 = vst [vmem:[#allocation2 + $0x30] sm:$0x3] %v1501_v19 }
 0x29a   : > { %1504 = vst [vmem:[#allocation2] sm:$0x3] %v1502_v20  ;;  %v3524_v20 = vld [vmem:[%s3756_s21 + $0x10] sm:$0x3] }
 0x29b   : > { %v2059_v25 = vperm.slane %v3524_v20, 0 }
 0x2a0   : > { %v1655_v22 = vld [vmem:[#allocation2 + $0x30] sm:$0xff] }
 0x2a1   : > { %v1656_v23 = vld [vmem:[#allocation2] sm:$0xff]  ;;  %1690 = vmatpush.msrb.mxu0 %v1655_v22 }
 0x2a2   : > { %1710 = vmatpush.msrb.mxu1 %v1656_v23  ;;  %3505 = vmatmul.msk.f32.vlgmr.msrb.gmra.mxu0 %vm1436_vm10, %v1187_v21 }
 0x2a3   : > { %3507 = vmatmul.msk.f32.vlgmr.msrb.gmra.mxu1 %vm1436_vm10, %v1187_v21  ;;  %3512 = vmatpush.msk.msra.mxu0 %vm1794_vm11, %v1788_v24 }
 0x2a4   : > { %3514 = vmatpush.msk.msra.mxu1 %vm1794_vm11, %v1789_v26  ;;  %v2060_v26 = vperm.slane %v3524_v20, 1 }
 0x2aa   : > { %3513 = vmatmul.msk.f32.vlgmr.msra.gmra.mxu0 %vm1790_vm12, %v1778_v27 }
 0x2ab   : > { %3515 = vmatmul.msk.f32.vlgmr.msra.gmra.mxu1 %vm1790_vm12, %v1778_v27 }
 0x31f   : > { %v1692_v29 = vpop.f32.mrf.mxu0 }
 0x320   : > { %v1693_v30 = vadd.f32 %v1692_v29, %v1664_v28  ;;  %v1712_v31 = vpop.f32.mrf.mxu1 }
 0x321   : > { %v1713_v32 = vadd.f32 %v1712_v31, %v1664_v28 }
 0x322   : > { %v1715_v33 = vmax.f32 %v1693_v30, 0.0 }
 0x323   : > { %v1716_v35 = vmax.f32 %v1713_v32, 0.0 }
 0x324   : > { %3508 = vmatpush.msk.msrb.mxu2 %vm1440_vm7, %v1715_v33  ;;  %v3519_v33 = vld [vmem:[%s3756_s21 + $0x4] sm:$0x3] }
 0x325   : > { %3510 = vmatpush.msk.msrb.mxu3 %vm1440_vm7, %v1716_v35  ;;  %3509 = vmatmul.msk.f32.vlgmr.msrb.gmra.mxu2 %vm1722_vm13, %v1189_v34  ;;  %v1937_v35 = vperm.slane %v3519_v33, 0  ;;  %vm2378_vm7 = vcmask 23552  }
 0x326   : > { %3511 = vmatmul.msk.f32.vlgmr.msrb.gmra.mxu3 %vm1722_vm13, %v1189_v34  ;;  %1857 = vmatpush.msra.mxu2 %v3931_v3  ;;  %v3520_v34 = vld [vmem:[%s3756_s21 + $0x6] sm:$0x3] }
 0x327   : > { %1877 = vmatpush.msra.mxu3 %v3934_v5  ;;  %v1816_v39 = vpop.f32.mrf.mxu0 }
 0x328   : > { %v1836_v40 = vpop.f32.mrf.mxu1 }
 0x32d   : > { %3516 = vmatmul.msk.f32.vlgmr.msra.gmra.mxu2 %vm1196_vm0, %v1777_v36 }
 0x32e   : > { %3517 = vmatmul.msk.f32.vlgmr.msra.gmra.mxu3 %vm1196_vm0, %v1777_v36  ;;  %v1938_v36 = vperm.slane %v3519_v33, 1 }
 0x3a8   : > { %v4090_v37 = vpop.f32.mrf.mxu2 }
 0x3a9   : > { %v4092_v38 = vpop.f32.mrf.mxu3 }
 0x3b0   : > { %v1859_v41 = vpop.f32.mrf.mxu2 }
 0x3b1   : > { %v1860_v42 = vadd.f32 %v1859_v41, %v1816_v39  ;;  %v1879_v43 = vpop.f32.mrf.mxu3  ;;  %v1961_v39 = vperm.slane %v3520_v34, 0 }
 0x3b2   : > { %v1880_v45 = vadd.f32 %v1879_v43, %v1836_v40  ;;  %v1962_v40 = vperm.slane %v3520_v34, 1 }
 0x3b3   : > { %v1887_v46 = vadd.f32 %v1885_v44, %v1860_v42 }
 0x3b4   : > { %v1888_v3 = vadd.f32 %v1885_v44, %v1880_v45 }
 0x3b5   : > { %v1889_v47 = vmax.f32 %v1887_v46, 0.0 }
 0x3b6   : > { %v1890_v5 = vmax.f32 %v1888_v3, 0.0 }
 0x3b7   : > { %v1977_v48 = vrot.slane %v1889_v47, 4  ;;  %2007 = vrot.lane.b32.xlu2 %v1889_v47, %s3720_s2  ;;  %1983 = vrot.lane.b32.xlu0 %v1889_v47, %s3721_s7 }
 0x3b8   : > { %v1978_v49 = vrot.slane %v1890_v5, 4  ;;  %1985 = vrot.lane.b32.xlu1 %v1890_v5, %s3721_s7 }
 0x3b9   : > { %1981 = vst [vmem:[#allocation2 + $0x18] sm:$0x70] %v1977_v48 }
 0x3ba   : > { %1982 = vst [vmem:[#allocation2 + $0x10] sm:$0x70] %v1978_v49 }
 0x3bf   : > { %2031 = vrot.lane.b32.xlu2 %v1890_v5, %s3722_s10  ;;  %2009 = vrot.lane.b32.xlu0 %v1890_v5, %s3720_s2 }
 0x3c0   : > { %2029 = vrot.lane.b32.xlu1 %v1889_v47, %s3722_s10 }
 0x3c7   : > { %1929 = vrot.lane.b32.xlu2 %v1889_v47, %s3725_s16  ;;  %2051 = vrot.lane.b32.xlu0 %v1889_v47, %s3723_s11 }
 0x3c8   : > { %2053 = vrot.lane.b32.xlu1 %v1890_v5, %s3723_s11 }
 0x3cf   : > { %1955 = vrot.lane.b32.xlu2 %v1890_v5, %s3726_s18  ;;  %1931 = vrot.lane.b32.xlu0 %v1890_v5, %s3725_s16 }
 0x3d0   : > { %1953 = vrot.lane.b32.xlu1 %v1889_v47, %s3726_s18 }
 0x3d7   : > { %1891 = vrot.lane.b32.xlu2 %v1889_v47, %s4437_s23  ;;  %1907 = vrot.lane.b32.xlu0 %v1889_v47, %s4435_s15 }
 0x3d8   : > { %1909 = vrot.lane.b32.xlu1 %v1890_v5, %s4435_s15 }
 0x3df   : > { %1893 = vrot.lane.b32.xlu0 %v1890_v5, %s4437_s23 }
 0x3e0   : > { %2077 = vperm.xlu1 %3641, %v1781_v50  }
 0x411   : > { %v2008_v51 = vpop.permute.xlu2 %2007 }
 0x419   : > { %v2032_v63 = vpop.permute.xlu2 %2031 }
 0x421   : > { %v1930_v24 = vpop.permute.xlu2 %1929 }
 0x429   : > { %v1984_v55 = vpop.permute.xlu0 %1983  ;;  %v1956_v42 = vpop.permute.xlu2 %1955 }
 0x42a   : > { %v1986_v56 = vpop.permute.xlu1 %1985 }
 0x42b   : > { %v1987_v57 = vsel %vm1339_vm1, %v1984_v55, %v1986_v56  ;;  %v1988_v58 = vsel %vm1339_vm1, %v1986_v56, %v1984_v55 }
 0x42c   : > { %v1995_v59 = vmul.f32 %v1991_v53, %v1987_v57  ;;  %v1996_v60 = vmul.f32 %v1992_v54, %v1988_v58 }
 0x42e   : > { %v1999_v0 = vrot.slane %v1995_v59, 1  ;;  %v2000_v1 = vrot.slane %v1996_v60, 1  ;;  %v1915_v59 = vperm.slane %v3518_v52, 0  ;;  %v1916_v60 = vperm.slane %v3518_v52, 1 }
 0x430   : > { %2003 = vst [vmem:[#allocation2 + $0x18] sm:$0x80] %v1999_v0 }
 0x431   : > { %2004 = vst [vmem:[#allocation2 + $0x10] sm:$0x80] %v2000_v1  ;;  %v2010_v8 = vpop.permute.xlu0 %2009 }
 0x432   : > { %2005 = vst [vmem:[#allocation2 + $0x8] sm:$0x3] %v1999_v0  ;;  %v2030_v9 = vpop.permute.xlu1 %2029  ;;  %v2011_v10 = vsel %vm1363_vm2, %v2008_v51, %v2010_v8  ;;  %v2012_v11 = vsel %vm1363_vm2, %v2010_v8, %v2008_v51 }
 0x433   : > { %2006 = vst [vmem:[#allocation2 + $0x20] sm:$0x3] %v2000_v1  ;;  %v2033_v12 = vsel %vm1387_vm3, %v2030_v9, %v2032_v63  ;;  %v2034_v13 = vsel %vm1387_vm3, %v2032_v63, %v2030_v9  ;;  %v2019_v14 = vmul.f32 %v2015_v2, %v2011_v10  ;;  %v2020_v16 = vmul.f32 %v2016_v4, %v2012_v11  ;;  %v1897_v4 = vld [vmem:[%s3756_s21] sm:$0x3]  ;;  %v1892_v10 = vpop.permute.xlu2 %1891 }
 0x434   : > { %v2041_v17 = vmul.f32 %v2037_v6, %v2033_v12  ;;  %v2042_v18 = vmul.f32 %v2038_v7, %v2034_v13  ;;  %v1899_v8 = vperm.slane %v1897_v4, 0  ;;  %v1900_v9 = vperm.slane %v1897_v4, 1  ;;  %v3535_v4 = vld [vmem:[%s3756_s21 + $0x10] sm:$0x3] }
 0x435   : > { %v2023_v19 = vrot.slane %v2019_v14, 6  ;;  %v2024_v23 = vrot.slane %v2020_v16, 6 }
 0x436   : > { %v2045_v21 = vrot.slane %v2041_v17, 3  ;;  %v2046_v22 = vrot.slane %v2042_v18, 3 }
 0x437   : > { %2027 = vst [vmem:[#allocation2 + $0x8] sm:$0x1c] %v2023_v19  ;;  %v1780_v19 = vld [vmem:[%s4458_s0] sm:$0x7]  ;;  %s4460_s0 = sld [smem:[#allocation8_spill]] }
 0x438   : > { %2049 = vst [vmem:[#allocation2 + $0x8] sm:$0xe0] %v2045_v21 }
 0x439   : > { %2050 = vst [vmem:[#allocation2 + $0x20] sm:$0xe0] %v2046_v22  ;;  %v2052_v27 = vpop.permute.xlu0 %2051 }
 0x43a   : > { %2028 = vst [vmem:[#allocation2 + $0x20] sm:$0x1c] %v2024_v23  ;;  %v2054_v28 = vpop.permute.xlu1 %2053 }
 0x43b   : > { %v2055_v29 = vsel %vm1411_vm4, %v2052_v27, %v2054_v28  ;;  %v2056_v30 = vsel %vm1411_vm4, %v2054_v28, %v2052_v27 }
 0x43c   : > { %v2063_v31 = vmul.f32 %v2059_v25, %v2055_v29  ;;  %v2064_v32 = vmul.f32 %v2060_v26, %v2056_v30 }
 0x43e   : > { %2065 = vst [vmem:[#allocation2 + $0x28] sm:$0x7] %v2063_v31  ;;  %v2439_v31 = vld [vmem:[%s4459_s1] sm:$0x7]  ;;  %s4461_s1 = sld [smem:[#allocation7_spill]] }
 0x43f   : > { %2066 = vst [vmem:[#allocation2 + $0x38] sm:$0x7] %v2064_v32  ;;  %v2071_v57 = vld [vmem:[#allocation2 + $0x8] sm:$0xff]  ;;  %v1783_v32 = vld [vmem:[%s4460_s0] sm:$0x7]  ;;  %s4462_s0 = sld [smem:[#allocation12_spill]] }
 0x441   : > { %v1932_v41 = vpop.permute.xlu0 %1931  ;;  %v2072_v58 = vld [vmem:[#allocation2 + $0x20] sm:$0xff] }
 0x442   : > { %v1954_v43 = vpop.permute.xlu1 %1953  ;;  %v1933_v44 = vsel %vm1289_vm6, %v1930_v24, %v1932_v41  ;;  %v1934_v45 = vsel %vm1289_vm6, %v1932_v41, %v1930_v24 }
 0x443   : > { %v1957_v46 = vsel %vm1313_vm8, %v1954_v43, %v1956_v42  ;;  %v1958_v3 = vsel %vm1313_vm8, %v1956_v42, %v1954_v43  ;;  %v1941_v47 = vmul.f32 %v1937_v35, %v1934_v45  ;;  %v1942_v5 = vmul.f32 %v1938_v36, %v1933_v44  ;;  %v3533_v35 = vld [vmem:[%s3756_s21 + $0xc] sm:$0x3]  ;;  %v3532_v36 = vld [vmem:[%s3756_s21 + $0xa] sm:$0x3] }
 0x444   : > { %v1965_v48 = vmul.f32 %v1961_v39, %v1958_v3  ;;  %v1966_v49 = vmul.f32 %v1962_v40, %v1957_v46  ;;  %v2257_v39 = vperm.slane %v3533_v35, 0  ;;  %v2233_v40 = vperm.slane %v3532_v36, 0 }
 0x445   : > { %v1945_v50 = vrot.slane %v1941_v47, 2  ;;  %v2073_v51 = vld [vmem:[#allocation2 + $0x28] sm:$0x7]  ;;  %v1946_v55 = vrot.slane %v1942_v5, 2  ;;  %v2234_v41 = vperm.slane %v3532_v36, 1  ;;  %v2258_v42 = vperm.slane %v3533_v35, 1 }
 0x446   : > { %v1969_v53 = vrot.slane %v1965_v48, 7  ;;  %v1970_v54 = vrot.slane %v1966_v49, 7  ;;  %3525 = vmatpush.msk.msrb.mxu0 %vm2084_vm14, %v2073_v51  ;;  %v2074_v56 = vld [vmem:[#allocation2 + $0x38] sm:$0x7] }
 0x447   : > { %1949 = vst [vmem:[#allocation2 + $0x30] sm:$0xc0] %v1945_v50  ;;  %3527 = vmatpush.msk.msrb.mxu1 %vm2084_vm14, %v2074_v56  ;;  %v2139_v35 = vld [vmem:[%s3756_s21] sm:$0x3] }
 0x448   : > { %1973 = vst [vmem:[#allocation2 + $0x18] sm:$0xe] %v1969_v53  ;;  %2104 = vmatpush.msrb.mxu0 %v2071_v57  ;;  %v3534_v53 = vld [vmem:[%s3756_s21 + $0xe] sm:$0x3] }
 0x449   : > { %1974 = vst [vmem:[#allocation2 + $0x10] sm:$0xe] %v1970_v54  ;;  %2124 = vmatpush.msrb.mxu1 %v2072_v58  ;;  %v1908_v61 = vpop.permute.xlu0 %1907  ;;  %v2279_v57 = vperm.slane %v3534_v53, 0  ;;  %v2280_v58 = vperm.slane %v3534_v53, 1 }
 0x44a   : > { %1950 = vst [vmem:[#allocation2] sm:$0xc0] %v1946_v55  ;;  %v1910_v62 = vpop.permute.xlu1 %1909 }
 0x44b   : > { %1951 = vst [vmem:[#allocation2 + $0x18] sm:$0x1] %v1945_v50  ;;  %v1911_v63 = vsel %vm1265_vm5, %v1908_v61, %v1910_v62  ;;  %v1912_v0 = vsel %vm1265_vm5, %v1910_v62, %v1908_v61 }
 0x44c   : > { %1952 = vst [vmem:[#allocation2 + $0x10] sm:$0x1] %v1946_v55  ;;  %v1919_v1 = vmul.f32 %v1915_v59, %v1912_v0  ;;  %v1920_v2 = vmul.f32 %v1916_v60, %v1911_v63 }
 0x44e   : > { %v1923_v6 = vrot.slane %v1919_v1, 5  ;;  %v1924_v7 = vrot.slane %v1920_v2, 5  ;;  %v3530_v1 = vld [vmem:[%s3756_s21 + $0x4] sm:$0x3] }
 0x450   : > { %1927 = vst [vmem:[#allocation2 + $0x30] sm:$0x38] %v1923_v6 }
 0x451   : > { %1928 = vst [vmem:[#allocation2] sm:$0x38] %v1924_v7  ;;  %v1894_v11 = vpop.permute.xlu0 %1893 }
 0x452   : > { %v2069_v12 = vld [vmem:[#allocation2 + $0x18] sm:$0xff]  ;;  %v1895_v13 = vsel %vm1248_vm9, %v1892_v10, %v1894_v11  ;;  %v1896_v14 = vsel %vm1248_vm9, %v1894_v11, %v1892_v10  ;;  %v2078_v22 = vpop.permute.xlu1 %2077  ;;  %v2301_v10 = vperm.slane %v3535_v4, 0  ;;  %v2302_v11 = vperm.slane %v3535_v4, 1 }
 0x453   : > { %2105 = vmatpush.msrb.mxu0 %v2069_v12  ;;  %v2070_v16 = vld [vmem:[#allocation2 + $0x10] sm:$0xff]  ;;  %v1903_v17 = vmul.f32 %v1899_v8, %v1896_v14  ;;  %v1904_v18 = vmul.f32 %v1900_v9, %v1895_v13  ;;  %v2179_v8 = vperm.slane %v3530_v1, 0  ;;  %v2180_v9 = vperm.slane %v3530_v1, 1  ;;  %v2448_v1 = vld.sshfl [vmem:[#allocation1] sm:$0xff pattern:$0x75316420] }
 0x454   : > { %2125 = vmatpush.msrb.mxu1 %v2070_v16  ;;  %v2438_v4 = vld [vmem:[%s4462_s0] sm:$0x7]  ;;  %s4467_s0 = sld [smem:[#allocation14_spill]] }
 0x455   : > { %1905 = vst [vmem:[#allocation2 + $0x30] sm:$0x7] %v1903_v17 }
 0x456   : > { %1906 = vst [vmem:[#allocation2] sm:$0x7] %v1904_v18 }
 0x45c   : > { %v2067_v20 = vld [vmem:[#allocation2 + $0x30] sm:$0xff] }
 0x45d   : > { %2106 = vmatpush.msrb.mxu0 %v2067_v20  ;;  %v2068_v21 = vld [vmem:[#allocation2] sm:$0xff] }
 0x45e   : > { %2126 = vmatpush.msrb.mxu1 %v2068_v21  ;;  %3526 = vmatmul.msk.f32.vlgmr.msrb.gmra.mxu0 %vm2080_vm15, %v1780_v19 }
 0x45f   : > { %3528 = vmatmul.msk.f32.vlgmr.msrb.gmra.mxu1 %vm2080_vm15, %v1780_v19 }
 0x4db   : > { %v2108_v23 = vpop.f32.mrf.mxu0 }
 0x4dc   : > { %v2109_v24 = vadd.f32 %v2108_v23, %v2078_v22  ;;  %v2128_v25 = vpop.f32.mrf.mxu1 }
 0x4dd   : > { %v2129_v26 = vadd.f32 %v2128_v25, %v2078_v22  ;;  %v3531_v25 = vld [vmem:[%s3756_s21 + $0x6] sm:$0x3] }
 0x4de   : > { %v2131_v27 = vmax.f32 %v2109_v24, 0.0 }
 0x4df   : > { %v2132_v28 = vmax.f32 %v2129_v26, 0.0 }
 0x4e0   : > { %v2219_v29 = vrot.slane %v2131_v27, 4  ;;  %2249 = vrot.lane.b32.xlu1 %v2131_v27, %s3720_s2  ;;  %2225 = vrot.lane.b32.xlu2 %v2131_v27, %s3721_s7 }
 0x4e1   : > { %v2220_v30 = vrot.slane %v2132_v28, 4  ;;  %2227 = vrot.lane.b32.xlu0 %v2132_v28, %s3721_s7 }
 0x4e2   : > { %2223 = vst [vmem:[#allocation2 + $0x18] sm:$0x70] %v2219_v29 }
 0x4e3   : > { %2224 = vst [vmem:[#allocation2 + $0x10] sm:$0x70] %v2220_v30 }
 0x4e8   : > { %2273 = vrot.lane.b32.xlu1 %v2132_v28, %s3722_s10  ;;  %2251 = vrot.lane.b32.xlu2 %v2132_v28, %s3720_s2 }
 0x4e9   : > { %2271 = vrot.lane.b32.xlu0 %v2131_v27, %s3722_s10 }
 0x4f0   : > { %2171 = vrot.lane.b32.xlu1 %v2131_v27, %s3725_s16  ;;  %2293 = vrot.lane.b32.xlu2 %v2131_v27, %s3723_s11 }
 0x4f1   : > { %2295 = vrot.lane.b32.xlu0 %v2132_v28, %s3723_s11 }
 0x4f8   : > { %2197 = vrot.lane.b32.xlu1 %v2132_v28, %s3726_s18  ;;  %2173 = vrot.lane.b32.xlu2 %v2132_v28, %s3725_s16 }
 0x4f9   : > { %2195 = vrot.lane.b32.xlu0 %v2131_v27, %s3726_s18 }
 0x500   : > { %2133 = vrot.lane.b32.xlu1 %v2131_v27, %s4437_s23  ;;  %2149 = vrot.lane.b32.xlu2 %v2131_v27, %s4435_s15  ;;  %v2203_v27 = vperm.slane %v3531_v25, 0 }
 0x501   : > { %2151 = vrot.lane.b32.xlu0 %v2132_v28, %s4435_s15  ;;  %s4463_s15 = sld [smem:[#allocation9_spill]] }
 0x508   : > { %2542 = vperm.xlu1 %3641, %v2439_v31   ;;  %2135 = vrot.lane.b32.xlu2 %v2132_v28, %s4437_s23  ;;  %v2204_v28 = vperm.slane %v3531_v25, 1 }
 0x509   : > { %2319 = vperm.xlu0 %3639, %v1783_v32  }
 0x53a   : > { %v2226_v33 = vpop.permute.xlu2 %2225 }
 0x542   : > { %v2252_v34 = vpop.permute.xlu2 %2251 }
 0x54a   : > { %v2294_v3 = vpop.permute.xlu2 %2293 }
 0x552   : > { %v2250_v43 = vpop.permute.xlu1 %2249  ;;  %v2174_v2 = vpop.permute.xlu2 %2173 }
 0x553   : > { %v2228_v44 = vpop.permute.xlu0 %2227  ;;  %v2253_v45 = vsel %vm1363_vm2, %v2250_v43, %v2252_v34  ;;  %v2254_v46 = vsel %vm1363_vm2, %v2252_v34, %v2250_v43 }
 0x554   : > { %v2229_v47 = vsel %vm1339_vm1, %v2226_v33, %v2228_v44  ;;  %v2230_v5 = vsel %vm1339_vm1, %v2228_v44, %v2226_v33  ;;  %v2261_v48 = vmul.f32 %v2257_v39, %v2253_v45  ;;  %v2262_v51 = vmul.f32 %v2258_v42, %v2254_v46  ;;  %v3529_v39 = vld [vmem:[%s3756_s21 + $0x2] sm:$0x3] }
 0x555   : > { %v2237_v49 = vmul.f32 %v2233_v40, %v2229_v47  ;;  %v2238_v50 = vmul.f32 %v2234_v41, %v2230_v5  ;;  %v2141_v44 = vperm.slane %v2139_v35, 0  ;;  %v2142_v45 = vperm.slane %v2139_v35, 1 }
 0x556   : > { %v2265_v52 = vrot.slane %v2261_v48, 6  ;;  %v2266_v56 = vrot.slane %v2262_v51, 6  ;;  %v2158_v47 = vperm.slane %v3529_v39, 1 }
 0x557   : > { %v2241_v54 = vrot.slane %v2237_v49, 1  ;;  %v2242_v55 = vrot.slane %v2238_v50, 1 }
 0x558   : > { %2269 = vst [vmem:[#allocation2 + $0x8] sm:$0x1c] %v2265_v52 }
 0x559   : > { %2245 = vst [vmem:[#allocation2 + $0x18] sm:$0x80] %v2241_v54 }
 0x55a   : > { %2246 = vst [vmem:[#allocation2 + $0x10] sm:$0x80] %v2242_v55  ;;  %v2274_v59 = vpop.permute.xlu1 %2273  ;;  %v2150_v26 = vpop.permute.xlu2 %2149 }
 0x55b   : > { %2247 = vst [vmem:[#allocation2 + $0x8] sm:$0x3] %v2241_v54  ;;  %v2272_v60 = vpop.permute.xlu0 %2271 }
 0x55c   : > { %2248 = vst [vmem:[#allocation2 + $0x20] sm:$0x3] %v2242_v55  ;;  %v2275_v61 = vsel %vm1387_vm3, %v2272_v60, %v2274_v59  ;;  %v2276_v62 = vsel %vm1387_vm3, %v2274_v59, %v2272_v60 }
 0x55d   : > { %2270 = vst [vmem:[#allocation2 + $0x20] sm:$0x1c] %v2266_v56  ;;  %v2283_v63 = vmul.f32 %v2279_v57, %v2275_v61  ;;  %v2284_v0 = vmul.f32 %v2280_v58, %v2276_v62  ;;  %v1782_v62 = vld [vmem:[%s4461_s1] sm:$0x7]  ;;  %s4464_s1 = sld [smem:[#allocation11_spill]] }
 0x55f   : > { %v2287_v6 = vrot.slane %v2283_v63, 3  ;;  %v2288_v7 = vrot.slane %v2284_v0, 3 }
 0x561   : > { %2291 = vst [vmem:[#allocation2 + $0x8] sm:$0xe0] %v2287_v6 }
 0x562   : > { %2292 = vst [vmem:[#allocation2 + $0x20] sm:$0xe0] %v2288_v7  ;;  %v2172_v12 = vpop.permute.xlu1 %2171  ;;  %v2136_v5 = vpop.permute.xlu2 %2135 }
 0x563   : > { %v2296_v13 = vpop.permute.xlu0 %2295  ;;  %v2175_v14 = vsel %vm1289_vm6, %v2172_v12, %v2174_v2  ;;  %v2176_v16 = vsel %vm1289_vm6, %v2174_v2, %v2172_v12  ;;  %v2449_v2 = vld.sshfl [vmem:[#allocation1 + $0x8] sm:$0xff pattern:$0x75316420]  ;;  %v1784_v12 = vld [vmem:[%s4463_s15] sm:$0xff]  ;;  %s4466_s15 = smov 16  }
 0x564   : > { %v2297_v17 = vsel %vm1411_vm4, %v2294_v3, %v2296_v13  ;;  %v2298_v18 = vsel %vm1411_vm4, %v2296_v13, %v2294_v3  ;;  %v2183_v19 = vmul.f32 %v2179_v8, %v2176_v16  ;;  %v2184_v20 = vmul.f32 %v2180_v9, %v2175_v14  ;;  %v3674_v14 = vld [vmem:[%s3925_s28] sm:$0xff]  ;;  %v3675_v16 = vld [vmem:[%s3925_s28 + $0x8] sm:$0xff]  ;;  %s4465_s28 = sld [smem:[#allocation15_spill]] }
 0x565   : > { %v2305_v21 = vmul.f32 %v2301_v10, %v2297_v17  ;;  %v2306_v22 = vmul.f32 %v2302_v11, %v2298_v18  ;;  %v2157_v3 = vperm.slane %v3529_v39, 0  ;;  %v2437_v17 = vld [vmem:[%s4464_s1] sm:$0x7]  ;;  %v3553_v39 = vld [vmem:[%s3756_s21 + $0xa] sm:$0x3]  ;;  %s4468_s1 = sld [smem:[#allocation10_spill]] }
 0x566   : > { %v2187_v23 = vrot.slane %v2183_v19, 2  ;;  %v2188_v24 = vrot.slane %v2184_v20, 2 }
 0x567   : > { %2307 = vst [vmem:[#allocation2 + $0x28] sm:$0x7] %v2305_v21 }
 0x568   : > { %2308 = vst [vmem:[#allocation2 + $0x38] sm:$0x7] %v2306_v22  ;;  %v2313_v43 = vld [vmem:[#allocation2 + $0x8] sm:$0xff] }
 0x569   : > { %2191 = vst [vmem:[#allocation2 + $0x30] sm:$0xc0] %v2187_v23  ;;  %v2314_v46 = vld [vmem:[#allocation2 + $0x20] sm:$0xff] }
 0x56a   : > { %2192 = vst [vmem:[#allocation2] sm:$0xc0] %v2188_v24  ;;  %v2198_v29 = vpop.permute.xlu1 %2197 }
 0x56b   : > { %2193 = vst [vmem:[#allocation2 + $0x18] sm:$0x1] %v2187_v23  ;;  %v2196_v30 = vpop.permute.xlu0 %2195 }
 0x56c   : > { %2194 = vst [vmem:[#allocation2 + $0x10] sm:$0x1] %v2188_v24  ;;  %v2199_v31 = vsel %vm1313_vm8, %v2196_v30, %v2198_v29  ;;  %v2200_v32 = vsel %vm1313_vm8, %v2198_v29, %v2196_v30 }
 0x56d   : > { %v2207_v33 = vmul.f32 %v2203_v27, %v2200_v32  ;;  %v2208_v34 = vmul.f32 %v2204_v28, %v2199_v31 }
 0x56e   : > { %v2315_v36 = vld [vmem:[#allocation2 + $0x28] sm:$0x7] }
 0x56f   : > { %v2211_v40 = vrot.slane %v2207_v33, 7  ;;  %v2212_v41 = vrot.slane %v2208_v34, 7  ;;  %3536 = vmatpush.msk.msrb.mxu2 %vm2084_vm14, %v2315_v36  ;;  %v2316_v42 = vld [vmem:[#allocation2 + $0x38] sm:$0x7]  ;;  %v3554_v36 = vld [vmem:[%s3756_s21 + $0xc] sm:$0x3] }
 0x570   : > { %3538 = vmatpush.msk.msrb.mxu3 %vm2084_vm14, %v2316_v42  ;;  %v2441_v33 = vld [vmem:[%s4465_s28] sm:$0x7]  ;;  %v2650_v42 = vperm.slane %v3553_v39, 1  ;;  %s4469_s28 = sld [smem:[#allocation17_spill]] }
 0x571   : > { %2215 = vst [vmem:[#allocation2 + $0x18] sm:$0xe] %v2211_v40  ;;  %2344 = vmatpush.msrb.mxu2 %v2313_v43  ;;  %v2673_v40 = vperm.slane %v3554_v36, 0  ;;  %v2674_v43 = vperm.slane %v3554_v36, 1 }
 0x572   : > { %2216 = vst [vmem:[#allocation2 + $0x10] sm:$0xe] %v2212_v41  ;;  %2364 = vmatpush.msrb.mxu3 %v2314_v46  ;;  %v2134_v48 = vpop.permute.xlu1 %2133  ;;  %v2649_v41 = vperm.slane %v3553_v39, 0 }
 0x573   : > { %v2152_v49 = vpop.permute.xlu0 %2151  ;;  %v2137_v50 = vsel %vm1248_vm9, %v2134_v48, %v2136_v5  ;;  %v2138_v51 = vsel %vm1248_vm9, %v2136_v5, %v2134_v48 }
 0x574   : > { %v2153_v52 = vsel %vm1265_vm5, %v2150_v26, %v2152_v49  ;;  %v2154_v53 = vsel %vm1265_vm5, %v2152_v49, %v2150_v26  ;;  %v2145_v54 = vmul.f32 %v2141_v44, %v2138_v51  ;;  %v2146_v55 = vmul.f32 %v2142_v45, %v2137_v50 }
 0x575   : > { %v2161_v56 = vmul.f32 %v2157_v3, %v2154_v53  ;;  %v2162_v57 = vmul.f32 %v2158_v47, %v2153_v52 }
 0x576   : > { %2147 = vst [vmem:[#allocation2 + $0x30] sm:$0x7] %v2145_v54  ;;  %v3555_v54 = vld [vmem:[%s3756_s21 + $0xe] sm:$0x3] }
 0x577   : > { %v2165_v58 = vrot.slane %v2161_v56, 5  ;;  %v2166_v59 = vrot.slane %v2162_v57, 5  ;;  %2148 = vst [vmem:[#allocation2] sm:$0x7] %v2146_v55 }
 0x578   : > { %v2311_v60 = vld [vmem:[#allocation2 + $0x18] sm:$0xff] }
 0x579   : > { %2169 = vst [vmem:[#allocation2 + $0x30] sm:$0x38] %v2165_v58  ;;  %2345 = vmatpush.msrb.mxu2 %v2311_v60  ;;  %v2312_v61 = vld [vmem:[#allocation2 + $0x10] sm:$0xff]  ;;  %v2695_v58 = vperm.slane %v3555_v54, 0 }
 0x57a   : > { %2170 = vst [vmem:[#allocation2] sm:$0x38] %v2166_v59  ;;  %2365 = vmatpush.msrb.mxu3 %v2312_v61  ;;  %v2543_v25 = vpop.permute.xlu1 %2542  ;;  %v2696_v59 = vperm.slane %v3555_v54, 1 }
 0x57b   : > { %v2320_v6 = vpop.permute.xlu0 %2319 }
 0x580   : > { %v2309_v63 = vld [vmem:[#allocation2 + $0x30] sm:$0xff] }
 0x581   : > { %2346 = vmatpush.msrb.mxu2 %v2309_v63  ;;  %v2310_v0 = vld [vmem:[#allocation2] sm:$0xff] }
 0x582   : > { %2366 = vmatpush.msrb.mxu3 %v2310_v0  ;;  %3537 = vmatmul.msk.f32.vlgmr.msrb.gmra.mxu2 %vm2080_vm15, %v1782_v62 }
 0x583   : > { %3539 = vmatmul.msk.f32.vlgmr.msrb.gmra.mxu3 %vm2080_vm15, %v1782_v62  ;;  %3544 = vmatpush.msk.msra.mxu2 %vm1794_vm11, %v2448_v1 }
 0x584   : > { %3546 = vmatpush.msk.msra.mxu3 %vm1794_vm11, %v2449_v2  ;;  %v3551_v2 = vld [vmem:[%s3756_s21 + $0x4] sm:$0x3] }
 0x58a   : > { %3545 = vmatmul.msk.f32.vlgmr.msra.gmra.mxu2 %vm1790_vm12, %v2438_v4 }
 0x58b   : > { %3547 = vmatmul.msk.f32.vlgmr.msra.gmra.mxu3 %vm1790_vm12, %v2438_v4 }
 0x605   : > { %v2348_v7 = vpop.f32.mrf.mxu2 }
 0x606   : > { %v2349_v8 = vadd.f32 %v2348_v7, %v2320_v6  ;;  %v2368_v9 = vpop.f32.mrf.mxu3 }
 0x607   : > { %v2369_v10 = vadd.f32 %v2368_v9, %v2320_v6  ;;  %v3556_v6 = vld [vmem:[%s3756_s21 + $0x10] sm:$0x3]  ;;  %v2595_v9 = vperm.slane %v3551_v2, 0 }
 0x608   : > { %v2371_v11 = vmax.f32 %v2349_v8, 0.0 }
 0x609   : > { %v2372_v13 = vmax.f32 %v2369_v10, 0.0  ;;  %v2596_v10 = vperm.slane %v3551_v2, 1 }
 0x60a   : > { %3540 = vmatpush.msk.msra.mxu0 %vm2084_vm14, %v2371_v11  ;;  %v2717_v11 = vperm.slane %v3556_v6, 0 }
 0x60b   : > { %3542 = vmatpush.msk.msra.mxu1 %vm2084_vm14, %v2372_v13  ;;  %3541 = vmatmul.msk.f32.vlgmr.msra.gmra.mxu0 %vm2378_vm7, %v1784_v12 }
 0x60c   : > { %3543 = vmatmul.msk.f32.vlgmr.msra.gmra.mxu1 %vm2378_vm7, %v1784_v12  ;;  %2515 = vmatpush.msrb.mxu0 %v3674_v14  ;;  %v2718_v12 = vperm.slane %v3556_v6, 1 }
 0x60d   : > { %2535 = vmatpush.msrb.mxu1 %v3675_v16  ;;  %v2474_v20 = vpop.f32.mrf.mxu2 }
 0x60e   : > { %v2494_v21 = vpop.f32.mrf.mxu3 }
 0x613   : > { %3548 = vmatmul.msk.f32.vlgmr.msrb.gmra.mxu0 %vm1196_vm0, %v2437_v17 }
 0x614   : > { %3549 = vmatmul.msk.f32.vlgmr.msrb.gmra.mxu1 %vm1196_vm0, %v2437_v17 }
 0x688   : > { %v4234_v18 = vpop.f32.mrf.mxu0 }
 0x689   : > { %v4236_v19 = vpop.f32.mrf.mxu1 }
 0x690   : > { %v2517_v22 = vpop.f32.mrf.mxu0 }
 0x691   : > { %v2518_v23 = vadd.f32 %v2517_v22, %v2474_v20  ;;  %v2537_v24 = vpop.f32.mrf.mxu1 }
 0x692   : > { %v2538_v26 = vadd.f32 %v2537_v24, %v2494_v21 }
 0x693   : > { %v2545_v27 = vadd.f32 %v2543_v25, %v2518_v23 }
 0x694   : > { %v2546_v28 = vadd.f32 %v2543_v25, %v2538_v26 }
 0x695   : > { %v2547_v29 = vmax.f32 %v2545_v27, 0.0 }
 0x696   : > { %v2548_v30 = vmax.f32 %v2546_v28, 0.0  ;;  %v3552_v28 = vld [vmem:[%s3756_s21 + $0x6] sm:$0x3] }
 0x697   : > { %v2635_v31 = vrot.slane %v2547_v29, 4  ;;  %2665 = vrot.lane.b32.xlu1 %v2547_v29, %s3720_s2  ;;  %2641 = vrot.lane.b32.xlu2 %v2547_v29, %s3721_s7 }
 0x698   : > { %v2636_v32 = vrot.slane %v2548_v30, 4  ;;  %2643 = vrot.lane.b32.xlu0 %v2548_v30, %s3721_s7 }
 0x699   : > { %2639 = vst [vmem:[#allocation2 + $0x18] sm:$0x70] %v2635_v31  ;;  %v2620_v31 = vperm.slane %v3552_v28, 1 }
 0x69a   : > { %2640 = vst [vmem:[#allocation2 + $0x10] sm:$0x70] %v2636_v32 }
 0x69f   : > { %2689 = vrot.lane.b32.xlu1 %v2548_v30, %s3722_s10  ;;  %2667 = vrot.lane.b32.xlu2 %v2548_v30, %s3720_s2 }
 0x6a0   : > { %2687 = vrot.lane.b32.xlu0 %v2547_v29, %s3722_s10 }
 0x6a7   : > { %2587 = vrot.lane.b32.xlu1 %v2547_v29, %s3725_s16  ;;  %2709 = vrot.lane.b32.xlu2 %v2547_v29, %s3723_s11 }
 0x6a8   : > { %2711 = vrot.lane.b32.xlu0 %v2548_v30, %s3723_s11 }
 0x6af   : > { %2613 = vrot.lane.b32.xlu1 %v2548_v30, %s3726_s18  ;;  %2589 = vrot.lane.b32.xlu2 %v2548_v30, %s3725_s16 }
 0x6b0   : > { %2611 = vrot.lane.b32.xlu0 %v2547_v29, %s3726_s18 }
 0x6b7   : > { %2549 = vrot.lane.b32.xlu1 %v2547_v29, %s4437_s23  ;;  %2565 = vrot.lane.b32.xlu2 %v2547_v29, %s4466_s15 }
 0x6b8   : > { %2567 = vrot.lane.b32.xlu0 %v2548_v30, %s4466_s15 }
 0x6bf   : > { %2551 = vrot.lane.b32.xlu2 %v2548_v30, %s4437_s23  ;;  %v2619_v30 = vperm.slane %v3552_v28, 0  ;;  %s4471_s23 = sld [smem:[#allocation4_spill]] }
 0x6c0   : > { %2735 = vperm.xlu0 %3639, %v2441_v33  }
 0x6f1   : > { %v2642_v34 = vpop.permute.xlu2 %2641 }
 0x6f9   : > { %v2668_v35 = vpop.permute.xlu2 %2667 }
 0x701   : > { %v2710_v47 = vpop.permute.xlu2 %2709 }
 0x709   : > { %v2666_v44 = vpop.permute.xlu1 %2665  ;;  %v2590_v4 = vpop.permute.xlu2 %2589 }
 0x70a   : > { %v2644_v45 = vpop.permute.xlu0 %2643  ;;  %v2669_v46 = vsel %vm1363_vm2, %v2666_v44, %v2668_v35  ;;  %v2670_v3 = vsel %vm1363_vm2, %v2668_v35, %v2666_v44 }
 0x70b   : > { %v2645_v5 = vsel %vm1339_vm1, %v2642_v34, %v2644_v45  ;;  %v2646_v48 = vsel %vm1339_vm1, %v2644_v45, %v2642_v34  ;;  %v2677_v49 = vmul.f32 %v2673_v40, %v2669_v46  ;;  %v2678_v52 = vmul.f32 %v2674_v43, %v2670_v3  ;;  %v2555_v40 = vld [vmem:[%s3756_s21] sm:$0x3] }
 0x70c   : > { %v2653_v50 = vmul.f32 %v2649_v41, %v2645_v5  ;;  %v2654_v51 = vmul.f32 %v2650_v42, %v2646_v48  ;;  %v3550_v42 = vld [vmem:[%s3756_s21 + $0x2] sm:$0x3]  ;;  %v2557_v3 = vperm.slane %v2555_v40, 0 }
 0x70d   : > { %v2681_v53 = vrot.slane %v2677_v49, 6  ;;  %v2682_v57 = vrot.slane %v2678_v52, 6  ;;  %v2573_v48 = vperm.slane %v3550_v42, 0  ;;  %v2574_v49 = vperm.slane %v3550_v42, 1 }
 0x70e   : > { %v2657_v55 = vrot.slane %v2653_v50, 1  ;;  %v2658_v56 = vrot.slane %v2654_v51, 1 }
 0x70f   : > { %2685 = vst [vmem:[#allocation2 + $0x8] sm:$0x1c] %v2681_v53 }
 0x710   : > { %2661 = vst [vmem:[#allocation2 + $0x18] sm:$0x80] %v2657_v55 }
 0x711   : > { %2662 = vst [vmem:[#allocation2 + $0x10] sm:$0x80] %v2658_v56  ;;  %v2690_v60 = vpop.permute.xlu1 %2689  ;;  %v2566_v29 = vpop.permute.xlu2 %2565 }
 0x712   : > { %2663 = vst [vmem:[#allocation2 + $0x8] sm:$0x3] %v2657_v55  ;;  %v2688_v61 = vpop.permute.xlu0 %2687 }
 0x713   : > { %2664 = vst [vmem:[#allocation2 + $0x20] sm:$0x3] %v2658_v56  ;;  %v2691_v62 = vsel %vm1387_vm3, %v2688_v61, %v2690_v60  ;;  %v2692_v63 = vsel %vm1387_vm3, %v2690_v60, %v2688_v61 }
 0x714   : > { %2686 = vst [vmem:[#allocation2 + $0x20] sm:$0x1c] %v2682_v57  ;;  %v2699_v0 = vmul.f32 %v2695_v58, %v2691_v62  ;;  %v2700_v1 = vmul.f32 %v2696_v59, %v2692_v63 }
 0x716   : > { %v2703_v7 = vrot.slane %v2699_v0, 3  ;;  %v2704_v8 = vrot.slane %v2700_v1, 3  ;;  %v2440_v1 = vld [vmem:[%s4467_s0] sm:$0x7]  ;;  %s4470_s0 = sld [smem:[#allocation19_spill]] }
 0x718   : > { %2707 = vst [vmem:[#allocation2 + $0x8] sm:$0xe0] %v2703_v7 }
 0x719   : > { %2708 = vst [vmem:[#allocation2 + $0x20] sm:$0xe0] %v2704_v8  ;;  %v2588_v13 = vpop.permute.xlu1 %2587  ;;  %v2552_v50 = vpop.permute.xlu2 %2551 }
 0x71a   : > { %v2712_v14 = vpop.permute.xlu0 %2711  ;;  %v2591_v16 = vsel %vm1289_vm6, %v2588_v13, %v2590_v4  ;;  %v2592_v17 = vsel %vm1289_vm6, %v2590_v4, %v2588_v13 }
 0x71b   : > { %v2713_v20 = vsel %vm1411_vm4, %v2710_v47, %v2712_v14  ;;  %v2714_v21 = vsel %vm1411_vm4, %v2712_v14, %v2710_v47  ;;  %v2599_v22 = vmul.f32 %v2595_v9, %v2592_v17  ;;  %v2600_v23 = vmul.f32 %v2596_v10, %v2591_v16  ;;  %v1785_v16 = vld [vmem:[%s4468_s1] sm:$0xff] }
 0x71c   : > { %v2721_v24 = vmul.f32 %v2717_v11, %v2713_v20  ;;  %v2722_v25 = vmul.f32 %v2718_v12, %v2714_v21  ;;  %v2558_v47 = vperm.slane %v2555_v40, 1  ;;  %v2443_v17 = vld [vmem:[%s4469_s28] sm:$0x7]  ;;  %s1169_s28 = scalar_lea.vmem %s3901_s4, %s3922_s26 }
 0x71d   : > { %v2603_v26 = vrot.slane %v2599_v22, 2  ;;  %v2604_v27 = vrot.slane %v2600_v23, 2  ;;  %v2445_v20 = vld [vmem:[%s4470_s0] sm:$0xff]  ;;  %s1179_s0 = scalar_lea.vmem %s3911_s30, %s3922_s26 }
 0x71e   : > { %2723 = vst [vmem:[#allocation2 + $0x28] sm:$0x7] %v2721_v24  ;;  %v1190_v21 = vld [vmem:[%s4471_s23] sm:$0xff]  ;;  %s1174_s23 = scalar_lea.vmem %s3906_s17, %s3922_s26 }
 0x71f   : > { %2724 = vst [vmem:[#allocation2 + $0x38] sm:$0x7] %v2722_v25  ;;  %v2729_v46 = vld [vmem:[#allocation2 + $0x8] sm:$0xff]  ;;  %v3564_v25 = vld [vmem:[%s3756_s21 + $0xa] sm:$0x3] }
 0x720   : > { %2607 = vst [vmem:[#allocation2 + $0x30] sm:$0xc0] %v2603_v26  ;;  %v2730_v5 = vld [vmem:[#allocation2 + $0x20] sm:$0xff] }
 0x721   : > { %2608 = vst [vmem:[#allocation2] sm:$0xc0] %v2604_v27  ;;  %v2614_v32 = vpop.permute.xlu1 %2613 }
 0x722   : > { %2609 = vst [vmem:[#allocation2 + $0x18] sm:$0x1] %v2603_v26  ;;  %v2612_v33 = vpop.permute.xlu0 %2611  ;;  %v2889_v26 = vperm.slane %v3564_v25, 0 }
 0x723   : > { %2610 = vst [vmem:[#allocation2 + $0x10] sm:$0x1] %v2604_v27  ;;  %v2615_v34 = vsel %vm1313_vm8, %v2612_v33, %v2614_v32  ;;  %v2616_v35 = vsel %vm1313_vm8, %v2614_v32, %v2612_v33  ;;  %v2890_v27 = vperm.slane %v3564_v25, 1 }
 0x724   : > { %v2623_v36 = vmul.f32 %v2619_v30, %v2616_v35  ;;  %v2624_v39 = vmul.f32 %v2620_v31, %v2615_v34  ;;  %v3566_v35 = vld [vmem:[%s3756_s21 + $0xe] sm:$0x3] }
 0x725   : > { %v2731_v41 = vld [vmem:[#allocation2 + $0x28] sm:$0x7]  ;;  %v2936_v42 = vperm.slane %v3566_v35, 1 }
 0x726   : > { %v2627_v43 = vrot.slane %v2623_v36, 7  ;;  %v2628_v44 = vrot.slane %v2624_v39, 7  ;;  %3557 = vmatpush.msk.msrb.mxu2 %vm2084_vm14, %v2731_v41  ;;  %v2732_v45 = vld [vmem:[#allocation2 + $0x38] sm:$0x7]  ;;  %v3565_v36 = vld [vmem:[%s3756_s21 + $0xc] sm:$0x3] }
 0x727   : > { %3559 = vmatpush.msk.msrb.mxu3 %vm2084_vm14, %v2732_v45  ;;  %v2935_v41 = vperm.slane %v3566_v35, 0 }
 0x728   : > { %2631 = vst [vmem:[#allocation2 + $0x18] sm:$0xe] %v2627_v43  ;;  %2760 = vmatpush.msrb.mxu2 %v2729_v46  ;;  %v2913_v43 = vperm.slane %v3565_v36, 0 }
 0x729   : > { %2632 = vst [vmem:[#allocation2 + $0x10] sm:$0xe] %v2628_v44  ;;  %2780 = vmatpush.msrb.mxu3 %v2730_v5  ;;  %v2550_v51 = vpop.permute.xlu1 %2549  ;;  %v2914_v44 = vperm.slane %v3565_v36, 1 }
 0x72a   : > { %v2568_v52 = vpop.permute.xlu0 %2567  ;;  %v2553_v53 = vsel %vm1248_vm9, %v2550_v51, %v2552_v50  ;;  %v2554_v54 = vsel %vm1248_vm9, %v2552_v50, %v2550_v51 }
 0x72b   : > { %v2569_v55 = vsel %vm1265_vm5, %v2566_v29, %v2568_v52  ;;  %v2570_v56 = vsel %vm1265_vm5, %v2568_v52, %v2566_v29  ;;  %v2561_v57 = vmul.f32 %v2557_v3, %v2554_v54  ;;  %v2562_v58 = vmul.f32 %v2558_v47, %v2553_v53  ;;  %v3567_v54 = vld [vmem:[%s3756_s21 + $0x10] sm:$0x3] }
 0x72c   : > { %v2577_v59 = vmul.f32 %v2573_v48, %v2570_v56  ;;  %v2578_v60 = vmul.f32 %v2574_v49, %v2569_v55 }
 0x72d   : > { %2563 = vst [vmem:[#allocation2 + $0x30] sm:$0x7] %v2561_v57 }
 0x72e   : > { %v2581_v61 = vrot.slane %v2577_v59, 5  ;;  %v2582_v62 = vrot.slane %v2578_v60, 5  ;;  %2564 = vst [vmem:[#allocation2] sm:$0x7] %v2562_v58  ;;  %v2957_v59 = vperm.slane %v3567_v54, 0  ;;  %v2958_v60 = vperm.slane %v3567_v54, 1 }
 0x72f   : > { %v2727_v63 = vld [vmem:[#allocation2 + $0x18] sm:$0xff] }
 0x730   : > { %2585 = vst [vmem:[#allocation2 + $0x30] sm:$0x38] %v2581_v61  ;;  %2761 = vmatpush.msrb.mxu2 %v2727_v63  ;;  %v2728_v0 = vld [vmem:[#allocation2 + $0x10] sm:$0xff] }
 0x731   : > { %2586 = vst [vmem:[#allocation2] sm:$0x38] %v2582_v62  ;;  %2781 = vmatpush.msrb.mxu3 %v2728_v0 }
 0x732   : > { %v2736_v6 = vpop.permute.xlu0 %2735 }
 0x737   : > { %v2725_v2 = vld [vmem:[#allocation2 + $0x30] sm:$0xff] }
 0x738   : > { %2762 = vmatpush.msrb.mxu2 %v2725_v2  ;;  %v2726_v4 = vld [vmem:[#allocation2] sm:$0xff] }
 0x739   : > { %2782 = vmatpush.msrb.mxu3 %v2726_v4  ;;  %3558 = vmatmul.msk.f32.vlgmr.msrb.gmra.mxu2 %vm2080_vm15, %v2440_v1 }
 0x73a   : > { %3560 = vmatmul.msk.f32.vlgmr.msrb.gmra.mxu3 %vm2080_vm15, %v2440_v1 }
 0x7bc   : > { %v2764_v7 = vpop.f32.mrf.mxu2 }
 0x7bd   : > { %v2765_v8 = vadd.f32 %v2764_v7, %v2736_v6  ;;  %v2784_v9 = vpop.f32.mrf.mxu3  ;;  %v3562_v7 = vld [vmem:[%s3756_s21 + $0x4] sm:$0x3] }
 0x7be   : > { %v2785_v10 = vadd.f32 %v2784_v9, %v2736_v6  ;;  %v3563_v6 = vld [vmem:[%s3756_s21 + $0x6] sm:$0x3] }
 0x7bf   : > { %v2787_v11 = vmax.f32 %v2765_v8, 0.0  ;;  %v2859_v8 = vperm.slane %v3563_v6, 0  ;;  %v2860_v9 = vperm.slane %v3563_v6, 1 }
 0x7c0   : > { %v2788_v12 = vmax.f32 %v2785_v10, 0.0  ;;  %v2835_v10 = vperm.slane %v3562_v7, 0 }
 0x7c1   : > { %v2875_v13 = vrot.slane %v2787_v11, 4  ;;  %2905 = vrot.lane.b32.xlu0 %v2787_v11, %s3720_s2  ;;  %2881 = vrot.lane.b32.xlu1 %v2787_v11, %s3721_s7 }
 0x7c2   : > { %v2876_v14 = vrot.slane %v2788_v12, 4  ;;  %2883 = vrot.lane.b32.xlu2 %v2788_v12, %s3721_s7  ;;  %s4472_s7 = smov 17  }
 0x7c3   : > { %2879 = vst [vmem:[#allocation2 + $0x18] sm:$0x70] %v2875_v13 }
 0x7c4   : > { %2880 = vst [vmem:[#allocation2 + $0x10] sm:$0x70] %v2876_v14 }
 0x7c9   : > { %2929 = vrot.lane.b32.xlu0 %v2788_v12, %s3722_s10  ;;  %2907 = vrot.lane.b32.xlu1 %v2788_v12, %s3720_s2  ;;  %s1164_s2 = scalar_lea.vmem %s3896_s27, %s3922_s26 }
 0x7ca   : > { %2927 = vrot.lane.b32.xlu2 %v2787_v11, %s3722_s10  ;;  %s4473_s10 = sld [smem:[#allocation16_spill]] }
 0x7d1   : > { %2827 = vrot.lane.b32.xlu0 %v2787_v11, %s3725_s16  ;;  %2949 = vrot.lane.b32.xlu1 %v2787_v11, %s3723_s11 }
 0x7d2   : > { %2951 = vrot.lane.b32.xlu2 %v2788_v12, %s3723_s11  ;;  %s4474_s11 = sld [smem:[#allocation18_spill]] }
 0x7d9   : > { %2853 = vrot.lane.b32.xlu0 %v2788_v12, %s3726_s18  ;;  %2829 = vrot.lane.b32.xlu1 %v2788_v12, %s3725_s16  ;;  %s4475_s16 = sld [smem:[#allocation3_spill]] }
 0x7da   : > { %2851 = vrot.lane.b32.xlu2 %v2787_v11, %s3726_s18  ;;  %s4476_s18 = sld [smem:[#allocation20_spill]] }
 0x7e0   : > { %s1159_s1 = scalar_lea.vmem %s4476_s18, %s3922_s26 }
 0x7e1   : > { %2789 = vrot.lane.b32.xlu0 %v2787_v11, %s4472_s7  ;;  %2805 = vrot.lane.b32.xlu1 %v2787_v11, %s4466_s15  ;;  %v2836_v11 = vperm.slane %v3562_v7, 1 }
 0x7e2   : > { %2807 = vrot.lane.b32.xlu2 %v2788_v12, %s4466_s15  ;;  %s1154_s15 = scalar_lea.vmem %s4475_s16, %s3922_s26 }
 0x7e9   : > { %2375 = vperm.xlu0 %3639, %v1785_v16   ;;  %2791 = vrot.lane.b32.xlu1 %v2788_v12, %s4472_s7 }
 0x7ea   : > { %2975 = vperm.xlu2 %3640, %v2443_v17  }
 0x7f1   : > { %3031 = vperm.xlu1 %3641, %v2445_v20  }
 0x7f2   : > { %1719 = vperm.xlu2 %3640, %v1190_v21  }
 0x81c   : > { %v2884_v22 = vpop.permute.xlu2 %2883 }
 0x824   : > { %v2928_v23 = vpop.permute.xlu2 %2927 }
 0x82c   : > { %v2952_v24 = vpop.permute.xlu2 %2951 }
 0x833   : > { %v2906_v28 = vpop.permute.xlu0 %2905  ;;  %v2882_v29 = vpop.permute.xlu1 %2881 }
 0x834   : > { %v2852_v30 = vpop.permute.xlu2 %2851  ;;  %v2885_v31 = vsel %vm1339_vm1, %v2882_v29, %v2884_v22  ;;  %v2886_v32 = vsel %vm1339_vm1, %v2884_v22, %v2882_v29 }
 0x835   : > { %v2893_v33 = vmul.f32 %v2889_v26, %v2885_v31  ;;  %v2894_v34 = vmul.f32 %v2890_v27, %v2886_v32  ;;  %v3561_v26 = vld [vmem:[%s3756_s21 + $0x2] sm:$0x3] }
 0x836   : > { %v2814_v35 = vperm.slane %v3561_v26, 1 }
 0x837   : > { %v2897_v39 = vrot.slane %v2893_v33, 1  ;;  %v2898_v40 = vrot.slane %v2894_v34, 1 }
 0x839   : > { %2901 = vst [vmem:[#allocation2 + $0x18] sm:$0x80] %v2897_v39 }
 0x83a   : > { %2902 = vst [vmem:[#allocation2 + $0x10] sm:$0x80] %v2898_v40 }
 0x83b   : > { %2903 = vst [vmem:[#allocation2 + $0x8] sm:$0x3] %v2897_v39  ;;  %v2930_v45 = vpop.permute.xlu0 %2929  ;;  %v2908_v46 = vpop.permute.xlu1 %2907 }
 0x83c   : > { %2904 = vst [vmem:[#allocation2 + $0x20] sm:$0x3] %v2898_v40  ;;  %v4327_v3 = vpop.permute.xlu2 %2807  ;;  %v2931_v47 = vsel %vm1387_vm3, %v2928_v23, %v2930_v45  ;;  %v2932_v5 = vsel %vm1387_vm3, %v2930_v45, %v2928_v23  ;;  %v2909_v48 = vsel %vm1363_vm2, %v2906_v28, %v2908_v46  ;;  %v2910_v49 = vsel %vm1363_vm2, %v2908_v46, %v2906_v28 }
 0x83d   : > { %v2939_v50 = vmul.f32 %v2935_v41, %v2931_v47  ;;  %v2940_v51 = vmul.f32 %v2936_v42, %v2932_v5  ;;  %v2917_v52 = vmul.f32 %v2913_v43, %v2909_v48  ;;  %v2918_v53 = vmul.f32 %v2914_v44, %v2910_v49  ;;  %v2795_v5 = vld [vmem:[%s3756_s21] sm:$0x3] }
 0x83f   : > { %v2943_v55 = vrot.slane %v2939_v50, 3  ;;  %v2944_v56 = vrot.slane %v2940_v51, 3  ;;  %v2921_v57 = vrot.slane %v2917_v52, 6  ;;  %v2922_v58 = vrot.slane %v2918_v53, 6 }
 0x840   : > { %v2798_v50 = vperm.slane %v2795_v5, 1  ;;  %v2797_v51 = vperm.slane %v2795_v5, 0 }
 0x841   : > { %2947 = vst [vmem:[#allocation2 + $0x8] sm:$0xe0] %v2943_v55 }
 0x842   : > { %2948 = vst [vmem:[#allocation2 + $0x20] sm:$0xe0] %v2944_v56 }
 0x843   : > { %2925 = vst [vmem:[#allocation2 + $0x8] sm:$0x1c] %v2921_v57  ;;  %v2828_v61 = vpop.permute.xlu0 %2827  ;;  %v2950_v62 = vpop.permute.xlu1 %2949 }
 0x844   : > { %2926 = vst [vmem:[#allocation2 + $0x20] sm:$0x1c] %v2922_v58  ;;  %v4338_v63 = vpop.permute.xlu2 %2975  ;;  %v2953_v0 = vsel %vm1411_vm4, %v2950_v62, %v2952_v24  ;;  %v2954_v1 = vsel %vm1411_vm4, %v2952_v24, %v2950_v62 }
 0x845   : > { %v2961_v2 = vmul.f32 %v2957_v59, %v2953_v0  ;;  %v2962_v4 = vmul.f32 %v2958_v60, %v2954_v1  ;;  %v2442_v59 = vld [vmem:[%s4473_s10] sm:$0x7] }
 0x847   : > { %2963 = vst [vmem:[#allocation2 + $0x28] sm:$0x7] %v2961_v2 }
 0x848   : > { %2964 = vst [vmem:[#allocation2 + $0x38] sm:$0x7] %v2962_v4  ;;  %v2444_v4 = vld [vmem:[%s4474_s11] sm:$0xff] }
 0x84b   : > { %v2854_v12 = vpop.permute.xlu0 %2853  ;;  %v2830_v13 = vpop.permute.xlu1 %2829  ;;  %v2970_v41 = vld [vmem:[#allocation2 + $0x20] sm:$0xff] }
 0x84c   : > { %v1720_v14 = vpop.permute.xlu2 %1719  ;;  %v2855_v16 = vsel %vm1313_vm8, %v2852_v30, %v2854_v12  ;;  %v2856_v17 = vsel %vm1313_vm8, %v2854_v12, %v2852_v30  ;;  %v2831_v20 = vsel %vm1289_vm6, %v2828_v61, %v2830_v13  ;;  %v2832_v21 = vsel %vm1289_vm6, %v2830_v13, %v2828_v61 }
 0x84d   : > { %v1750_v22 = vadd.f32 %v4090_v37, %v1720_v14  ;;  %v1770_v23 = vadd.f32 %v4092_v38, %v1720_v14  ;;  %v2863_v24 = vmul.f32 %v2859_v8, %v2856_v17  ;;  %v2864_v25 = vmul.f32 %v2860_v9, %v2855_v16  ;;  %v2969_v37 = vld [vmem:[#allocation2 + $0x8] sm:$0xff] }
 0x84e   : > { %v2839_v27 = vmul.f32 %v2835_v10, %v2832_v21  ;;  %v2840_v28 = vmul.f32 %v2836_v11, %v2831_v20  ;;  %v2971_v29 = vld [vmem:[#allocation2 + $0x28] sm:$0x7]  ;;  %v2813_v38 = vperm.slane %v3561_v26, 0 }
 0x84f   : > { %v4357_v31 = vmax.f32 %v1770_v23, 0.0  ;;  %v2867_v30 = vrot.slane %v2863_v24, 7  ;;  %v2868_v32 = vrot.slane %v2864_v25, 7  ;;  %3568 = vmatpush.msk.msra.mxu0 %vm2084_vm14, %v2971_v29  ;;  %v2972_v33 = vld [vmem:[#allocation2 + $0x38] sm:$0x7]  ;;  %v4363_v36 = vmax.f32 %v1750_v22, 0.0 }
 0x850   : > { %v2843_v34 = vrot.slane %v2839_v27, 2  ;;  %3570 = vmatpush.msk.msra.mxu1 %vm2084_vm14, %v2972_v33  ;;  %v2844_v40 = vrot.slane %v2840_v28, 2 }
 0x851   : > { %v3182_v39 = vrot.slane %v4357_v31, 4  ;;  %2871 = vst [vmem:[#allocation2 + $0x18] sm:$0xe] %v2867_v30  ;;  %3000 = vmatpush.msra.mxu0 %v2969_v37 }
 0x852   : > { %2872 = vst [vmem:[#allocation2 + $0x10] sm:$0xe] %v2868_v32  ;;  %3020 = vmatpush.msra.mxu1 %v2970_v41 }
 0x853   : > { %v3183_v42 = vsel %vm1794_vm11, %v4363_v36, %v3182_v39  ;;  %2847 = vst [vmem:[#allocation2 + $0x30] sm:$0xc0] %v2843_v34  ;;  %v2806_v43 = vpop.permute.xlu1 %2805  ;;  %v2790_v52 = vpop.permute.xlu0 %2789 }
 0x854   : > { %3185 = vst [vmem:[%s1164_s2] sm:$0xff] %v3183_v42  ;;  %v2809_v44 = vsel %vm1265_vm5, %v2806_v43, %v4327_v3  ;;  %v2810_v45 = vsel %vm1265_vm5, %v4327_v3, %v2806_v43 }
 0x855   : > { %2848 = vst [vmem:[#allocation2] sm:$0xc0] %v2844_v40  ;;  %v2817_v46 = vmul.f32 %v2813_v38, %v2810_v45  ;;  %v2818_v47 = vmul.f32 %v2814_v35, %v2809_v44 }
 0x856   : > { %2849 = vst [vmem:[#allocation2 + $0x18] sm:$0x1] %v2843_v34 }
 0x857   : > { %2850 = vst [vmem:[#allocation2 + $0x10] sm:$0x1] %v2844_v40  ;;  %v2821_v48 = vrot.slane %v2817_v46, 5  ;;  %v2822_v49 = vrot.slane %v2818_v47, 5 }
 0x859   : > { %2825 = vst [vmem:[#allocation2 + $0x30] sm:$0x38] %v2821_v48 }
 0x85a   : > { %2826 = vst [vmem:[#allocation2] sm:$0x38] %v2822_v49 }
 0x85b   : > { %v2792_v53 = vpop.permute.xlu1 %2791  ;;  %v2376_v7 = vpop.permute.xlu0 %2375 }
 0x85c   : > { %v2793_v54 = vsel %vm1248_vm9, %v2790_v52, %v2792_v53  ;;  %v2794_v3 = vsel %vm1248_vm9, %v2792_v53, %v2790_v52  ;;  %v4390_v8 = vadd.f32 %v4236_v19, %v2376_v7  ;;  %v4393_v9 = vadd.f32 %v4234_v18, %v2376_v7 }
 0x85d   : > { %v2967_v55 = vld [vmem:[#allocation2 + $0x18] sm:$0xff]  ;;  %v2802_v56 = vmul.f32 %v2798_v50, %v2793_v54  ;;  %v2801_v58 = vmul.f32 %v2797_v51, %v2794_v3 }
 0x85e   : > { %3001 = vmatpush.msra.mxu0 %v2967_v55  ;;  %v2968_v57 = vld [vmem:[#allocation2 + $0x10] sm:$0xff]  ;;  %v2428_v10 = vmax.f32 %v4393_v9, 0.0 }
 0x85f   : > { %3021 = vmatpush.msra.mxu1 %v2968_v57  ;;  %2804 = vst [vmem:[#allocation2] sm:$0x7] %v2802_v56 }
 0x860   : > { %2803 = vst [vmem:[#allocation2 + $0x30] sm:$0x7] %v2801_v58  ;;  %v2430_v12 = vmul.f32 0.1, %v2428_v10 }
 0x863   : > { %v3032_v13 = vpop.permute.xlu1 %3031 }
 0x866   : > { %v2966_v60 = vld [vmem:[#allocation2] sm:$0xff] }
 0x867   : > { %v2965_v61 = vld [vmem:[#allocation2 + $0x30] sm:$0xff]  ;;  %3022 = vmatpush.msra.mxu1 %v2966_v60 }
 0x868   : > { %3002 = vmatpush.msra.mxu0 %v2965_v61  ;;  %3571 = vmatmul.msk.f32.vlgmr.msra.gmra.mxu1 %vm2080_vm15, %v2442_v59 }
 0x869   : > { %3569 = vmatmul.msk.f32.vlgmr.msra.gmra.mxu0 %vm2080_vm15, %v2442_v59 }
 0x8e5   : > { %v3024_v62 = vpop.f32.mrf.mxu1 }
 0x8e6   : > { %v3004_v15 = vpop.f32.mrf.mxu0  ;;  %v3025_v0 = vadd.f32 %v3024_v62, %v4338_v63 }
 0x8e7   : > { %v3005_v1 = vadd.f32 %v3004_v15, %v4338_v63  ;;  %v2429_v63 = vmax.f32 %v4390_v8, 0.0 }
 0x8e8   : > { %v3028_v2 = vmax.f32 %v3025_v0, 0.0 }
 0x8e9   : > { %v3027_v6 = vmax.f32 %v3005_v1, 0.0  ;;  %v2431_v11 = vmul.f32 0.1, %v2429_v63 }
 0x8ea   : > { %3574 = vmatpush.msk.msra.mxu3 %vm2084_vm14, %v3028_v2 }
 0x8eb   : > { %3572 = vmatpush.msk.msra.mxu2 %vm2084_vm14, %v3027_v6  ;;  %3575 = vmatmul.msk.f32.vlgmr.msra.gmra.mxu3 %vm2378_vm7, %v2444_v4  ;;  %3642 = vtanh.f32 %v2431_v11 }
 0x8ec   : > { %3573 = vmatmul.msk.f32.vlgmr.msra.gmra.mxu2 %vm2378_vm7, %v2444_v4  ;;  %3644 = vtanh.f32 %v2430_v12 }
 0x8ed   : > { %3646 = vtanh.f32 %v4357_v31 }
 0x8ee   : > { %3648 = vtanh.f32 %v4363_v36 }
 0x8f1   : > { %v3643_v16 = vpop.eup %3642 }
 0x8f2   : > { %v3645_v17 = vpop.eup %3644  ;;  %v2435_v22 = vmul.f32 10.0, %v3643_v16 }
 0x8f3   : > { %v2434_v24 = vmul.f32 10.0, %v3645_v17  ;;  %v4406_v27 = vpop.eup %3646 }
 0x8f4   : > { %v4408_v28 = vpop.eup %3648  ;;  %v3098_v29 = vsub.f32 0.0, %v2435_v22  ;;  %v3092_v32 = vsub.f32 0.0, %v4406_v27 }
 0x8f5   : > { %v3097_v30 = vsub.f32 0.0, %v2434_v24  ;;  %v3091_v33 = vsub.f32 0.0, %v4408_v28 }
 0x8f6   : > { %v3101_v34 = vmul.f32 1.442695, %v3098_v29  ;;  %v3095_v39 = vmul.f32 1.442695, %v3092_v32 }
 0x8f7   : > { %v3099_v38 = vmul.f32 1.442695, %v3097_v30  ;;  %v3093_v41 = vmul.f32 1.442695, %v3091_v33 }
 0x96e   : > { %v3080_v14 = vpop.f32.mrf.mxu3 }
 0x96f   : > { %v3060_v19 = vpop.f32.mrf.mxu2  ;;  %v3081_v18 = vadd.f32 %v3080_v14, %v3032_v13 }
 0x970   : > { %v4403_v20 = vadd.f32 %v3060_v19, %v3032_v13 }
 0x971   : > { %v3084_v21 = vmax.f32 %v3081_v18, 0.0 }
 0x972   : > { %v3083_v23 = vmax.f32 %v4403_v20, 0.0 }
 0x973   : > { %v3086_v25 = vmul.f32 0.1, %v3084_v21 }
 0x974   : > { %v3085_v26 = vmul.f32 0.1, %v3083_v23 }
 0x975   : > { %3650 = vtanh.f32 %v3086_v25 }
 0x976   : > { %3652 = vtanh.f32 %v3085_v26 }
 0x977   : > { %3654 = vpow2.f32 %v3101_v34 }
 0x978   : > { %3656 = vpow2.f32 %v3099_v38 }
 0x979   : > { %3658 = vpow2.f32 %v3095_v39 }
 0x97a   : > { %3660 = vpow2.f32 %v3093_v41 }
 0x97b   : > { %v3651_v37 = vpop.eup %3650 }
 0x97c   : > { %v3653_v35 = vpop.eup %3652  ;;  %v3090_v40 = vmul.f32 10.0, %v3651_v37 }
 0x97d   : > { %v3089_v42 = vmul.f32 10.0, %v3653_v35  ;;  %v3655_v47 = vpop.eup %3654 }
 0x97e   : > { %v3104_v43 = vsub.f32 0.0, %v3090_v40  ;;  %v3657_v5 = vpop.eup %3656  ;;  %v3122_v3 = vrot.slane %v3655_v47, 4 }
 0x97f   : > { %v3103_v44 = vsub.f32 0.0, %v3089_v42  ;;  %v3659_v48 = vpop.eup %3658  ;;  %v3121_v57 = vrot.slane %v3657_v5, 4 }
 0x980   : > { %v3107_v45 = vmul.f32 1.442695, %v3104_v43  ;;  %v3661_v49 = vpop.eup %3660  ;;  %v3118_v50 = vadd.f32 %v3659_v48, %v3655_v47  ;;  %v3112_v56 = vrot.slane %v3659_v48, 4  ;;  %v3126_v62 = vmul.f32 %v3122_v3, %v2429_v63 }
 0x981   : > { %v3105_v46 = vmul.f32 1.442695, %v3103_v44  ;;  %v3117_v52 = vadd.f32 %v3661_v49, %v3657_v5  ;;  %v3111_v61 = vrot.slane %v3661_v49, 4  ;;  %v3125_v4 = vmul.f32 %v3121_v57, %v2428_v10 }
 0x982   : > { %3662 = vpow2.f32 %v3107_v45  ;;  %v3116_v2 = vmul.f32 %v3112_v56, %v4357_v31 }
 0x983   : > { %3664 = vpow2.f32 %v3105_v46  ;;  %v3115_v12 = vmul.f32 %v3111_v61, %v4363_v36 }
 0x984   : > { %v3128_v13 = vadd.f32 %v3126_v62, %v3116_v2 }
 0x985   : > { %v3127_v16 = vadd.f32 %v3125_v4, %v3115_v12 }
 0x988   : > { %v3663_v51 = vpop.eup %3662 }
 0x989   : > { %v3665_v53 = vpop.eup %3664  ;;  %v3130_v54 = vadd.f32 %v3663_v51, %v3118_v50  ;;  %v3134_v58 = vrot.slane %v3663_v51, 4 }
 0x98a   : > { %v3129_v55 = vadd.f32 %v3665_v53, %v3117_v52  ;;  %v3133_v15 = vrot.slane %v3665_v53, 4 }
 0x98b   : > { %3666 = vrcp.f32 %v3130_v54  ;;  %v3138_v6 = vmul.f32 %v3134_v58, %v3084_v21 }
 0x98c   : > { %3668 = vrcp.f32 %v3129_v55  ;;  %v3137_v14 = vmul.f32 %v3133_v15, %v3083_v23  ;;  %v1182_v23 = vld [vmem:[%s1154_s15] sm:$0xff] }
 0x98d   : > { %v3140_v19 = vadd.f32 %v3138_v6, %v3128_v13  ;;  %3670 = vlog2.f32 %v3129_v55 }
 0x98e   : > { %v3139_v10 = vadd.f32 %v3137_v14, %v3127_v16  ;;  %3672 = vlog2.f32 %v3130_v54 }
 0x991   : > { %v3667_v59 = vpop.eup %3666 }
 0x992   : > { %v3669_v60 = vpop.eup %3668  ;;  %v3144_v0 = vmul.f32 %v3667_v59, %v3130_v54 }
 0x993   : > { %v3143_v1 = vmul.f32 %v3669_v60, %v3129_v55  ;;  %v3671_v26 = vpop.eup %3670 }
 0x994   : > { %v3146_v7 = vsub.f32 2.0, %v3144_v0  ;;  %v3673_v29 = vpop.eup %3672  ;;  %v3158_v32 = vmul.f32 0.6931472, %v3671_v26 }
 0x995   : > { %v3145_v11 = vsub.f32 2.0, %v3143_v1  ;;  %v3160_v33 = vmul.f32 0.6931472, %v3673_v29 }
 0x996   : > { %v3148_v8 = vmul.f32 %v3667_v59, %v3146_v7  ;;  %v3161_v34 = vsub.f32 0.0, %v3158_v32 }
 0x997   : > { %v3147_v63 = vmul.f32 %v3669_v60, %v3145_v11  ;;  %v3162_v38 = vsub.f32 0.0, %v3160_v33 }
 0x998   : > { %v3152_v18 = vrot.slane %v3148_v8, 4  ;;  %v3164_v31 = vmul.f32 %v3148_v8, %v3148_v8 }
 0x999   : > { %v3151_v17 = vrot.slane %v3147_v63, 4  ;;  %v3163_v9 = vmul.f32 %v3147_v63, %v3147_v63 }
 0x99a   : > { %v3156_v20 = vmul.f32 %v3152_v18, %v3140_v19  ;;  %3168 = vst.sshfl [vmem:[#allocation1 + $0x8] sm:$0xff pattern:$0x75316420] %v3164_v31 }
 0x99b   : > { %3167 = vst.sshfl [vmem:[#allocation1] sm:$0xff pattern:$0x75316420] %v3163_v9  ;;  %v3155_v36 = vmul.f32 %v3151_v17, %v3139_v10 }
 0x99c   : > { %v3175_v21 = vrot.slane %v3156_v20, 4 }
 0x99e   : > { %v3176_v22 = vsel %vm1794_vm11, %v3155_v36, %v3175_v21 }
 0x99f   : > { %3194 = vst [vmem:[%s1174_s23] sm:$0xff] %v3176_v22 }
 0x9a2   : > { %v3170_v24 = vld [vmem:[#allocation1 + $0x1] ss:$2 sm:$0xff] }
 0x9a3   : > { %v3172_v25 = vmul.f32 %v3170_v24, %v1182_v23  ;;  %3188 = vst.sshfl [vmem:[#allocation1] sm:$0xff pattern:$0x75316420] %v4408_v28 }
 0x9a4   : > { %3189 = vst.sshfl [vmem:[#allocation1 + $0x8] sm:$0xff pattern:$0x75316420] %v4406_v27 }
 0x9a5   : > { %v3178_v30 = vadd.f32 %v3176_v22, %v3172_v25 }
 0x9a7   : > { %3179 = vst [vmem:[%s1159_s1] sm:$0xff] %v3178_v30 }
 0x9ab   : > { %v3191_v37 = vld [vmem:[#allocation1 + $0x1] ss:$2 sm:$0xff] }
 0x9ac   : > { %3193 = vst [vmem:[%s1169_s28] sm:$0xff] %v3191_v37 }
 0x9ad   : > { %3197 = vst.sshfl [vmem:[#allocation1] sm:$0xff pattern:$0x75316420] %v3161_v34 }
 0x9ae   : > { %3198 = vst.sshfl [vmem:[#allocation1 + $0x8] sm:$0xff pattern:$0x75316420] %v3162_v38 }
 0x9b5   : > { %v3200_v28 = vld [vmem:[#allocation1 + $0x1] ss:$2 sm:$0xff] }
 0x9b6   : > { %3202 = vst [vmem:[%s1179_s0] sm:$0xff] %v3200_v28 }
 0x9b7 PF: > { %s82_s22 = sadd.s32 1, %s3682_s22  }
 0x9b8   : > { %p79_p4 = scmp.ge.s32.totalorder %s82_s22, 4  }
 0x9ba   :  { %81 = sbr.rel (!%p79_p4) target bundleno = 59 (0x3b), region = 276 }

</bundles_post_ra>
